<compile_context>
chip_gen: v7x
topology: tpu7x:2x2x1
jax: 0.10.0
libtpu: 0.0.40
codegen_flags: <defaults>
</compile_context>

<pallas_src>
import functools

import jax
import jax.numpy as jnp
from jax.experimental import pallas as pl
from jax.experimental.pallas import tpu as pltpu

THRESHOLD = 1.0
V_RESET = 0.0
DECAY = 0.5
EPS = 1e-5
TIME_WINDOW = 8  # module default is 16; kept small for the demo


# ------------------------------ Pallas kernels ------------------------------ #

def _matmul_bias_kernel(a_ref, b_ref, bias_ref, o_ref):
    o_ref[...] = (
        jnp.dot(a_ref[...], b_ref[...], preferred_element_type=jnp.float32)
        + bias_ref[...]
    )


def matmul_bias(a, b, bias):
    """(M,K)@(K,N) + bias(N,), bf16 operands, f32 accumulate.  Single block."""
    M, K = a.shape
    _, N = b.shape
    return pl.pallas_call(
        _matmul_bias_kernel,
        out_shape=jax.ShapeDtypeStruct((M, N), jnp.float32),
        grid=(1,),
        in_specs=[
            pl.BlockSpec((M, K), lambda i: (0, 0)),
            pl.BlockSpec((K, N), lambda i: (0, 0)),
            pl.BlockSpec((1, N), lambda i: (0, 0)),
        ],
        out_specs=pl.BlockSpec((M, N), lambda i: (0, 0)),
    )(a.astype(jnp.bfloat16), b.astype(jnp.bfloat16),
      bias.reshape(1, N).astype(jnp.float32))


def _popnorm_lif(z, gamma, beta, v_ref):
    """PopNorm (layernorm over all per-sample features) + LIF membrane update."""
    mean = jnp.mean(z, axis=1, keepdims=True)
    var = jnp.mean((z - mean) ** 2, axis=1, keepdims=True)
    xhat = (z - mean) * jax.lax.rsqrt(var + EPS)
    y = xhat * gamma + beta
    v = DECAY * v_ref[...] + y
    spike = (v >= THRESHOLD).astype(jnp.float32)
    v_ref[...] = jnp.where(spike > 0.0, V_RESET, v)
    return spike


def _lif(x, v_ref):
    v = DECAY * v_ref[...] + x
    spike = (v >= THRESHOLD).astype(jnp.float32)
    v_ref[...] = jnp.where(spike > 0.0, V_RESET, v)
    return spike


def _fused_time_step_kernel(
    z1_ref, g1_ref, bt1_ref,
    m2_ref, b2_ref, g2_ref, bt2_ref,
    m3_ref, b3_ref, g3_ref, bt3_ref,
    fc1w_ref, fc1b_ref, fc2w_ref,
    q_ref,
    v1_ref, v2_ref, v3_ref, v4_ref, qacc_ref,
):
    t = pl.program_id(0)
    n_t = pl.num_programs(0)

    @pl.when(t == 0)
    def _init():  # forward() calls reset(): membrane potentials start at v_reset
        v1_ref[...] = jnp.full_like(v1_ref, V_RESET)
        v2_ref[...] = jnp.full_like(v2_ref, V_RESET)
        v3_ref[...] = jnp.full_like(v3_ref, V_RESET)
        v4_ref[...] = jnp.full_like(v4_ref, V_RESET)
        qacc_ref[...] = jnp.zeros_like(qacc_ref)

    # block 1: PopNorm + LIF on the hoisted, loop-invariant conv1 output.
    s1 = _popnorm_lif(z1_ref[...], g1_ref[...], bt1_ref[...], v1_ref)
    # block 2: conv2 as a dense NHWC feature matmul (bf16 on the MXU).
    z2 = jnp.dot(s1.astype(m2_ref.dtype), m2_ref[...],
                 preferred_element_type=jnp.float32) + b2_ref[...]
    s2 = _popnorm_lif(z2, g2_ref[...], bt2_ref[...], v2_ref)
    # block 3: conv3 (kernel covers the full spatial extent -> plain matmul).
    z3 = jnp.dot(s2.astype(m3_ref.dtype), m3_ref[...],
                 preferred_element_type=jnp.float32) + b3_ref[...]
    s3 = _popnorm_lif(z3, g3_ref[...], bt3_ref[...], v3_ref)
    # FC head: Linear(feat, 512) + LIF, then Linear(512, A) with no bias.
    h = jnp.dot(s3.astype(fc1w_ref.dtype), fc1w_ref[...],
                preferred_element_type=jnp.float32) + fc1b_ref[...]
    s4 = _lif(h, v4_ref)
    q = jnp.dot(s4.astype(fc2w_ref.dtype), fc2w_ref[...],
                preferred_element_type=jnp.float32)
    qacc_ref[...] += q

    @pl.when(t == n_t - 1)
    def _finalize():  # Q = sum(qs) / time_window, written once, lane-dense
        q_ref[...] = qacc_ref[...] * (1.0 / n_t)


# ------------------------- layout / conv plumbing --------------------------- #

def _conv_out(s, k, st):
    return (s - k) // st + 1


def _im2col_nhwc(x_nhwc, kh, kw, stride):
    """NHWC -> (B*Ho*Wo, KH*KW*C) patch matrix (kernel-position-major columns)."""
    B, H, W, C = x_nhwc.shape
    Ho = _conv_out(H, kh, stride)
    Wo = _conv_out(W, kw, stride)
    cols = []
    for i in range(kh):
        for j in range(kw):
            cols.append(
                x_nhwc[:, i:i + Ho * stride:stride, j:j + Wo * stride:stride, :])
    p = jnp.stack(cols, axis=3)                       # (B, Ho, Wo, KH*KW, C)
    return p.reshape(B * Ho * Wo, kh * kw * C), Ho, Wo


def _conv_weight_as_patch_matrix(w):
    """(Cout,Cin,KH,KW) -> (KH*KW*Cin, Cout) matching _im2col_nhwc columns."""
    Cout, Cin, KH, KW = w.shape
    return jnp.transpose(w, (2, 3, 1, 0)).reshape(KH * KW * Cin, Cout)


def _conv_as_dense_nhwc_matrix(w, H, W, stride):
    """Unfold a valid conv into a dense (H*W*Cin, Ho*Wo*Cout) matrix acting on
    NHWC-flattened features: z_out = z_in_flat @ M (per sample)."""
    Cout, Cin, KH, KW = w.shape
    Ho = _conv_out(H, KH, stride)
    Wo = _conv_out(W, KW, stride)
    row_hit = (jnp.arange(H)[:, None, None]
               == stride * jnp.arange(Ho)[None, :, None]
               + jnp.arange(KH)[None, None, :]).astype(w.dtype)   # (H, Ho, KH)
    col_hit = (jnp.arange(W)[:, None, None]
               == stride * jnp.arange(Wo)[None, :, None]
               + jnp.arange(KW)[None, None, :]).astype(w.dtype)   # (W, Wo, KW)
    m = jnp.einsum('hpi,wqj,ocij->hwcpqo', row_hit, col_hit, w)
    return m.reshape(H * W * Cin, Ho * Wo * Cout)


def _chw_affine_to_nhwc_row(v, C, H, W):
    """PopNorm affine param stored as [C,H,W] -> (1, H*W*C) NHWC-flat row."""
    return jnp.transpose(v.reshape(C, H, W), (1, 2, 0)).reshape(1, H * W * C)


# ----------------------------- params & forward ----------------------------- #

def init_params(key, c, h, w, action_dim):
    h1, w1 = _conv_out(h, 8, 4), _conv_out(w, 8, 4)
    h2, w2 = _conv_out(h1, 4, 2), _conv_out(w1, 4, 2)
    h3, w3 = _conv_out(h2, 3, 1), _conv_out(w2, 3, 1)
    feat_dim = 64 * h3 * w3

    ks = jax.random.split(key, 5)

    def winit(k, shape, fan_in):
        return jax.random.normal(k, shape, jnp.float32) / jnp.sqrt(float(fan_in))

    return dict(
        conv1_w=winit(ks[0], (32, c, 8, 8), c * 8 * 8),
        conv1_b=jnp.zeros((32,), jnp.float32),
        norm1_w=jnp.ones((32, h1, w1), jnp.float32),
        norm1_b=jnp.zeros((32, h1, w1), jnp.float32),
        conv2_w=winit(ks[1], (64, 32, 4, 4), 32 * 4 * 4),
        conv2_b=jnp.zeros((64,), jnp.float32),
        norm2_w=jnp.ones((64, h2, w2), jnp.float32),
        norm2_b=jnp.zeros((64, h2, w2), jnp.float32),
        conv3_w=winit(ks[2], (64, 64, 3, 3), 64 * 3 * 3),
        conv3_b=jnp.zeros((64,), jnp.float32),
        norm3_w=jnp.ones((64, h3, w3), jnp.float32),
        norm3_b=jnp.zeros((64, h3, w3), jnp.float32),
        fc1_w=winit(ks[3], (feat_dim, 512), feat_dim),
        fc1_b=jnp.zeros((512,), jnp.float32),
        fc2_w=winit(ks[4], (512, action_dim), 512),   # Linear(512, A, bias=False)
    )


@functools.partial(jax.jit, static_argnames=("time_window",))
def spiking_dqn_forward(x, params, time_window=TIME_WINDOW):
    """Mapping: x -> Q(x, *).  Returns (B, action_dim) = mean over T spike steps."""
    p = params
    x = x.astype(jnp.float32) / 255.0
    B = x.shape[0]

    # ---- conv1, hoisted out of the time loop (its input never changes) ----- #
    x_nhwc = jnp.transpose(x, (0, 2, 3, 1))                       # once per call
    patches, H1, W1 = _im2col_nhwc(x_nhwc, 8, 8, 4)
    z1_rows = matmul_bias(patches, _conv_weight_as_patch_matrix(p["conv1_w"]),
                          p["conv1_b"])                  # (B*H1*W1, 32), NHWC rows
    C1 = 32
    F1 = H1 * W1 * C1
    z1 = z1_rows.reshape(B, F1)                          # pure reshape, no transpose

    # static shapes of the remaining layers
    C2, C3 = 64, 64
    H2, W2 = _conv_out(H1, 4, 2), _conv_out(W1, 4, 2)
    H3, W3 = _conv_out(H2, 3, 1), _conv_out(W2, 3, 1)
    F2, F3 = H2 * W2 * C2, H3 * W3 * C3
    A = p["fc2_w"].shape[1]
    A_pad = ((A + 127) // 128) * 128                     # lane-dense fc2 output

    # ---- loop-invariant operands (built once per call, VMEM-resident) ------ #
    m2 = _conv_as_dense_nhwc_matrix(p["conv2_w"], H1, W1, 2).astype(jnp.bfloat16)
    m3 = _conv_as_dense_nhwc_matrix(p["conv3_w"], H2, W2, 1).astype(jnp.bfloat16)
    b2 = jnp.tile(p["conv2_b"], H2 * W2).reshape(1, F2)
    b3 = jnp.tile(p["conv3_b"], H3 * W3).reshape(1, F3)
    g1 = _chw_affine_to_nhwc_row(p["norm1_w"], C1, H1, W1)
    bt1 = _chw_affine_to_nhwc_row(p["norm1_b"], C1, H1, W1)
    g2 = _chw_affine_to_nhwc_row(p["norm2_w"], C2, H2, W2)
    bt2 = _chw_affine_to_nhwc_row(p["norm2_b"], C2, H2, W2)
    g3 = _chw_affine_to_nhwc_row(p["norm3_w"], C3, H3, W3)
    bt3 = _chw_affine_to_nhwc_row(p["norm3_b"], C3, H3, W3)
    # fc1 expects NCHW-flattened features; permute its rows to NHWC order once.
    fc1w = (p["fc1_w"].reshape(C3, H3, W3, 512)
            .transpose(1, 2, 0, 3).reshape(F3, 512).astype(jnp.bfloat16))
    fc1b = p["fc1_b"].reshape(1, 512)
    fc2w = jnp.zeros((512, A_pad), jnp.float32).at[:, :A].set(p["fc2_w"])
    fc2w = fc2w.astype(jnp.bfloat16)

    # ---- whole time loop as ONE pallas_call; state lives in VMEM scratch --- #
    inv = lambda t: (0, 0)                 # every operand is loop-invariant
    full = lambda arr: pl.BlockSpec(arr.shape, inv)
    operands = (z1, g1, bt1, m2, b2, g2, bt2, m3, b3, g3, bt3, fc1w, fc1b, fc2w)

    q_pad = pl.pallas_call(
        _fused_time_step_kernel,
        out_shape=jax.ShapeDtypeStruct((B, A_pad), jnp.float32),
        grid=(time_window,),
        in_specs=[full(a) for a in operands],
        out_specs=pl.BlockSpec((B, A_pad), inv),
        scratch_shapes=[
            pltpu.VMEM((B, F1), jnp.float32),    # v1 membrane potential
            pltpu.VMEM((B, F2), jnp.float32),    # v2
            pltpu.VMEM((B, F3), jnp.float32),    # v3
            pltpu.VMEM((B, 512), jnp.float32),   # v4
            pltpu.VMEM((B, A_pad), jnp.float32),  # Q accumulator over T
        ],
        compiler_params=pltpu.CompilerParams(
            dimension_semantics=("arbitrary",)),  # state carries across time
    )(*operands)

    return q_pad[:, :A]


if __name__ == "__main__":
    key = jax.random.PRNGKey(0)
    kx, kp = jax.random.split(key)

    B, C, H, W = 2, 4, 36, 36          # small input; conv stack: 36 -> 8 -> 3 -> 1
    action_dim = 6

    x = jax.random.uniform(kx, (B, C, H, W), jnp.float32, 0.0, 255.0)
    params = init_params(kp, C, H, W, action_dim)

    q = spiking_dqn_forward(x, params)
    jax.block_until_ready(q)
    assert q.shape == (B, action_dim), q.shape
    assert q.dtype == jnp.float32
    assert bool(jnp.all(jnp.isfinite(q)))
    print("KERNEL_OK")
</pallas_src>

<mosaic_0001>
module attributes {stable_mosaic.version = 11 : i64} {
  func.func @_matmul_bias_kernel(%arg0: i32, %arg1: memref<128x256xbf16, #tpu.memory_space<vmem>>, %arg2: memref<256x32xbf16, #tpu.memory_space<vmem>>, %arg3: memref<1x32xf32, #tpu.memory_space<vmem>>, %arg4: memref<128x32xf32, #tpu.memory_space<vmem>>) attributes {dimension_semantics = [#tpu.dimension_semantics<arbitrary>], iteration_bounds = array<i64: 1>, scalar_prefetch = 0 : i64, scratch_operands = 0 : i64, tpu.core_type = #tpu.core_type<tc>, window_params = [{pipeline_mode = #tpu.pipeline_mode<synchronous>, transform_indices = @transform_0, window_bounds = array<i64: 128, 256>}, {pipeline_mode = #tpu.pipeline_mode<synchronous>, transform_indices = @transform_1, window_bounds = array<i64: 256, 32>}, {pipeline_mode = #tpu.pipeline_mode<synchronous>, transform_indices = @transform_2, window_bounds = array<i64: 1, 32>}, {pipeline_mode = #tpu.pipeline_mode<synchronous>, transform_indices = @transform_3, window_bounds = array<i64: 128, 32>}]} {
    %c0 = arith.constant 0 : index
    %c0_0 = arith.constant 0 : index
    %0 = vector.load %arg1[%c0, %c0_0] : memref<128x256xbf16, #tpu.memory_space<vmem>>, vector<128x256xbf16>
    %c0_1 = arith.constant 0 : index
    %c0_2 = arith.constant 0 : index
    %1 = vector.load %arg2[%c0_1, %c0_2] : memref<256x32xbf16, #tpu.memory_space<vmem>>, vector<256x32xbf16>
    %cst = arith.constant dense<0.000000e+00> : vector<128x32xf32>
    %2 = tpu.matmul %0, %1, %cst {dimension_numbers = #tpu.dot_dimension_numbers<[1], [0], [0], [1], [0, 0, 1, 1], [], []>} : vector<128x256xbf16>, vector<256x32xbf16>, vector<128x32xf32> -> vector<128x32xf32>
    %c0_3 = arith.constant 0 : index
    %c0_4 = arith.constant 0 : index
    %3 = vector.load %arg3[%c0_3, %c0_4] : memref<1x32xf32, #tpu.memory_space<vmem>>, vector<1x32xf32>
    %4 = vector.broadcast %3 : vector<1x32xf32> to vector<128x32xf32>
    %5 = arith.addf %2, %4 : vector<128x32xf32>
    %c0_5 = arith.constant 0 : index
    %c0_6 = arith.constant 0 : index
    %6 = vector.load %arg4[%c0_5, %c0_6] : memref<128x32xf32, #tpu.memory_space<vmem>>, vector<128x32xf32>
    tpu.vector_store %arg4[%c0_5, %c0_6], %5 {strides = array<i32>} : memref<128x32xf32, #tpu.memory_space<vmem>>, vector<128x32xf32>,
    return
  }
  func.func @transform_0(%arg0: i32) -> (i32, i32) {
    %c0_i32 = arith.constant 0 : i32
    %c0_i32_0 = arith.constant 0 : i32
    %c0_i32_1 = arith.constant 0 : i32
    return %c0_i32, %c0_i32_0 : i32, i32
  }
  func.func @transform_1(%arg0: i32) -> (i32, i32) {
    %c0_i32 = arith.constant 0 : i32
    %c0_i32_0 = arith.constant 0 : i32
    %c0_i32_1 = arith.constant 0 : i32
    return %c0_i32, %c0_i32_0 : i32, i32
  }
  func.func @transform_2(%arg0: i32) -> (i32, i32) {
    %c0_i32 = arith.constant 0 : i32
    %c0_i32_0 = arith.constant 0 : i32
    %c0_i32_1 = arith.constant 0 : i32
    return %c0_i32, %c0_i32_0 : i32, i32
  }
  func.func @transform_3(%arg0: i32) -> (i32, i32) {
    %c0_i32 = arith.constant 0 : i32
    %c0_i32_0 = arith.constant 0 : i32
    %c0_i32_1 = arith.constant 0 : i32
    return %c0_i32, %c0_i32_0 : i32, i32
  }
}

module attributes {stable_mosaic.version = 11 : i64} {
  func.func @_fused_time_step_kernel(%arg0: i32, %arg1: memref<2x2048xf32, #tpu.memory_space<vmem>>, %arg2: memref<1x2048xf32, #tpu.memory_space<vmem>>, %arg3: memref<1x2048xf32, #tpu.memory_space<vmem>>, %arg4: memref<2048x576xbf16, #tpu.memory_space<vmem>>, %arg5: memref<1x576xf32, #tpu.memory_space<vmem>>, %arg6: memref<1x576xf32, #tpu.memory_space<vmem>>, %arg7: memref<1x576xf32, #tpu.memory_space<vmem>>, %arg8: memref<576x64xbf16, #tpu.memory_space<vmem>>, %arg9: memref<1x64xf32, #tpu.memory_space<vmem>>, %arg10: memref<1x64xf32, #tpu.memory_space<vmem>>, %arg11: memref<1x64xf32, #tpu.memory_space<vmem>>, %arg12: memref<64x512xbf16, #tpu.memory_space<vmem>>, %arg13: memref<1x512xf32, #tpu.memory_space<vmem>>, %arg14: memref<512x128xbf16, #tpu.memory_space<vmem>>, %arg15: memref<2x128xf32, #tpu.memory_space<vmem>>, %arg16: memref<2x2048xf32, #tpu.memory_space<vmem>>, %arg17: memref<2x576xf32, #tpu.memory_space<vmem>>, %arg18: memref<2x64xf32, #tpu.memory_space<vmem>>, %arg19: memref<2x512xf32, #tpu.memory_space<vmem>>, %arg20: memref<2x128xf32, #tpu.memory_space<vmem>>) attributes {dimension_semantics = [#tpu.dimension_semantics<arbitrary>], iteration_bounds = array<i64: 8>, scalar_prefetch = 0 : i64, scratch_operands = 5 : i64, tpu.core_type = #tpu.core_type<tc>, window_params = [{pipeline_mode = #tpu.pipeline_mode<synchronous>, transform_indices = @transform_0, window_bounds = array<i64: 2, 2048>}, {pipeline_mode = #tpu.pipeline_mode<synchronous>, transform_indices = @transform_1, window_bounds = array<i64: 1, 2048>}, {pipeline_mode = #tpu.pipeline_mode<synchronous>, transform_indices = @transform_2, window_bounds = array<i64: 1, 2048>}, {pipeline_mode = #tpu.pipeline_mode<synchronous>, transform_indices = @transform_3, window_bounds = array<i64: 2048, 576>}, {pipeline_mode = #tpu.pipeline_mode<synchronous>, transform_indices = @transform_4, window_bounds = array<i64: 1, 576>}, {pipeline_mode = #tpu.pipeline_mode<synchronous>, transform_indices = @transform_5, window_bounds = array<i64: 1, 576>}, {pipeline_mode = #tpu.pipeline_mode<synchronous>, transform_indices = @transform_6, window_bounds = array<i64: 1, 576>}, {pipeline_mode = #tpu.pipeline_mode<synchronous>, transform_indices = @transform_7, window_bounds = array<i64: 576, 64>}, {pipeline_mode = #tpu.pipeline_mode<synchronous>, transform_indices = @transform_8, window_bounds = array<i64: 1, 64>}, {pipeline_mode = #tpu.pipeline_mode<synchronous>, transform_indices = @transform_9, window_bounds = array<i64: 1, 64>}, {pipeline_mode = #tpu.pipeline_mode<synchronous>, transform_indices = @transform_10, window_bounds = array<i64: 1, 64>}, {pipeline_mode = #tpu.pipeline_mode<synchronous>, transform_indices = @transform_11, window_bounds = array<i64: 64, 512>}, {pipeline_mode = #tpu.pipeline_mode<synchronous>, transform_indices = @transform_12, window_bounds = array<i64: 1, 512>}, {pipeline_mode = #tpu.pipeline_mode<synchronous>, transform_indices = @transform_13, window_bounds = array<i64: 512, 128>}, {pipeline_mode = #tpu.pipeline_mode<synchronous>, transform_indices = @transform_14, window_bounds = array<i64: 2, 128>}]} {
    %c0_i32 = arith.constant 0 : i32
    %0 = arith.cmpi eq, %arg0, %c0_i32 : i32
    %1 = arith.extui %0 : i1 to i32
    %c0_i32_0 = arith.constant 0 : i32
    %2 = arith.cmpi ne, %1, %c0_i32_0 : i32
    scf.if %2 {
      %cst_83 = arith.constant 0.000000e+00 : f32
      %155 = vector.broadcast %cst_83 : f32 to vector<2x2048xf32>
      %c0_84 = arith.constant 0 : index
      %c0_85 = arith.constant 0 : index
      %156 = vector.load %arg16[%c0_84, %c0_85] : memref<2x2048xf32, #tpu.memory_space<vmem>>, vector<2x2048xf32>
      tpu.vector_store %arg16[%c0_84, %c0_85], %155 {strides = array<i32>} : memref<2x2048xf32, #tpu.memory_space<vmem>>, vector<2x2048xf32>,
      %cst_86 = arith.constant 0.000000e+00 : f32
      %157 = vector.broadcast %cst_86 : f32 to vector<2x576xf32>
      %c0_87 = arith.constant 0 : index
      %c0_88 = arith.constant 0 : index
      %158 = vector.load %arg17[%c0_87, %c0_88] : memref<2x576xf32, #tpu.memory_space<vmem>>, vector<2x576xf32>
      tpu.vector_store %arg17[%c0_87, %c0_88], %157 {strides = array<i32>} : memref<2x576xf32, #tpu.memory_space<vmem>>, vector<2x576xf32>,
      %cst_89 = arith.constant 0.000000e+00 : f32
      %159 = vector.broadcast %cst_89 : f32 to vector<2x64xf32>
      %c0_90 = arith.constant 0 : index
      %c0_91 = arith.constant 0 : index
      %160 = vector.load %arg18[%c0_90, %c0_91] : memref<2x64xf32, #tpu.memory_space<vmem>>, vector<2x64xf32>
      tpu.vector_store %arg18[%c0_90, %c0_91], %159 {strides = array<i32>} : memref<2x64xf32, #tpu.memory_space<vmem>>, vector<2x64xf32>,
      %cst_92 = arith.constant 0.000000e+00 : f32
      %161 = vector.broadcast %cst_92 : f32 to vector<2x512xf32>
      %c0_93 = arith.constant 0 : index
      %c0_94 = arith.constant 0 : index
      %162 = vector.load %arg19[%c0_93, %c0_94] : memref<2x512xf32, #tpu.memory_space<vmem>>, vector<2x512xf32>
      tpu.vector_store %arg19[%c0_93, %c0_94], %161 {strides = array<i32>} : memref<2x512xf32, #tpu.memory_space<vmem>>, vector<2x512xf32>,
      %cst_95 = arith.constant 0.000000e+00 : f32
      %163 = vector.broadcast %cst_95 : f32 to vector<2x128xf32>
      %c0_96 = arith.constant 0 : index
      %c0_97 = arith.constant 0 : index
      %164 = vector.load %arg20[%c0_96, %c0_97] : memref<2x128xf32, #tpu.memory_space<vmem>>, vector<2x128xf32>
      tpu.vector_store %arg20[%c0_96, %c0_97], %163 {strides = array<i32>} : memref<2x128xf32, #tpu.memory_space<vmem>>, vector<2x128xf32>,
    } else {
    }
    %c0 = arith.constant 0 : index
    %c0_1 = arith.constant 0 : index
    %3 = vector.load %arg1[%c0, %c0_1] : memref<2x2048xf32, #tpu.memory_space<vmem>>, vector<2x2048xf32>
    %c0_2 = arith.constant 0 : index
    %c0_3 = arith.constant 0 : index
    %4 = vector.load %arg2[%c0_2, %c0_3] : memref<1x2048xf32, #tpu.memory_space<vmem>>, vector<1x2048xf32>
    %c0_4 = arith.constant 0 : index
    %c0_5 = arith.constant 0 : index
    %5 = vector.load %arg3[%c0_4, %c0_5] : memref<1x2048xf32, #tpu.memory_space<vmem>>, vector<1x2048xf32>
    %cst = arith.constant dense<0.000000e+00> : vector<2xf32>
    %6 = vector.multi_reduction <add>, %3, %cst [1] : vector<2x2048xf32> to vector<2xf32>
    %7 = vector.shape_cast %6 : vector<2xf32> to vector<2x1xf32>
    %cst_6 = arith.constant 2.048000e+03 : f32
    %8 = vector.broadcast %cst_6 : f32 to vector<2x1xf32>
    %9 = arith.divf %7, %8 : vector<2x1xf32>
    %10 = vector.broadcast %9 : vector<2x1xf32> to vector<2x2048xf32>
    %11 = arith.subf %3, %10 : vector<2x2048xf32>
    %12 = arith.mulf %11, %11 : vector<2x2048xf32>
    %cst_7 = arith.constant dense<0.000000e+00> : vector<2xf32>
    %13 = vector.multi_reduction <add>, %12, %cst_7 [1] : vector<2x2048xf32> to vector<2xf32>
    %14 = vector.shape_cast %13 : vector<2xf32> to vector<2x1xf32>
    %cst_8 = arith.constant 2.048000e+03 : f32
    %15 = vector.broadcast %cst_8 : f32 to vector<2x1xf32>
    %16 = arith.divf %14, %15 : vector<2x1xf32>
    %17 = vector.broadcast %9 : vector<2x1xf32> to vector<2x2048xf32>
    %18 = arith.subf %3, %17 : vector<2x2048xf32>
    %cst_9 = arith.constant 9.99999974E-6 : f32
    %19 = vector.broadcast %cst_9 : f32 to vector<2x1xf32>
    %20 = arith.addf %16, %19 : vector<2x1xf32>
    %21 = math.rsqrt %20 : vector<2x1xf32>
    %22 = vector.broadcast %21 : vector<2x1xf32> to vector<2x2048xf32>
    %23 = arith.mulf %18, %22 : vector<2x2048xf32>
    %24 = vector.broadcast %4 : vector<1x2048xf32> to vector<2x2048xf32>
    %25 = arith.mulf %23, %24 : vector<2x2048xf32>
    %26 = vector.broadcast %5 : vector<1x2048xf32> to vector<2x2048xf32>
    %27 = arith.addf %25, %26 : vector<2x2048xf32>
    %c0_10 = arith.constant 0 : index
    %c0_11 = arith.constant 0 : index
    %28 = vector.load %arg16[%c0_10, %c0_11] : memref<2x2048xf32, #tpu.memory_space<vmem>>, vector<2x2048xf32>
    %cst_12 = arith.constant 5.000000e-01 : f32
    %29 = vector.broadcast %cst_12 : f32 to vector<2x2048xf32>
    %30 = arith.mulf %29, %28 : vector<2x2048xf32>
    %31 = arith.addf %30, %27 : vector<2x2048xf32>
    %cst_13 = arith.constant 1.000000e+00 : f32
    %32 = vector.broadcast %cst_13 : f32 to vector<2x2048xf32>
    %33 = arith.cmpf oge, %31, %32 : vector<2x2048xf32>
    %34 = arith.extui %33 : vector<2x2048xi1> to vector<2x2048xi32>
    %35 = arith.sitofp %34 : vector<2x2048xi32> to vector<2x2048xf32>
    %cst_14 = arith.constant 0.000000e+00 : f32
    %36 = vector.broadcast %cst_14 : f32 to vector<2x2048xf32>
    %37 = arith.cmpf ogt, %35, %36 : vector<2x2048xf32>
    %cst_15 = arith.constant 0.000000e+00 : f32
    %38 = vector.broadcast %cst_15 : f32 to vector<2x2048xf32>
    %39 = arith.select %37, %38, %31 : vector<2x2048xi1>, vector<2x2048xf32>
    %c0_16 = arith.constant 0 : index
    %c0_17 = arith.constant 0 : index
    %40 = vector.load %arg16[%c0_16, %c0_17] : memref<2x2048xf32, #tpu.memory_space<vmem>>, vector<2x2048xf32>
    tpu.vector_store %arg16[%c0_16, %c0_17], %39 {strides = array<i32>} : memref<2x2048xf32, #tpu.memory_space<vmem>>, vector<2x2048xf32>,
    %41 = arith.truncf %35 : vector<2x2048xf32> to vector<2x2048xbf16>
    %c0_18 = arith.constant 0 : index
    %c0_19 = arith.constant 0 : index
    %42 = vector.load %arg4[%c0_18, %c0_19] : memref<2048x576xbf16, #tpu.memory_space<vmem>>, vector<2048x576xbf16>
    %cst_20 = arith.constant dense<0.000000e+00> : vector<2x576xf32>
    %43 = tpu.matmul %41, %42, %cst_20 {dimension_numbers = #tpu.dot_dimension_numbers<[1], [0], [0], [1], [0, 0, 1, 1], [], []>} : vector<2x2048xbf16>, vector<2048x576xbf16>, vector<2x576xf32> -> vector<2x576xf32>
    %c0_21 = arith.constant 0 : index
    %c0_22 = arith.constant 0 : index
    %44 = vector.load %arg5[%c0_21, %c0_22] : memref<1x576xf32, #tpu.memory_space<vmem>>, vector<1x576xf32>
    %45 = vector.broadcast %44 : vector<1x576xf32> to vector<2x576xf32>
    %46 = arith.addf %43, %45 : vector<2x576xf32>
    %c0_23 = arith.constant 0 : index
    %c0_24 = arith.constant 0 : index
    %47 = vector.load %arg6[%c0_23, %c0_24] : memref<1x576xf32, #tpu.memory_space<vmem>>, vector<1x576xf32>
    %c0_25 = arith.constant 0 : index
    %c0_26 = arith.constant 0 : index
    %48 = vector.load %arg7[%c0_25, %c0_26] : memref<1x576xf32, #tpu.memory_space<vmem>>, vector<1x576xf32>
    %cst_27 = arith.constant dense<0.000000e+00> : vector<2xf32>
    %49 = vector.multi_reduction <add>, %46, %cst_27 [1] : vector<2x576xf32> to vector<2xf32>
    %50 = vector.shape_cast %49 : vector<2xf32> to vector<2x1xf32>
    %cst_28 = arith.constant 5.760000e+02 : f32
    %51 = vector.broadcast %cst_28 : f32 to vector<2x1xf32>
    %52 = arith.divf %50, %51 : vector<2x1xf32>
    %53 = vector.broadcast %52 : vector<2x1xf32> to vector<2x576xf32>
    %54 = arith.subf %46, %53 : vector<2x576xf32>
    %55 = arith.mulf %54, %54 : vector<2x576xf32>
    %cst_29 = arith.constant dense<0.000000e+00> : vector<2xf32>
    %56 = vector.multi_reduction <add>, %55, %cst_29 [1] : vector<2x576xf32> to vector<2xf32>
    %57 = vector.shape_cast %56 : vector<2xf32> to vector<2x1xf32>
    %cst_30 = arith.constant 5.760000e+02 : f32
    %58 = vector.broadcast %cst_30 : f32 to vector<2x1xf32>
    %59 = arith.divf %57, %58 : vector<2x1xf32>
    %60 = vector.broadcast %52 : vector<2x1xf32> to vector<2x576xf32>
    %61 = arith.subf %46, %60 : vector<2x576xf32>
    %cst_31 = arith.constant 9.99999974E-6 : f32
    %62 = vector.broadcast %cst_31 : f32 to vector<2x1xf32>
    %63 = arith.addf %59, %62 : vector<2x1xf32>
    %64 = math.rsqrt %63 : vector<2x1xf32>
    %65 = vector.broadcast %64 : vector<2x1xf32> to vector<2x576xf32>
    %66 = arith.mulf %61, %65 : vector<2x576xf32>
    %67 = vector.broadcast %47 : vector<1x576xf32> to vector<2x576xf32>
    %68 = arith.mulf %66, %67 : vector<2x576xf32>
    %69 = vector.broadcast %48 : vector<1x576xf32> to vector<2x576xf32>
    %70 = arith.addf %68, %69 : vector<2x576xf32>
    %c0_32 = arith.constant 0 : index
    %c0_33 = arith.constant 0 : index
    %71 = vector.load %arg17[%c0_32, %c0_33] : memref<2x576xf32, #tpu.memory_space<vmem>>, vector<2x576xf32>
    %cst_34 = arith.constant 5.000000e-01 : f32
    %72 = vector.broadcast %cst_34 : f32 to vector<2x576xf32>
    %73 = arith.mulf %72, %71 : vector<2x576xf32>
    %74 = arith.addf %73, %70 : vector<2x576xf32>
    %cst_35 = arith.constant 1.000000e+00 : f32
    %75 = vector.broadcast %cst_35 : f32 to vector<2x576xf32>
    %76 = arith.cmpf oge, %74, %75 : vector<2x576xf32>
    %77 = arith.extui %76 : vector<2x576xi1> to vector<2x576xi32>
    %78 = arith.sitofp %77 : vector<2x576xi32> to vector<2x576xf32>
    %cst_36 = arith.constant 0.000000e+00 : f32
    %79 = vector.broadcast %cst_36 : f32 to vector<2x576xf32>
    %80 = arith.cmpf ogt, %78, %79 : vector<2x576xf32>
    %cst_37 = arith.constant 0.000000e+00 : f32
    %81 = vector.broadcast %cst_37 : f32 to vector<2x576xf32>
    %82 = arith.select %80, %81, %74 : vector<2x576xi1>, vector<2x576xf32>
    %c0_38 = arith.constant 0 : index
    %c0_39 = arith.constant 0 : index
    %83 = vector.load %arg17[%c0_38, %c0_39] : memref<2x576xf32, #tpu.memory_space<vmem>>, vector<2x576xf32>
    tpu.vector_store %arg17[%c0_38, %c0_39], %82 {strides = array<i32>} : memref<2x576xf32, #tpu.memory_space<vmem>>, vector<2x576xf32>,
    %84 = arith.truncf %78 : vector<2x576xf32> to vector<2x576xbf16>
    %c0_40 = arith.constant 0 : index
    %c0_41 = arith.constant 0 : index
    %85 = vector.load %arg8[%c0_40, %c0_41] : memref<576x64xbf16, #tpu.memory_space<vmem>>, vector<576x64xbf16>
    %cst_42 = arith.constant dense<0.000000e+00> : vector<2x64xf32>
    %86 = tpu.matmul %84, %85, %cst_42 {dimension_numbers = #tpu.dot_dimension_numbers<[1], [0], [0], [1], [0, 0, 1, 1], [], []>} : vector<2x576xbf16>, vector<576x64xbf16>, vector<2x64xf32> -> vector<2x64xf32>
    %c0_43 = arith.constant 0 : index
    %c0_44 = arith.constant 0 : index
    %87 = vector.load %arg9[%c0_43, %c0_44] : memref<1x64xf32, #tpu.memory_space<vmem>>, vector<1x64xf32>
    %88 = vector.broadcast %87 : vector<1x64xf32> to vector<2x64xf32>
    %89 = arith.addf %86, %88 : vector<2x64xf32>
    %c0_45 = arith.constant 0 : index
    %c0_46 = arith.constant 0 : index
    %90 = vector.load %arg10[%c0_45, %c0_46] : memref<1x64xf32, #tpu.memory_space<vmem>>, vector<1x64xf32>
    %c0_47 = arith.constant 0 : index
    %c0_48 = arith.constant 0 : index
    %91 = vector.load %arg11[%c0_47, %c0_48] : memref<1x64xf32, #tpu.memory_space<vmem>>, vector<1x64xf32>
    %cst_49 = arith.constant dense<0.000000e+00> : vector<2xf32>
    %92 = vector.multi_reduction <add>, %89, %cst_49 [1] : vector<2x64xf32> to vector<2xf32>
    %93 = vector.shape_cast %92 : vector<2xf32> to vector<2x1xf32>
    %cst_50 = arith.constant 6.400000e+01 : f32
    %94 = vector.broadcast %cst_50 : f32 to vector<2x1xf32>
    %95 = arith.divf %93, %94 : vector<2x1xf32>
    %96 = vector.broadcast %95 : vector<2x1xf32> to vector<2x64xf32>
    %97 = arith.subf %89, %96 : vector<2x64xf32>
    %98 = arith.mulf %97, %97 : vector<2x64xf32>
    %cst_51 = arith.constant dense<0.000000e+00> : vector<2xf32>
    %99 = vector.multi_reduction <add>, %98, %cst_51 [1] : vector<2x64xf32> to vector<2xf32>
    %100 = vector.shape_cast %99 : vector<2xf32> to vector<2x1xf32>
    %cst_52 = arith.constant 6.400000e+01 : f32
    %101 = vector.broadcast %cst_52 : f32 to vector<2x1xf32>
    %102 = arith.divf %100, %101 : vector<2x1xf32>
    %103 = vector.broadcast %95 : vector<2x1xf32> to vector<2x64xf32>
    %104 = arith.subf %89, %103 : vector<2x64xf32>
    %cst_53 = arith.constant 9.99999974E-6 : f32
    %105 = vector.broadcast %cst_53 : f32 to vector<2x1xf32>
    %106 = arith.addf %102, %105 : vector<2x1xf32>
    %107 = math.rsqrt %106 : vector<2x1xf32>
    %108 = vector.broadcast %107 : vector<2x1xf32> to vector<2x64xf32>
    %109 = arith.mulf %104, %108 : vector<2x64xf32>
    %110 = vector.broadcast %90 : vector<1x64xf32> to vector<2x64xf32>
    %111 = arith.mulf %109, %110 : vector<2x64xf32>
    %112 = vector.broadcast %91 : vector<1x64xf32> to vector<2x64xf32>
    %113 = arith.addf %111, %112 : vector<2x64xf32>
    %c0_54 = arith.constant 0 : index
    %c0_55 = arith.constant 0 : index
    %114 = vector.load %arg18[%c0_54, %c0_55] : memref<2x64xf32, #tpu.memory_space<vmem>>, vector<2x64xf32>
    %cst_56 = arith.constant 5.000000e-01 : f32
    %115 = vector.broadcast %cst_56 : f32 to vector<2x64xf32>
    %116 = arith.mulf %115, %114 : vector<2x64xf32>
    %117 = arith.addf %116, %113 : vector<2x64xf32>
    %cst_57 = arith.constant 1.000000e+00 : f32
    %118 = vector.broadcast %cst_57 : f32 to vector<2x64xf32>
    %119 = arith.cmpf oge, %117, %118 : vector<2x64xf32>
    %120 = arith.extui %119 : vector<2x64xi1> to vector<2x64xi32>
    %121 = arith.sitofp %120 : vector<2x64xi32> to vector<2x64xf32>
    %cst_58 = arith.constant 0.000000e+00 : f32
    %122 = vector.broadcast %cst_58 : f32 to vector<2x64xf32>
    %123 = arith.cmpf ogt, %121, %122 : vector<2x64xf32>
    %cst_59 = arith.constant 0.000000e+00 : f32
    %124 = vector.broadcast %cst_59 : f32 to vector<2x64xf32>
    %125 = arith.select %123, %124, %117 : vector<2x64xi1>, vector<2x64xf32>
    %c0_60 = arith.constant 0 : index
    %c0_61 = arith.constant 0 : index
    %126 = vector.load %arg18[%c0_60, %c0_61] : memref<2x64xf32, #tpu.memory_space<vmem>>, vector<2x64xf32>
    tpu.vector_store %arg18[%c0_60, %c0_61], %125 {strides = array<i32>} : memref<2x64xf32, #tpu.memory_space<vmem>>, vector<2x64xf32>,
    %127 = arith.truncf %121 : vector<2x64xf32> to vector<2x64xbf16>
    %c0_62 = arith.constant 0 : index
    %c0_63 = arith.constant 0 : index
    %128 = vector.load %arg12[%c0_62, %c0_63] : memref<64x512xbf16, #tpu.memory_space<vmem>>, vector<64x512xbf16>
    %cst_64 = arith.constant dense<0.000000e+00> : vector<2x512xf32>
    %129 = tpu.matmul %127, %128, %cst_64 {dimension_numbers = #tpu.dot_dimension_numbers<[1], [0], [0], [1], [0, 0, 1, 1], [], []>} : vector<2x64xbf16>, vector<64x512xbf16>, vector<2x512xf32> -> vector<2x512xf32>
    %c0_65 = arith.constant 0 : index
    %c0_66 = arith.constant 0 : index
    %130 = vector.load %arg13[%c0_65, %c0_66] : memref<1x512xf32, #tpu.memory_space<vmem>>, vector<1x512xf32>
    %131 = vector.broadcast %130 : vector<1x512xf32> to vector<2x512xf32>
    %132 = arith.addf %129, %131 : vector<2x512xf32>
    %c0_67 = arith.constant 0 : index
    %c0_68 = arith.constant 0 : index
    %133 = vector.load %arg19[%c0_67, %c0_68] : memref<2x512xf32, #tpu.memory_space<vmem>>, vector<2x512xf32>
    %cst_69 = arith.constant 5.000000e-01 : f32
    %134 = vector.broadcast %cst_69 : f32 to vector<2x512xf32>
    %135 = arith.mulf %134, %133 : vector<2x512xf32>
    %136 = arith.addf %135, %132 : vector<2x512xf32>
    %cst_70 = arith.constant 1.000000e+00 : f32
    %137 = vector.broadcast %cst_70 : f32 to vector<2x512xf32>
    %138 = arith.cmpf oge, %136, %137 : vector<2x512xf32>
    %139 = arith.extui %138 : vector<2x512xi1> to vector<2x512xi32>
    %140 = arith.sitofp %139 : vector<2x512xi32> to vector<2x512xf32>
    %cst_71 = arith.constant 0.000000e+00 : f32
    %141 = vector.broadcast %cst_71 : f32 to vector<2x512xf32>
    %142 = arith.cmpf ogt, %140, %141 : vector<2x512xf32>
    %cst_72 = arith.constant 0.000000e+00 : f32
    %143 = vector.broadcast %cst_72 : f32 to vector<2x512xf32>
    %144 = arith.select %142, %143, %136 : vector<2x512xi1>, vector<2x512xf32>
    %c0_73 = arith.constant 0 : index
    %c0_74 = arith.constant 0 : index
    %145 = vector.load %arg19[%c0_73, %c0_74] : memref<2x512xf32, #tpu.memory_space<vmem>>, vector<2x512xf32>
    tpu.vector_store %arg19[%c0_73, %c0_74], %144 {strides = array<i32>} : memref<2x512xf32, #tpu.memory_space<vmem>>, vector<2x512xf32>,
    %146 = arith.truncf %140 : vector<2x512xf32> to vector<2x512xbf16>
    %c0_75 = arith.constant 0 : index
    %c0_76 = arith.constant 0 : index
    %147 = vector.load %arg14[%c0_75, %c0_76] : memref<512x128xbf16, #tpu.memory_space<vmem>>, vector<512x128xbf16>
    %cst_77 = arith.constant dense<0.000000e+00> : vector<2x128xf32>
    %148 = tpu.matmul %146, %147, %cst_77 {dimension_numbers = #tpu.dot_dimension_numbers<[1], [0], [0], [1], [0, 0, 1, 1], [], []>} : vector<2x512xbf16>, vector<512x128xbf16>, vector<2x128xf32> -> vector<2x128xf32>
    %c0_78 = arith.constant 0 : index
    %c0_79 = arith.constant 0 : index
    %149 = vector.load %arg20[%c0_78, %c0_79] : memref<2x128xf32, #tpu.memory_space<vmem>>, vector<2x128xf32>
    %150 = arith.addf %149, %148 : vector<2x128xf32>
    %c0_80 = arith.constant 0 : index
    %c0_81 = arith.constant 0 : index
    %151 = vector.load %arg20[%c0_80, %c0_81] : memref<2x128xf32, #tpu.memory_space<vmem>>, vector<2x128xf32>
    tpu.vector_store %arg20[%c0_80, %c0_81], %150 {strides = array<i32>} : memref<2x128xf32, #tpu.memory_space<vmem>>, vector<2x128xf32>,
    %c7_i32 = arith.constant 7 : i32
    %152 = arith.cmpi eq, %arg0, %c7_i32 : i32
    %153 = arith.extui %152 : i1 to i32
    %c0_i32_82 = arith.constant 0 : i32
    %154 = arith.cmpi ne, %153, %c0_i32_82 : i32
    scf.if %154 {
      %c0_83 = arith.constant 0 : index
      %c0_84 = arith.constant 0 : index
      %155 = vector.load %arg20[%c0_83, %c0_84] : memref<2x128xf32, #tpu.memory_space<vmem>>, vector<2x128xf32>
      %cst_85 = arith.constant 1.250000e-01 : f32
      %156 = vector.broadcast %cst_85 : f32 to vector<2x128xf32>
      %157 = arith.mulf %155, %156 : vector<2x128xf32>
      %c0_86 = arith.constant 0 : index
      %c0_87 = arith.constant 0 : index
      %158 = vector.load %arg15[%c0_86, %c0_87] : memref<2x128xf32, #tpu.memory_space<vmem>>, vector<2x128xf32>
      tpu.vector_store %arg15[%c0_86, %c0_87], %157 {strides = array<i32>} : memref<2x128xf32, #tpu.memory_space<vmem>>, vector<2x128xf32>,
    } else {
    }
    return
  }
  func.func @transform_0(%arg0: i32) -> (i32, i32) {
    %c0_i32 = arith.constant 0 : i32
    %c0_i32_0 = arith.constant 0 : i32
    %c0_i32_1 = arith.constant 0 : i32
    return %c0_i32, %c0_i32_0 : i32, i32
  }
  func.func @transform_1(%arg0: i32) -> (i32, i32) {
    %c0_i32 = arith.constant 0 : i32
    %c0_i32_0 = arith.constant 0 : i32
    %c0_i32_1 = arith.constant 0 : i32
    return %c0_i32, %c0_i32_0 : i32, i32
  }
  func.func @transform_2(%arg0: i32) -> (i32, i32) {
    %c0_i32 = arith.constant 0 : i32
    %c0_i32_0 = arith.constant 0 : i32
    %c0_i32_1 = arith.constant 0 : i32
    return %c0_i32, %c0_i32_0 : i32, i32
  }
  func.func @transform_3(%arg0: i32) -> (i32, i32) {
    %c0_i32 = arith.constant 0 : i32
    %c0_i32_0 = arith.constant 0 : i32
    %c0_i32_1 = arith.constant 0 : i32
    return %c0_i32, %c0_i32_0 : i32, i32
  }
  func.func @transform_4(%arg0: i32) -> (i32, i32) {
    %c0_i32 = arith.constant 0 : i32
    %c0_i32_0 = arith.constant 0 : i32
    %c0_i32_1 = arith.constant 0 : i32
    return %c0_i32, %c0_i32_0 : i32, i32
  }
  func.func @transform_5(%arg0: i32) -> (i32, i32) {
    %c0_i32 = arith.constant 0 : i32
    %c0_i32_0 = arith.constant 0 : i32
    %c0_i32_1 = arith.constant 0 : i32
    return %c0_i32, %c0_i32_0 : i32, i32
  }
  func.func @transform_6(%arg0: i32) -> (i32, i32) {
    %c0_i32 = arith.constant 0 : i32
    %c0_i32_0 = arith.constant 0 : i32
    %c0_i32_1 = arith.constant 0 : i32
    return %c0_i32, %c0_i32_0 : i32, i32
  }
  func.func @transform_7(%arg0: i32) -> (i32, i32) {
    %c0_i32 = arith.constant 0 : i32
    %c0_i32_0 = arith.constant 0 : i32
    %c0_i32_1 = arith.constant 0 : i32
    return %c0_i32, %c0_i32_0 : i32, i32
  }
  func.func @transform_8(%arg0: i32) -> (i32, i32) {
    %c0_i32 = arith.constant 0 : i32
    %c0_i32_0 = arith.constant 0 : i32
    %c0_i32_1 = arith.constant 0 : i32
    return %c0_i32, %c0_i32_0 : i32, i32
  }
  func.func @transform_9(%arg0: i32) -> (i32, i32) {
    %c0_i32 = arith.constant 0 : i32
    %c0_i32_0 = arith.constant 0 : i32
    %c0_i32_1 = arith.constant 0 : i32
    return %c0_i32, %c0_i32_0 : i32, i32
  }
  func.func @transform_10(%arg0: i32) -> (i32, i32) {
    %c0_i32 = arith.constant 0 : i32
    %c0_i32_0 = arith.constant 0 : i32
    %c0_i32_1 = arith.constant 0 : i32
    return %c0_i32, %c0_i32_0 : i32, i32
  }
  func.func @transform_11(%arg0: i32) -> (i32, i32) {
    %c0_i32 = arith.constant 0 : i32
    %c0_i32_0 = arith.constant 0 : i32
    %c0_i32_1 = arith.constant 0 : i32
    return %c0_i32, %c0_i32_0 : i32, i32
  }
  func.func @transform_12(%arg0: i32) -> (i32, i32) {
    %c0_i32 = arith.constant 0 : i32
    %c0_i32_0 = arith.constant 0 : i32
    %c0_i32_1 = arith.constant 0 : i32
    return %c0_i32, %c0_i32_0 : i32, i32
  }
  func.func @transform_13(%arg0: i32) -> (i32, i32) {
    %c0_i32 = arith.constant 0 : i32
    %c0_i32_0 = arith.constant 0 : i32
    %c0_i32_1 = arith.constant 0 : i32
    return %c0_i32, %c0_i32_0 : i32, i32
  }
  func.func @transform_14(%arg0: i32) -> (i32, i32) {
    %c0_i32 = arith.constant 0 : i32
    %c0_i32_0 = arith.constant 0 : i32
    %c0_i32_1 = arith.constant 0 : i32
    return %c0_i32, %c0_i32_0 : i32, i32
  }
}

</mosaic_0001>

<bundles_post_ra>
// kernel: spiking_dqn_forward.2
= control target key start
LH: loop header
LB: loop body
LE: loop exit
PB: predicated region body
PF: predicated region fallthrough
CT: control target
= control target key end

     0   :  { %vm343_vm0 = vcmask 261120   ;;  %s718_s1 = inlined_call_operand.vmem [shape: bf16[256,32], index: 1, kind: input, shape index: {}]   ;;  %s719_s0 = inlined_call_operand.vmem [shape: bf16[128,256], index: 0, kind: input, shape index: {}]   ;;  %s720_s2 = inlined_call_operand.vmem [shape: f32[1,32], index: 2, kind: input, shape index: {}]   ;;  %s721_s3 = inlined_call_operand.vmem [shape: f32[128,32], index: 3, kind: output, shape index: {}]  }
   0x1   :  { %v477_v0 = vld [vmem:[%s718_s1 + $0x40] sm:$0xff]   ;;  %v479_v2 = vld [vmem:[%s718_s1 + $0x48] sm:$0xff]   ;;  %v481_v4 = vld [vmem:[%s718_s1 + $0x50] sm:$0xff]  }
   0x2   :  { %v478_v1 = vld [vmem:[%s718_s1] sm:$0xff]   ;;  %397 = vmatprep.subr.bf16.mxu0 %v477_v0  ;;  %461 = vmatprep.subr.bf16.mxu1 %v477_v0  ;;  %v480_v3 = vld [vmem:[%s718_s1 + $0x8] sm:$0xff]   ;;  %v482_v5 = vld [vmem:[%s718_s1 + $0x10] sm:$0xff]  }
   0x3   :  { %398 = vmatpush3.bf16.msra.mxu0 %v478_v1  ;;  %469 = vmatpush3.bf16.msra.mxu1 %v478_v1  ;;  %v483_v6 = vld [vmem:[%s718_s1 + $0x58] sm:$0xff]   ;;  %v485_v8 = vld [vmem:[%s718_s1 + $0x60] sm:$0xff]   ;;  %v487_v10 = vld [vmem:[%s718_s1 + $0x68] sm:$0xff]  }
   0x4   :  { %399 = vmatprep.subr.bf16.mxu0 %v479_v2  ;;  %462 = vmatprep.subr.bf16.mxu1 %v479_v2  ;;  %v484_v7 = vld [vmem:[%s718_s1 + $0x18] sm:$0xff]   ;;  %v486_v9 = vld [vmem:[%s718_s1 + $0x20] sm:$0xff]   ;;  %v488_v13 = vld [vmem:[%s718_s1 + $0x28] sm:$0xff]  }
   0x5   :  { %v495_v11 = vld [vmem:[%s719_s0 + $0x4] ss:$8 sps:$4 sm:$0xff]   ;;  %v489_v14 = vld [vmem:[%s718_s1 + $0x70] sm:$0xff]   ;;  %v491_v16 = vld [vmem:[%s718_s1 + $0x78] sm:$0xff]  }
   0x6   :  { %v498_v12 = vld [vmem:[%s719_s0 + $0x44] ss:$8 sps:$4 sm:$0xff]   ;;  %278 = vmatprep.mubr.bf16.mxu0 %v495_v11  ;;  %v490_v15 = vld [vmem:[%s718_s1 + $0x30] sm:$0xff]   ;;  %v492_v17 = vld [vmem:[%s718_s1 + $0x38] sm:$0xff]  }
   0x7   :  { %400 = vmatpush3.bf16.msra.mxu0 %v480_v3  ;;  %470 = vmatpush3.bf16.msra.mxu1 %v480_v3  ;;  %v493_v18 = vld [vmem:[%s719_s0] ss:$8 sps:$4 sm:$0xff]   ;;  %v499_v20 = vld [vmem:[%s719_s0 + $0x14] ss:$8 sps:$4 sm:$0xff]   ;;  %v503_v22 = vld [vmem:[%s719_s0 + $0x10] ss:$8 sps:$4 sm:$0xff]  }
   0x8   :  { %401 = vmatprep.subr.bf16.mxu0 %v481_v4  ;;  %463 = vmatprep.subr.bf16.mxu1 %v481_v4  ;;  %v496_v19 = vld [vmem:[%s719_s0 + $0x40] ss:$8 sps:$4 sm:$0xff]   ;;  %v501_v21 = vld [vmem:[%s719_s0 + $0x54] ss:$8 sps:$4 sm:$0xff]   ;;  %v504_v23 = vld [vmem:[%s719_s0 + $0x50] ss:$8 sps:$4 sm:$0xff]  }
   0x9   :  { %310 = vmatprep.mubr.bf16.mxu1 %v498_v12  ;;  %v505_v24 = vld [vmem:[%s719_s0 + $0x24] ss:$8 sps:$4 sm:$0xff]   ;;  %v509_v26 = vld [vmem:[%s719_s0 + $0x20] ss:$8 sps:$4 sm:$0xff]   ;;  %v511_v28 = vld [vmem:[%s719_s0 + $0x34] ss:$8 sps:$4 sm:$0xff]  }
   0xa   :  { %v507_v25 = vld [vmem:[%s719_s0 + $0x64] ss:$8 sps:$4 sm:$0xff]   ;;  %v510_v27 = vld [vmem:[%s719_s0 + $0x60] ss:$8 sps:$4 sm:$0xff]   ;;  %v513_v29 = vld [vmem:[%s719_s0 + $0x74] ss:$8 sps:$4 sm:$0xff]  }
   0xb   :  { %402 = vmatpush3.bf16.msra.mxu0 %v482_v5  ;;  %471 = vmatpush3.bf16.msra.mxu1 %v482_v5  ;;  %v515_v30 = vld [vmem:[%s719_s0 + $0x30] ss:$8 sps:$4 sm:$0xff]   ;;  %v636_v34 = vld [vmem:[%s720_s2] ss:$0 sm:$0xff] }
   0xc   :  { %403 = vmatprep.subr.bf16.mxu0 %v483_v6  ;;  %464 = vmatprep.subr.bf16.mxu1 %v483_v6  ;;  %v516_v31 = vld [vmem:[%s719_s0 + $0x70] ss:$8 sps:$4 sm:$0xff]  }
   0xf   :  { %404 = vmatpush3.bf16.msra.mxu0 %v484_v7  ;;  %472 = vmatpush3.bf16.msra.mxu1 %v484_v7 }
  0x10   :  { %405 = vmatprep.subr.bf16.mxu0 %v485_v8  ;;  %465 = vmatprep.subr.bf16.mxu1 %v485_v8 }
  0x13   :  { %406 = vmatpush3.bf16.msra.mxu0 %v486_v9  ;;  %473 = vmatpush3.bf16.msra.mxu1 %v486_v9 }
  0x14   :  { %407 = vmatprep.subr.bf16.mxu0 %v487_v10  ;;  %466 = vmatprep.subr.bf16.mxu1 %v487_v10 }
  0x17   :  { %408 = vmatpush3.bf16.msra.mxu0 %v488_v13  ;;  %474 = vmatpush3.bf16.msra.mxu1 %v488_v13 }
  0x18   :  { %409 = vmatprep.subr.bf16.mxu0 %v489_v14  ;;  %467 = vmatprep.subr.bf16.mxu1 %v489_v14 }
  0x1b   :  { %410 = vmatpush3.bf16.msra.mxu0 %v490_v15  ;;  %475 = vmatpush3.bf16.msra.mxu1 %v490_v15 }
  0x1c   :  { %411 = vmatprep.subr.bf16.mxu0 %v491_v16  ;;  %468 = vmatprep.subr.bf16.mxu1 %v491_v16 }
  0x1f   :  { %412 = vmatpush3.bf16.msra.mxu0 %v492_v17  ;;  %476 = vmatpush3.bf16.msra.mxu1 %v492_v17 }
  0x22   :  { %279 = vmatmul.mubr.bf16.vlgmr.msra.gmra.mrb[0].mxu0 %v493_v18  ;;  %311 = vmatmul.mubr.bf16.vlgmr.msra.gmra.mrb[0].mxu1 %v496_v19 }
  0x23   :  { %286 = vmatprep.mubr.bf16.mxu0 %v499_v20  ;;  %318 = vmatprep.mubr.bf16.mxu1 %v501_v21 }
  0x2a   :  { %287 = vmatmul.mubr.bf16.gmra.mrb[4].mxu0 %v503_v22  ;;  %319 = vmatmul.mubr.bf16.gmra.mrb[4].mxu1 %v504_v23 }
  0x2b   :  { %294 = vmatprep.mubr.bf16.mxu0 %v505_v24  ;;  %326 = vmatprep.mubr.bf16.mxu1 %v507_v25 }
  0x32   :  { %295 = vmatmul.mubr.bf16.gmra.mrb[8].mxu0 %v509_v26  ;;  %327 = vmatmul.mubr.bf16.gmra.mrb[8].mxu1 %v510_v27 }
  0x33   :  { %302 = vmatprep.mubr.bf16.mxu0 %v511_v28  ;;  %334 = vmatprep.mubr.bf16.mxu1 %v513_v29 }
  0x3a   :  { %303 = vmatmul.mubr.bf16.gmra.mrb[12].mxu0 %v515_v30  ;;  %335 = vmatmul.mubr.bf16.gmra.mrb[12].mxu1 %v516_v31 }
  0xf5   :  { %v413_v32 = vpop.f32.mrb[0].mxu0  ;;  %v437_v33 = vpop.f32.mrb[0].mxu1 }
  0xf6   :  { %v414_v35 = vpop.f32.mrb[1].mxu0  ;;  %v438_v36 = vpop.f32.mrb[1].mxu1 }
  0xf7   :  { %v415_v37 = vadd.f32 %v414_v35, %v413_v32  ;;  %v439_v38 = vadd.f32 %v438_v36, %v437_v33  ;;  %v416_v39 = vpop.f32.mrb[2].mxu0  ;;  %v440_v40 = vpop.f32.mrb[2].mxu1 }
  0xf8   :  { %v417_v41 = vpop.f32.mrb[3].mxu0  ;;  %v441_v42 = vpop.f32.mrb[3].mxu1 }
  0xf9   :  { %v281_v43 = vadd.f32 %v415_v37, %v636_v34  ;;  %v313_v44 = vadd.f32 %v439_v38, %v636_v34  ;;  %v418_v45 = vadd.f32 %v417_v41, %v416_v39  ;;  %v442_v46 = vadd.f32 %v441_v42, %v440_v40 }
  0xfb   :  { %344 = vst.msk [vmem:[%s721_s3] sm:$0xff] %vm343_vm0, %v281_v43  ;;  %352 = vst.msk [vmem:[%s721_s3 + $0x40] sm:$0xff] %vm343_vm0, %v313_v44  ;;  %v284_v47 = vadd.f32 %v418_v45, %v636_v34  ;;  %v316_v48 = vadd.f32 %v442_v46, %v636_v34 }
  0xfd   :  { %345 = vst.msk [vmem:[%s721_s3 + $0x8] sm:$0xff] %vm343_vm0, %v284_v47  ;;  %353 = vst.msk [vmem:[%s721_s3 + $0x48] sm:$0xff] %vm343_vm0, %v316_v48  ;;  %v419_v49 = vpop.f32.mrb[4].mxu0  ;;  %v443_v50 = vpop.f32.mrb[4].mxu1 }
  0xfe   :  { %v420_v51 = vpop.f32.mrb[5].mxu0  ;;  %v444_v52 = vpop.f32.mrb[5].mxu1 }
  0xff   :  { %v421_v53 = vadd.f32 %v420_v51, %v419_v49  ;;  %v445_v54 = vadd.f32 %v444_v52, %v443_v50  ;;  %v422_v55 = vpop.f32.mrb[6].mxu0  ;;  %v446_v56 = vpop.f32.mrb[6].mxu1 }
 0x100   :  { %v423_v57 = vpop.f32.mrb[7].mxu0  ;;  %v447_v58 = vpop.f32.mrb[7].mxu1 }
 0x101   :  { %v289_v59 = vadd.f32 %v421_v53, %v636_v34  ;;  %v321_v60 = vadd.f32 %v445_v54, %v636_v34  ;;  %v424_v61 = vadd.f32 %v423_v57, %v422_v55  ;;  %v448_v62 = vadd.f32 %v447_v58, %v446_v56 }
 0x103   :  { %346 = vst.msk [vmem:[%s721_s3 + $0x10] sm:$0xff] %vm343_vm0, %v289_v59  ;;  %354 = vst.msk [vmem:[%s721_s3 + $0x50] sm:$0xff] %vm343_vm0, %v321_v60  ;;  %v292_v63 = vadd.f32 %v424_v61, %v636_v34  ;;  %v324_v0 = vadd.f32 %v448_v62, %v636_v34 }
 0x105   :  { %347 = vst.msk [vmem:[%s721_s3 + $0x18] sm:$0xff] %vm343_vm0, %v292_v63  ;;  %355 = vst.msk [vmem:[%s721_s3 + $0x58] sm:$0xff] %vm343_vm0, %v324_v0  ;;  %v425_v1 = vpop.f32.mrb[8].mxu0  ;;  %v449_v2 = vpop.f32.mrb[8].mxu1 }
 0x106   :  { %v426_v3 = vpop.f32.mrb[9].mxu0  ;;  %v450_v4 = vpop.f32.mrb[9].mxu1 }
 0x107   :  { %v427_v5 = vadd.f32 %v426_v3, %v425_v1  ;;  %v451_v6 = vadd.f32 %v450_v4, %v449_v2  ;;  %v428_v7 = vpop.f32.mrb[10].mxu0  ;;  %v452_v8 = vpop.f32.mrb[10].mxu1 }
 0x108   :  { %v429_v9 = vpop.f32.mrb[11].mxu0  ;;  %v453_v10 = vpop.f32.mrb[11].mxu1 }
 0x109   :  { %v297_v11 = vadd.f32 %v427_v5, %v636_v34  ;;  %v329_v12 = vadd.f32 %v451_v6, %v636_v34  ;;  %v430_v13 = vadd.f32 %v429_v9, %v428_v7  ;;  %v454_v14 = vadd.f32 %v453_v10, %v452_v8 }
 0x10b   :  { %348 = vst.msk [vmem:[%s721_s3 + $0x20] sm:$0xff] %vm343_vm0, %v297_v11  ;;  %356 = vst.msk [vmem:[%s721_s3 + $0x60] sm:$0xff] %vm343_vm0, %v329_v12  ;;  %v300_v15 = vadd.f32 %v430_v13, %v636_v34  ;;  %v332_v16 = vadd.f32 %v454_v14, %v636_v34 }
 0x10d   :  { %349 = vst.msk [vmem:[%s721_s3 + $0x28] sm:$0xff] %vm343_vm0, %v300_v15  ;;  %357 = vst.msk [vmem:[%s721_s3 + $0x68] sm:$0xff] %vm343_vm0, %v332_v16  ;;  %v431_v17 = vpop.f32.mrb[12].mxu0  ;;  %v455_v18 = vpop.f32.mrb[12].mxu1 }
 0x10e   :  { %v432_v19 = vpop.f32.mrb[13].mxu0  ;;  %v456_v20 = vpop.f32.mrb[13].mxu1 }
 0x10f   :  { %v433_v21 = vadd.f32 %v432_v19, %v431_v17  ;;  %v457_v22 = vadd.f32 %v456_v20, %v455_v18  ;;  %v434_v23 = vpop.f32.mrb[14].mxu0  ;;  %v458_v24 = vpop.f32.mrb[14].mxu1 }
 0x110   :  { %v435_v25 = vpop.f32.mrb[15].mxu0  ;;  %v459_v26 = vpop.f32.mrb[15].mxu1 }
 0x111   :  { %v305_v27 = vadd.f32 %v433_v21, %v636_v34  ;;  %v337_v28 = vadd.f32 %v457_v22, %v636_v34  ;;  %v436_v29 = vadd.f32 %v435_v25, %v434_v23  ;;  %v460_v30 = vadd.f32 %v459_v26, %v458_v24 }
 0x113   :  { %350 = vst.msk [vmem:[%s721_s3 + $0x30] sm:$0xff] %vm343_vm0, %v305_v27  ;;  %358 = vst.msk [vmem:[%s721_s3 + $0x70] sm:$0xff] %vm343_vm0, %v337_v28  ;;  %v308_v31 = vadd.f32 %v436_v29, %v636_v34  ;;  %v340_v32 = vadd.f32 %v460_v30, %v636_v34 }
 0x115   :  { %351 = vst.msk [vmem:[%s721_s3 + $0x38] sm:$0xff] %vm343_vm0, %v308_v31  ;;  %359 = vst.msk [vmem:[%s721_s3 + $0x78] sm:$0xff] %vm343_vm0, %v340_v32 }

// kernel: tile.9
= control target key start
LH: loop header
LB: loop body
LE: loop exit
PB: predicated region body
PF: predicated region fallthrough
CT: control target
= control target key end

     0   :  { %s28_s0 = inlined_call_operand.vmem [shape: f32[64], index: 0, kind: input, shape index: {}]   ;;  %s29_s1 = inlined_call_operand.vmem [shape: f32[9,64], index: 1, kind: output, shape index: {}]  }
   0x1   :  { %v4_v0 = vld [vmem:[%s28_s0] ss:$0 sm:$0xff] }
   0x2   :  { %5 = vst [vmem:[%s29_s1] sm:$0xff] %v4_v0  ;;  %8 = vst [vmem:[%s29_s1 + $0x8] sm:$0xff] %v4_v0 }

// kernel: tile.10
= control target key start
LH: loop header
LB: loop body
LE: loop exit
PB: predicated region body
PF: predicated region fallthrough
CT: control target
= control target key end

     0   :  { %vm3_vm0 = vcmask 523264   ;;  %s51_s8 = smov 64   ;;  %vm11_vm1 = vcmask 1048064   ;;  %s83_s0 = inlined_call_operand.vmem [shape: f32[9,64], index: 0, kind: input, shape index: {}]   ;;  %s84_s1 = inlined_call_operand.vmem [shape: f32[1,576], index: 1, kind: output, shape index: {}]  }
   0x1   :  { %v45_v0 = vld [vmem:[%s83_s0 + $0x1] ss:$2 sm:$0xf]   ;;  %v2_v1 = vld [vmem:[%s83_s0] ss:$2 sm:$0x1f]  }
   0x2   :  { %9 = vrot.lane.b32.xlu0 %v45_v0, %s51_s8  ;;  %4 = vst.msk [vmem:[#allocation0] ss:$8 sm:$0xf] %vm3_vm0, %v2_v1   ;;  %6 = vst.msk [vmem:[#allocation0 + $0x1c] sm:$0x10] %vm3_vm0, %v2_v1  }
   0x9   :  { %v37_v2 = vld [vmem:[#allocation0 + $0x20] sm:$0x1] }
   0xa   :  { %49 = vst [vmem:[%s84_s1 + $0x4] sm:$0x1] %v37_v2 }
  0x74   :  { %v10_v3 = vpop.permute.xlu0 %9  }
  0x75   :  { %12 = vst.msk [vmem:[#allocation0] ss:$8 sm:$0xf] %vm11_vm1, %v10_v3  }
  0x7c   :  { %v16_v4 = vld [vmem:[#allocation0] sm:$0x1]  ;;  %v20_v5 = vld [vmem:[#allocation0 + $0x8] sm:$0x1]  ;;  %v25_v6 = vld [vmem:[#allocation0 + $0x10] sm:$0x1] }
  0x7d   :  { %18 = vst [vmem:[%s84_s1] sm:$0x1] %v16_v4  ;;  %46 = vst [vmem:[%s84_s1 + $0x1] sm:$0x1] %v20_v5  ;;  %v31_v7 = vld [vmem:[#allocation0 + $0x18] sm:$0x1] }
  0x7e   :  { %47 = vst [vmem:[%s84_s1 + $0x2] sm:$0x1] %v25_v6  ;;  %48 = vst [vmem:[%s84_s1 + $0x3] sm:$0x1] %v31_v7 }

// kernel: spiking_dqn_forward.3
= control target key start
LH: loop header
LB: loop body
LE: loop exit
PB: predicated region body
PF: predicated region fallthrough
CT: control target
= control target key end

     0   :  { %19 = vsyncpa [#allocation8], 0  ;;  %s9780_s29 = smov 0   ;;  %s12411_s0 = inlined_call_operand.vmem [shape: f32[2,2048], index: 0, kind: input, shape index: {}]   ;;  %s12412_s1 = inlined_call_operand.vmem [shape: f32[1,2048], index: 1, kind: input, shape index: {}]   ;;  %s12413_s2 = inlined_call_operand.vmem [shape: f32[1,2048], index: 2, kind: input, shape index: {}]   ;;  %s12414_s3 = inlined_call_operand.vmem [shape: bf16[2048,576], index: 3, kind: input, shape index: {}]   ;;  %s12415_s4 = inlined_call_operand.vmem [shape: f32[1,576], index: 4, kind: input, shape index: {}]   ;;  %s12416_s5 = inlined_call_operand.vmem [shape: f32[1,576], index: 5, kind: input, shape index: {}]   ;;  %s12417_s6 = inlined_call_operand.vmem [shape: f32[1,576], index: 6, kind: input, shape index: {}]   ;;  %s12418_s7 = inlined_call_operand.vmem [shape: bf16[576,64], index: 7, kind: input, shape index: {}]   ;;  %s12419_s8 = inlined_call_operand.vmem [shape: f32[1,64], index: 8, kind: input, shape index: {}]   ;;  %s12420_s9 = inlined_call_operand.vmem [shape: f32[1,64], index: 9, kind: input, shape index: {}]   ;;  %s12421_s10 = inlined_call_operand.vmem [shape: f32[1,64], index: 10, kind: input, shape index: {}]   ;;  %s12422_s11 = inlined_call_operand.vmem [shape: bf16[64,512], index: 11, kind: input, shape index: {}]   ;;  %s12423_s12 = inlined_call_operand.vmem [shape: f32[1,512], index: 12, kind: input, shape index: {}]   ;;  %s12424_s13 = inlined_call_operand.vmem [shape: bf16[512,128], index: 13, kind: input, shape index: {}]   ;;  %s12425_s14 = inlined_call_operand.hbm [shape: f32[2,128], index: 14, kind: output, shape index: {}]  }
   0x1 LB: > { %s9786_s30 = sadd.s32 4294967295, %s9696_s29   ;;  %p7551_p0 = scmp.ge.s32.totalorder %s9696_s29, 1  ;;  %s9696_s29 = sphi %s9780_s29, %s25_s29  }
   0x2   : > { %p398_p1 = scmp.lt.s32.totalorder %s9696_s29, 9 }
   0x4   : > { %p399_p2 = pnand %p7551_p0, %p398_p1 }
   0x5   : > { %p7552_p3 = scmp.ne.s32.totalorder (!%p399_p2), %s9786_s30, 0 }
   0x6   : > { %402 = sbr.rel (%p399_p2) target bundleno = 2596 (0xa24), region = 76 }
   0xd   : > { %438 = sbr.rel (%p7552_p3) target bundleno = 20 (0x14), region = 80  ;;  %vm444_vm0 = vcmask (!%p7552_p3), 517120   ;;  %v9698_v0 = vmov (!%p7552_p3), 0.0  }
   0xe   : > { %439 = vst [vmem:[#allocation2] sm:$0xff] (!%p7552_p3), %v9698_v0  ;;  %440 = vst [vmem:[#allocation2 + $0x8] sm:$0xff] (!%p7552_p3), %v9698_v0 }
   0xf   : > { %441 = vst [vmem:[#allocation2 + $0x10] sm:$0xff] (!%p7552_p3), %v9698_v0  ;;  %442 = vst [vmem:[#allocation2 + $0x18] sm:$0xff] (!%p7552_p3), %v9698_v0 }
  0x10   : > { %443 = vst [vmem:[#allocation3] sm:$0xff] (!%p7552_p3), %v9698_v0  ;;  %447 = vst [vmem:[#allocation5] sm:$0xff] (!%p7552_p3), %v9698_v0 }
  0x11   : > { %448 = vst [vmem:[#allocation6] sm:$0x3] (!%p7552_p3), %v9698_v0  ;;  %445 = vst.msk [vmem:[#allocation3 + $0x8] sm:$0x3] (!%p7552_p3), %vm444_vm0, %v9698_v0 }
  0x12   : > { %446 = vst.msk [vmem:[#allocation4] sm:$0x3] (!%p7552_p3), %vm444_vm0, %v9698_v0 }
  0x14 PF: > { %v465_v1 = vlaneseq  ;;  %v449_v2 = vld [vmem:[%s12411_s0] sm:$0xff]  ;;  %v9699_v3 = vmov 1983009808   ;;  %v450_v8 = vld [vmem:[%s12411_s0 + $0x8] sm:$0xff]  ;;  %vm545_vm1 = vcmask 1041408   ;;  %v451_v20 = vld [vmem:[%s12411_s0 + $0x10] sm:$0xff] }
  0x15   : > { %v463_v4 = vunpack.c.l.s4 %v9699_v3  ;;  %v461_v6 = vcombine.high %v449_v2, %v449_v2  ;;  %v478_v14 = vcombine.high %v450_v8, %v450_v8  ;;  %v495_v28 = vcombine.high %v451_v20, %v451_v20  ;;  %v452_v33 = vld [vmem:[%s12411_s0 + $0x18] sm:$0xff]  ;;  %v8664_v63 = vld [vmem:[%s12414_s3 + $0xc] ss:$20 sps:$4 sm:$0xff]   ;;  %v8670_v3 = vld [vmem:[%s12414_s3 + $0x34] ss:$20 sps:$4 sm:$0xff]   ;;  %p8291_p4 = scmp.ne.s32.totalorder %s9786_s30, 7 }
  0x16   : > { %v9794_v5 = vshrl.u32 %v465_v1, 7  ;;  %v512_v42 = vcombine.high %v452_v33, %v452_v33  ;;  %v8662_v62 = vld [vmem:[%s12414_s3 + $0x4] ss:$20 sps:$4 sm:$0xff]   ;;  %v8666_v0 = vld [vmem:[%s12414_s3] ss:$20 sps:$4 sm:$0xff]   ;;  %5610 = vmatprep.subr.bf16.mxu1 %v8664_v63  ;;  %vm6267_vm10 = vcmask 517120  }
  0x17   : > { %v464_v7 = vunpack.c.0.s8 %v463_v4  ;;  %v8667_v1 = vld [vmem:[%s12414_s3 + $0x8] ss:$20 sps:$4 sm:$0xff]   ;;  %5282 = vmatprep.subr.bf16.mxu0 %v8662_v62  ;;  %vm9702_vm15 = vmmov 0   ;;  %vm6745_vm0 = vcmask 523264  }
  0x18   : > { %5283 = vmatpush1.bf16.msra.mxu0 %v8666_v0  ;;  %5611 = vmatpush1.bf16.msra.mxu1 %v8667_v1  ;;  %v8672_v4 = vld [vmem:[%s12414_s3 + $0x28] ss:$20 sps:$4 sm:$0xff]  }
  0x19   : > { %v9800_v9 = vsub.s32 %v464_v7, %v9794_v5  ;;  %5612 = vmatprep.subr.bf16.mxu1 %v8670_v3  ;;  %v8674_v7 = vld [vmem:[%s12414_s3 + $0x54] ss:$20 sps:$4 sm:$0xff]  }
  0x1b   : > { %v468_v10 = vrot.slane %v449_v2, %v9800_v9  ;;  %v475_v11 = vrot.slane %v461_v6, %v9800_v9  ;;  %v485_v15 = vrot.slane %v450_v8, %v9800_v9  ;;  %v492_v21 = vrot.slane %v478_v14, %v9800_v9  ;;  %v8668_v2 = vld [vmem:[%s12414_s3 + $0x2c] ss:$20 sps:$4 sm:$0xff]   ;;  %v8673_v6 = vld [vmem:[%s12414_s3 + $0x30] ss:$20 sps:$4 sm:$0xff]  }
  0x1c   : > { %v502_v29 = vrot.slane %v451_v20, %v9800_v9  ;;  %v509_v35 = vrot.slane %v495_v28, %v9800_v9  ;;  %v519_v43 = vrot.slane %v452_v33, %v9800_v9  ;;  %v526_v48 = vrot.slane %v512_v42, %v9800_v9  ;;  %5284 = vmatprep.subr.bf16.mxu0 %v8668_v2  ;;  %v8676_v8 = vld [vmem:[%s12414_s3 + $0x5c] ss:$20 sps:$4 sm:$0xff]   ;;  %v8684_v14 = vld [vmem:[%s12414_s3 + $0x78] ss:$20 sps:$4 sm:$0xff]  }
  0x1d   : > { %v476_v12 = vcombine.high %v468_v10, %v468_v10  ;;  %v477_v13 = vcombine.high %v475_v11, %v475_v11  ;;  %v546_v16 = vsel %vm545_vm1, %v468_v10, 0.0  ;;  %v549_v18 = vsel %vm545_vm1, %v475_v11, 0.0  ;;  %5285 = vmatpush1.bf16.msra.mxu0 %v8672_v4  ;;  %5613 = vmatpush1.bf16.msra.mxu1 %v8673_v6  ;;  %v8678_v10 = vld [vmem:[%s12414_s3 + $0x50] ss:$20 sps:$4 sm:$0xff]   ;;  %v8679_v11 = vld [vmem:[%s12414_s3 + $0x58] ss:$20 sps:$4 sm:$0xff]  }
  0x1e   : > { %v493_v22 = vcombine.high %v485_v15, %v485_v15  ;;  %v553_v25 = vsel %vm545_vm1, %v485_v15, 0.0  ;;  %v494_v27 = vcombine.high %v492_v21, %v492_v21  ;;  %v557_v32 = vsel %vm545_vm1, %v492_v21, 0.0  ;;  %5286 = vmatprep.subr.bf16.mxu0 %v8674_v7  ;;  %5614 = vmatprep.subr.bf16.mxu1 %v8676_v8  ;;  %v8685_v15 = vld [vmem:[%s12414_s3 + $0x80] ss:$20 sps:$4 sm:$0xff]   ;;  %v8704_v28 = vld [vmem:[%s12414_s3 + $0x11c] ss:$20 sps:$4 sm:$0xff]  }
  0x1f   : > { %v547_v17 = vsel %vm545_vm1, %v476_v12, 0.0  ;;  %v551_v23 = vsel %vm545_vm1, %v477_v13, 0.0  ;;  %v510_v36 = vcombine.high %v502_v29, %v502_v29  ;;  %v561_v39 = vsel %vm545_vm1, %v502_v29, 0.0  ;;  %v8680_v12 = vld [vmem:[%s12414_s3 + $0x7c] ss:$20 sps:$4 sm:$0xff]  }
  0x20   : > { %v548_v19 = vadd.f32 %v547_v17, %v546_v16  ;;  %v555_v30 = vsel %vm545_vm1, %v493_v22, 0.0  ;;  %v559_v37 = vsel %vm545_vm1, %v494_v27, 0.0  ;;  %v511_v41 = vcombine.high %v509_v35, %v509_v35  ;;  %v8682_v13 = vld [vmem:[%s12414_s3 + $0x84] ss:$20 sps:$4 sm:$0xff]   ;;  %v8688_v17 = vld [vmem:[%s12414_s3 + $0xac] ss:$20 sps:$4 sm:$0xff]  }
  0x21   : > { %v563_v44 = vsel %vm545_vm1, %v510_v36, 0.0  ;;  %v565_v46 = vsel %vm545_vm1, %v509_v35, 0.0  ;;  %v527_v49 = vcombine.high %v519_v43, %v519_v43  ;;  %v569_v52 = vsel %vm545_vm1, %v519_v43, 0.0  ;;  %v8686_v16 = vld [vmem:[%s12414_s3 + $0xa4] ss:$20 sps:$4 sm:$0xff]   ;;  %5287 = vmatpush1.bf16.msra.mxu0 %v8678_v10  ;;  %5615 = vmatpush1.bf16.msra.mxu1 %v8679_v11  ;;  %v9658_v43 = vld [vmem:[%s12411_s0 + $0x10] sm:$0xff] }
  0x22   : > { %v550_v24 = vadd.f32 %v549_v18, %v548_v19  ;;  %v567_v50 = vsel %vm545_vm1, %v511_v41, 0.0  ;;  %v528_v54 = vcombine.high %v526_v48, %v526_v48  ;;  %v573_v57 = vsel %vm545_vm1, %v526_v48, 0.0  ;;  %5288 = vmatprep.subr.bf16.mxu0 %v8680_v12  ;;  %5616 = vmatprep.subr.bf16.mxu1 %v8682_v13  ;;  %v8690_v18 = vld [vmem:[%s12414_s3 + $0xa0] ss:$20 sps:$4 sm:$0xff]   ;;  %v8691_v19 = vld [vmem:[%s12414_s3 + $0xa8] ss:$20 sps:$4 sm:$0xff]  }
  0x23   : > { %v571_v55 = vsel %vm545_vm1, %v527_v49, 0.0  ;;  %v8692_v20 = vld [vmem:[%s12414_s3 + $0xcc] ss:$20 sps:$4 sm:$0xff]   ;;  %v8694_v21 = vld [vmem:[%s12414_s3 + $0xd4] ss:$20 sps:$4 sm:$0xff]  }
  0x24   : > { %v552_v26 = vadd.f32 %v551_v23, %v550_v24  ;;  %v575_v59 = vsel %vm545_vm1, %v528_v54, 0.0  ;;  %v8696_v22 = vld [vmem:[%s12414_s3 + $0xc8] ss:$20 sps:$4 sm:$0xff]   ;;  %v8697_v23 = vld [vmem:[%s12414_s3 + $0xd0] ss:$20 sps:$4 sm:$0xff]  }
  0x25   : > { %5289 = vmatpush1.bf16.msra.mxu0 %v8684_v14  ;;  %5617 = vmatpush1.bf16.msra.mxu1 %v8685_v15  ;;  %v8698_v24 = vld [vmem:[%s12414_s3 + $0xf4] ss:$20 sps:$4 sm:$0xff]   ;;  %v8703_v27 = vld [vmem:[%s12414_s3 + $0xf8] ss:$20 sps:$4 sm:$0xff]  }
  0x26   : > { %v554_v31 = vadd.f32 %v553_v25, %v552_v26  ;;  %5290 = vmatprep.subr.bf16.mxu0 %v8686_v16  ;;  %5618 = vmatprep.subr.bf16.mxu1 %v8688_v17  ;;  %v8700_v25 = vld [vmem:[%s12414_s3 + $0xfc] ss:$20 sps:$4 sm:$0xff]   ;;  %v8706_v29 = vld [vmem:[%s12414_s3 + $0x124] ss:$20 sps:$4 sm:$0xff]   ;;  %v9657_v41 = vld [vmem:[%s12411_s0 + $0x8] sm:$0xff] }
  0x27   : > { %v8702_v26 = vld [vmem:[%s12414_s3 + $0xf0] ss:$20 sps:$4 sm:$0xff]  }
  0x28   : > { %v556_v34 = vadd.f32 %v555_v30, %v554_v31  ;;  %v8708_v30 = vld [vmem:[%s12414_s3 + $0x118] ss:$20 sps:$4 sm:$0xff]   ;;  %v8709_v31 = vld [vmem:[%s12414_s3 + $0x120] ss:$20 sps:$4 sm:$0xff]  }
  0x29   : > { %5291 = vmatpush1.bf16.msra.mxu0 %v8690_v18  ;;  %5619 = vmatpush1.bf16.msra.mxu1 %v8691_v19 }
  0x2a   : > { %v558_v38 = vadd.f32 %v557_v32, %v556_v34  ;;  %5292 = vmatprep.subr.bf16.mxu0 %v8692_v20  ;;  %5620 = vmatprep.subr.bf16.mxu1 %v8694_v21  ;;  %v9700_v32 = vmov 269488144  }
  0x2b   : > { %v583_v33 = vunpack.c.l.s4 %v9700_v32 }
  0x2c   : > { %v560_v40 = vadd.f32 %v559_v37, %v558_v38 }
  0x2d   : > { %5293 = vmatpush1.bf16.msra.mxu0 %v8696_v22  ;;  %5621 = vmatpush1.bf16.msra.mxu1 %v8697_v23  ;;  %v584_v34 = vunpack.c.0.s8 %v583_v33 }
  0x2e   : > { %v562_v45 = vadd.f32 %v561_v39, %v560_v40  ;;  %5294 = vmatprep.subr.bf16.mxu0 %v8698_v24  ;;  %5622 = vmatprep.subr.bf16.mxu1 %v8700_v25  ;;  %v9656_v39 = vld [vmem:[%s12411_s0] sm:$0xff] }
  0x2f   : > { %v9929_v35 = vsub.s32 %v584_v34, %v9794_v5 }
  0x30   : > { %v564_v47 = vadd.f32 %v563_v44, %v562_v45  ;;  %v9659_v45 = vld [vmem:[%s12411_s0 + $0x18] sm:$0xff] }
  0x31   : > { %5295 = vmatpush1.bf16.msra.mxu0 %v8702_v26  ;;  %5623 = vmatpush1.bf16.msra.mxu1 %v8703_v27 }
  0x32   : > { %v566_v51 = vadd.f32 %v565_v46, %v564_v47  ;;  %5296 = vmatprep.subr.bf16.mxu0 %v8704_v28  ;;  %5624 = vmatprep.subr.bf16.mxu1 %v8706_v29 }
  0x34   : > { %v568_v53 = vadd.f32 %v567_v50, %v566_v51 }
  0x35   : > { %5297 = vmatpush1.bf16.msra.mxu0 %v8708_v30  ;;  %5625 = vmatpush1.bf16.msra.mxu1 %v8709_v31 }
  0x36   : > { %v570_v56 = vadd.f32 %v569_v52, %v568_v53 }
  0x38   : > { %v572_v58 = vadd.f32 %v571_v55, %v570_v56 }
  0x3a   : > { %v574_v60 = vadd.f32 %v573_v57, %v572_v58 }
  0x3c   : > { %v576_v61 = vadd.f32 %v575_v59, %v574_v60 }
  0x3e   : > { %577 = vadd.xlane.f32.xlu0 %v576_v61 }
  0xcb   : > { %v578_v36 = vpop.xlane.xlu0 %577 }
  0xcc   : > { %v580_v37 = vmul.f32 0.00048828125, %v578_v36 }
  0xce   : > { %v588_v38 = vrot.slane %v580_v37, %v9929_v35 }
  0xd0   : > { %v9935_v40 = vsub.f32 %v9656_v39, %v588_v38  ;;  %v9940_v42 = vsub.f32 %v9657_v41, %v588_v38  ;;  %v9945_v44 = vsub.f32 %v9658_v43, %v588_v38  ;;  %v9950_v46 = vsub.f32 %v9659_v45, %v588_v38  ;;  %v8710_v43 = vld [vmem:[%s12414_s3 + $0x144] ss:$20 sps:$4 sm:$0xff]   ;;  %v8712_v45 = vld [vmem:[%s12414_s3 + $0x14c] ss:$20 sps:$4 sm:$0xff]  }
  0xd1   : > { %5298 = vmatprep.subr.bf16.mxu0 %v8710_v43  ;;  %5626 = vmatprep.subr.bf16.mxu1 %v8712_v45 }
  0xd2   : > { %v594_v47 = vmul.f32 %v9935_v40, %v9935_v40  ;;  %v595_v48 = vmul.f32 %v9940_v42, %v9940_v42  ;;  %v596_v49 = vmul.f32 %v9945_v44, %v9945_v44  ;;  %v597_v50 = vmul.f32 %v9950_v46, %v9950_v46 }
  0xd4   : > { %v602_v51 = vcombine.high %v594_v47, %v594_v47  ;;  %v609_v52 = vrot.slane %v594_v47, %v9800_v9  ;;  %v619_v53 = vcombine.high %v595_v48, %v595_v48  ;;  %v626_v54 = vrot.slane %v595_v48, %v9800_v9  ;;  %v8714_v47 = vld [vmem:[%s12414_s3 + $0x140] ss:$20 sps:$4 sm:$0xff]   ;;  %v8715_v48 = vld [vmem:[%s12414_s3 + $0x148] ss:$20 sps:$4 sm:$0xff]  }
  0xd5   : > { %v636_v55 = vcombine.high %v596_v49, %v596_v49  ;;  %v643_v56 = vrot.slane %v596_v49, %v9800_v9  ;;  %v653_v57 = vcombine.high %v597_v50, %v597_v50  ;;  %v660_v58 = vrot.slane %v597_v50, %v9800_v9  ;;  %5299 = vmatpush1.bf16.msra.mxu0 %v8714_v47  ;;  %v8716_v49 = vld [vmem:[%s12414_s3 + $0x16c] ss:$20 sps:$4 sm:$0xff]   ;;  %v8718_v50 = vld [vmem:[%s12414_s3 + $0x174] ss:$20 sps:$4 sm:$0xff]  }
  0xd6   : > { %v616_v59 = vrot.slane %v602_v51, %v9800_v9  ;;  %v617_v60 = vcombine.high %v609_v52, %v609_v52  ;;  %v633_v61 = vrot.slane %v619_v53, %v9800_v9  ;;  %v634_v62 = vcombine.high %v626_v54, %v626_v54  ;;  %5627 = vmatpush1.bf16.msra.mxu1 %v8715_v48  ;;  %v8720_v51 = vld [vmem:[%s12414_s3 + $0x168] ss:$20 sps:$4 sm:$0xff]  }
  0xd7   : > { %v686_v63 = vsel %vm545_vm1, %v609_v52, 0.0  ;;  %v693_v0 = vsel %vm545_vm1, %v626_v54, 0.0  ;;  %v650_v1 = vrot.slane %v636_v55, %v9800_v9  ;;  %v651_v2 = vcombine.high %v643_v56, %v643_v56  ;;  %v8721_v52 = vld [vmem:[%s12414_s3 + $0x170] ss:$20 sps:$4 sm:$0xff]   ;;  %5300 = vmatprep.subr.bf16.mxu0 %v8716_v49  ;;  %5628 = vmatprep.subr.bf16.mxu1 %v8718_v50  ;;  %v8722_v53 = vld [vmem:[%s12414_s3 + $0x194] ss:$20 sps:$4 sm:$0xff]  }
  0xd8   : > { %v618_v3 = vcombine.high %v616_v59, %v616_v59  ;;  %v635_v4 = vcombine.high %v633_v61, %v633_v61  ;;  %v687_v6 = vsel %vm545_vm1, %v617_v60, 0.0  ;;  %v689_v7 = vsel %vm545_vm1, %v616_v59, 0.0  ;;  %v8724_v54 = vld [vmem:[%s12414_s3 + $0x19c] ss:$20 sps:$4 sm:$0xff]   ;;  %v8732_v59 = vld [vmem:[%s12414_s3 + $0x1b8] ss:$20 sps:$4 sm:$0xff]  }
  0xd9   : > { %v688_v8 = vadd.f32 %v687_v6, %v686_v63  ;;  %v695_v10 = vsel %vm545_vm1, %v634_v62, 0.0  ;;  %v697_v11 = vsel %vm545_vm1, %v633_v61, 0.0  ;;  %v652_v12 = vcombine.high %v650_v1, %v650_v1  ;;  %5301 = vmatpush1.bf16.msra.mxu0 %v8720_v51  ;;  %v8726_v55 = vld [vmem:[%s12414_s3 + $0x190] ss:$20 sps:$4 sm:$0xff]   ;;  %v8733_v60 = vld [vmem:[%s12414_s3 + $0x1c0] ss:$20 sps:$4 sm:$0xff]  }
  0xda   : > { %v691_v13 = vsel %vm545_vm1, %v618_v3, 0.0  ;;  %v667_v14 = vrot.slane %v653_v57, %v9800_v9  ;;  %v668_v15 = vcombine.high %v660_v58, %v660_v58  ;;  %v699_v16 = vsel %vm545_vm1, %v635_v4, 0.0  ;;  %5629 = vmatpush1.bf16.msra.mxu1 %v8721_v52  ;;  %5302 = vmatprep.subr.bf16.mxu0 %v8722_v53  ;;  %v8728_v57 = vld [vmem:[%s12414_s3 + $0x1bc] ss:$20 sps:$4 sm:$0xff]   ;;  %v8734_v61 = vld [vmem:[%s12414_s3 + $0x1e4] ss:$20 sps:$4 sm:$0xff]  }
  0xdb   : > { %v690_v17 = vadd.f32 %v689_v7, %v688_v8  ;;  %v701_v18 = vsel %vm545_vm1, %v643_v56, 0.0  ;;  %v703_v19 = vsel %vm545_vm1, %v651_v2, 0.0  ;;  %v705_v20 = vsel %vm545_vm1, %v650_v1, 0.0  ;;  %v8727_v56 = vld [vmem:[%s12414_s3 + $0x198] ss:$20 sps:$4 sm:$0xff]   ;;  %5630 = vmatprep.subr.bf16.mxu1 %v8724_v54 }
  0xdc   : > { %v669_v21 = vcombine.high %v667_v14, %v667_v14  ;;  %v707_v22 = vsel %vm545_vm1, %v652_v12, 0.0  ;;  %v709_v23 = vsel %vm545_vm1, %v660_v58, 0.0  ;;  %v711_v24 = vsel %vm545_vm1, %v668_v15, 0.0  ;;  %v8730_v58 = vld [vmem:[%s12414_s3 + $0x1c4] ss:$20 sps:$4 sm:$0xff]  }
  0xdd   : > { %v692_v25 = vadd.f32 %v691_v13, %v690_v17  ;;  %v713_v26 = vsel %vm545_vm1, %v667_v14, 0.0  ;;  %5303 = vmatpush1.bf16.msra.mxu0 %v8726_v55  ;;  %v8736_v62 = vld [vmem:[%s12414_s3 + $0x1ec] ss:$20 sps:$4 sm:$0xff]   ;;  %v8742_v2 = vld [vmem:[%s12414_s3 + $0x214] ss:$20 sps:$4 sm:$0xff]   ;;  %v10087_v17 = vsub.s32 0, %v9794_v5 }
  0xde   : > { %v715_v27 = vsel %vm545_vm1, %v669_v21, 0.0  ;;  %5631 = vmatpush1.bf16.msra.mxu1 %v8727_v56  ;;  %5304 = vmatprep.subr.bf16.mxu0 %v8728_v57  ;;  %v8738_v63 = vld [vmem:[%s12414_s3 + $0x1e0] ss:$20 sps:$4 sm:$0xff]   ;;  %v8744_v3 = vld [vmem:[%s12414_s3 + $0x208] ss:$20 sps:$4 sm:$0xff]   ;;  %v10099_v21 = vsub.s32 2, %v9794_v5 }
  0xdf   : > { %v694_v28 = vadd.f32 %v693_v0, %v692_v25  ;;  %5632 = vmatprep.subr.bf16.mxu1 %v8730_v58  ;;  %v8739_v0 = vld [vmem:[%s12414_s3 + $0x1e8] ss:$20 sps:$4 sm:$0xff]   ;;  %v8740_v1 = vld [vmem:[%s12414_s3 + $0x20c] ss:$20 sps:$4 sm:$0xff]   ;;  %v8745_v4 = vld [vmem:[%s12414_s3 + $0x210] ss:$20 sps:$4 sm:$0xff]  }
  0xe0   : > { %v8746_v6 = vld [vmem:[%s12414_s3 + $0x234] ss:$20 sps:$4 sm:$0xff]   ;;  %v8748_v7 = vld [vmem:[%s12414_s3 + $0x23c] ss:$20 sps:$4 sm:$0xff]   ;;  %v8754_v12 = vld [vmem:[%s12414_s3 + $0x264] ss:$20 sps:$4 sm:$0xff]  }
  0xe1   : > { %v696_v29 = vadd.f32 %v695_v10, %v694_v28  ;;  %5305 = vmatpush1.bf16.msra.mxu0 %v8732_v59  ;;  %v8750_v8 = vld [vmem:[%s12414_s3 + $0x230] ss:$20 sps:$4 sm:$0xff]   ;;  %v8751_v10 = vld [vmem:[%s12414_s3 + $0x238] ss:$20 sps:$4 sm:$0xff]   ;;  %v8757_v14 = vld [vmem:[%s12414_s3 + $0x260] ss:$20 sps:$4 sm:$0xff]  }
  0xe2   : > { %5633 = vmatpush1.bf16.msra.mxu1 %v8733_v60  ;;  %5306 = vmatprep.subr.bf16.mxu0 %v8734_v61  ;;  %v8756_v13 = vld [vmem:[%s12414_s3 + $0x258] ss:$20 sps:$4 sm:$0xff]   ;;  %v763_v25 = vsub.s32 6, %v9794_v5 }
  0xe3   : > { %v698_v30 = vadd.f32 %v697_v11, %v696_v29  ;;  %5634 = vmatprep.subr.bf16.mxu1 %v8736_v62  ;;  %v8752_v11 = vld [vmem:[%s12414_s3 + $0x25c] ss:$20 sps:$4 sm:$0xff]   ;;  %v8760_v15 = vld [vmem:[%s12414_s3 + $0x284] ss:$20 sps:$4 sm:$0xff]  }
  0xe5   : > { %v700_v31 = vadd.f32 %v699_v16, %v698_v30  ;;  %5307 = vmatpush1.bf16.msra.mxu0 %v8738_v63  ;;  %v8763_v16 = vld [vmem:[%s12414_s3 + $0x28c] ss:$20 sps:$4 sm:$0xff]  }
  0xe6   : > { %5635 = vmatpush1.bf16.msra.mxu1 %v8739_v0  ;;  %5308 = vmatprep.subr.bf16.mxu0 %v8740_v1 }
  0xe7   : > { %v702_v32 = vadd.f32 %v701_v18, %v700_v31  ;;  %5636 = vmatprep.subr.bf16.mxu1 %v8742_v2  ;;  %v10090_v18 = vsub.s32 1, %v9794_v5 }
  0xe9   : > { %v704_v33 = vadd.f32 %v703_v19, %v702_v32  ;;  %5309 = vmatpush1.bf16.msra.mxu0 %v8744_v3  ;;  %v453_v19 = vld [vmem:[%s12412_s1] sm:$0xff] }
  0xea   : > { %5637 = vmatpush1.bf16.msra.mxu1 %v8745_v4  ;;  %5310 = vmatprep.subr.bf16.mxu0 %v8746_v6  ;;  %v744_v28 = vrot.slane %v453_v19, %v10090_v18  ;;  %v748_v30 = vrot.slane %v453_v19, %v10099_v21 }
  0xeb   : > { %v706_v34 = vadd.f32 %v705_v20, %v704_v33  ;;  %5638 = vmatprep.subr.bf16.mxu1 %v8748_v7  ;;  %v455_v20 = vld [vmem:[%s12413_s2] sm:$0xff] }
  0xec   : > { %v882_v29 = vrot.slane %v455_v20, %v10087_v17  ;;  %v886_v32 = vrot.slane %v455_v20, %v10090_v18  ;;  %v890_v33 = vrot.slane %v455_v20, %v10099_v21  ;;  %v906_v48 = vrot.slane %v455_v20, %v763_v25 }
  0xed   : > { %v708_v36 = vadd.f32 %v707_v22, %v706_v34  ;;  %5311 = vmatpush1.bf16.msra.mxu0 %v8750_v8  ;;  %v10102_v22 = vsub.s32 3, %v9794_v5  ;;  %v454_v34 = vld [vmem:[%s12412_s1 + $0x8] sm:$0xff] }
  0xee   : > { %5639 = vmatpush1.bf16.msra.mxu1 %v8751_v10  ;;  %5312 = vmatprep.subr.bf16.mxu0 %v8752_v11  ;;  %v772_v51 = vrot.slane %v454_v34, %v10087_v17  ;;  %v776_v52 = vrot.slane %v454_v34, %v10090_v18  ;;  %v780_v53 = vrot.slane %v454_v34, %v10099_v21 }
  0xef   : > { %v710_v37 = vadd.f32 %v709_v23, %v708_v36  ;;  %5640 = vmatprep.subr.bf16.mxu1 %v8754_v12  ;;  %v10105_v23 = vsub.s32 4, %v9794_v5  ;;  %v752_v31 = vrot.slane %v453_v19, %v10102_v22  ;;  %v784_v54 = vrot.slane %v454_v34, %v10102_v22 }
  0xf0   : > { %v796_v62 = vrot.slane %v454_v34, %v763_v25  ;;  %v943_v7 = vcombine.low %v882_v29, %v886_v32 }
  0xf1   : > { %v712_v38 = vadd.f32 %v711_v24, %v710_v37  ;;  %5313 = vmatpush1.bf16.msra.mxu0 %v8756_v13  ;;  %v759_v24 = vsub.s32 5, %v9794_v5  ;;  %v756_v36 = vrot.slane %v453_v19, %v10105_v23  ;;  %v898_v45 = vrot.slane %v455_v20, %v10105_v23 }
  0xf2   : > { %5641 = vmatpush1.bf16.msra.mxu1 %v8757_v14  ;;  %5323 = vmatprep.subr.bf16.mxu0 %v8760_v15  ;;  %v788_v60 = vrot.slane %v454_v34, %v10105_v23  ;;  %v802_v6 = vcombine.low %v748_v30, %v752_v31  ;;  %v835_v14 = vcombine.low %v772_v51, %v776_v52  ;;  %v1020_v52 = vld [vmem:[#allocation2 + $0x8] sm:$0xff] }
  0xf3   : > { %v714_v39 = vadd.f32 %v713_v26, %v712_v38  ;;  %5651 = vmatprep.subr.bf16.mxu1 %v8763_v16  ;;  %v767_v26 = vsub.s32 7, %v9794_v5  ;;  %v894_v5 = vrot.slane %v455_v20, %v10102_v22  ;;  %v760_v37 = vrot.slane %v453_v19, %v759_v24 }
  0xf4   : > { %v764_v38 = vrot.slane %v453_v19, %v763_v25  ;;  %v902_v47 = vrot.slane %v455_v20, %v759_v24  ;;  %v792_v61 = vrot.slane %v454_v34, %v759_v24  ;;  %v836_v15 = vcombine.low %v780_v53, %v784_v54  ;;  %v1021_v54 = vld [vmem:[#allocation2 + $0x10] sm:$0xff] }
  0xf5   : > { %v716_v41 = vadd.f32 %v715_v27, %v714_v39  ;;  %v740_v27 = vrot.slane %v453_v19, %v10087_v17  ;;  %v456_v39 = vld [vmem:[%s12413_s2 + $0x8] sm:$0xff]  ;;  %v768_v43 = vrot.slane %v453_v19, %v767_v26  ;;  %v910_v50 = vrot.slane %v455_v20, %v767_v26 }
  0xf6   : > { %v914_v55 = vrot.slane %v456_v39, %v10087_v17  ;;  %v918_v56 = vrot.slane %v456_v39, %v10090_v18  ;;  %v922_v58 = vrot.slane %v456_v39, %v10099_v21  ;;  %v926_v59 = vrot.slane %v456_v39, %v10102_v22 }
  0xf7   : > { %717 = vadd.xlane.f32.xlu0 %v716_v41  ;;  %v800_v63 = vrot.slane %v454_v34, %v767_v26  ;;  %v930_v0 = vrot.slane %v456_v39, %v10105_v23  ;;  %v934_v1 = vrot.slane %v456_v39, %v759_v24  ;;  %v938_v2 = vrot.slane %v456_v39, %v763_v25 }
  0xf8   : > { %v942_v3 = vrot.slane %v456_v39, %v767_v26  ;;  %v801_v4 = vcombine.low %v740_v27, %v744_v28  ;;  %v944_v8 = vcombine.low %v890_v33, %v894_v5  ;;  %v818_v10 = vcombine.low %v756_v36, %v760_v37 }
  0xf9   : > { %v819_v11 = vcombine.low %v764_v38, %v768_v43  ;;  %v960_v12 = vcombine.low %v898_v45, %v902_v47  ;;  %v961_v13 = vcombine.low %v906_v48, %v910_v50  ;;  %v852_v16 = vcombine.low %v788_v60, %v792_v61  ;;  %v1019_v48 = vld [vmem:[#allocation2] sm:$0xff] }
  0xfa   : > { %v853_v19 = vcombine.low %v796_v62, %v800_v63  ;;  %v977_v20 = vcombine.low %v914_v55, %v918_v56  ;;  %v978_v34 = vcombine.low %v922_v58, %v926_v59  ;;  %v809_v24 = vrot.slane %v801_v4, %v9800_v9  ;;  %v1022_v56 = vld [vmem:[#allocation2 + $0x18] sm:$0xff] }
  0xfb   : > { %v816_v25 = vrot.slane %v802_v6, %v9800_v9  ;;  %v951_v26 = vrot.slane %v943_v7, %v9800_v9  ;;  %v958_v27 = vrot.slane %v944_v8, %v9800_v9  ;;  %v826_v28 = vrot.slane %v818_v10, %v9800_v9 }
  0xfc   : > { %v833_v29 = vrot.slane %v819_v11, %v9800_v9  ;;  %v968_v30 = vrot.slane %v960_v12, %v9800_v9  ;;  %v975_v31 = vrot.slane %v961_v13, %v9800_v9  ;;  %v843_v32 = vrot.slane %v835_v14, %v9800_v9 }
  0xfd   : > { %v850_v33 = vrot.slane %v836_v15, %v9800_v9  ;;  %v860_v5 = vrot.slane %v852_v16, %v9800_v9  ;;  %v867_v36 = vrot.slane %v853_v19, %v9800_v9  ;;  %v985_v37 = vrot.slane %v977_v20, %v9800_v9 }
  0xfe   : > { %v992_v38 = vrot.slane %v978_v34, %v9800_v9  ;;  %v817_v47 = vcombine.low %v809_v24, %v816_v25  ;;  %v834_v51 = vcombine.low %v826_v28, %v833_v29  ;;  %v976_v58 = vcombine.low %v968_v30, %v975_v31  ;;  %v8758_v29 = vld [vmem:[%s12414_s3 + $0x280] ss:$20 sps:$4 sm:$0xff]   ;;  %v8761_v30 = vld [vmem:[%s12414_s3 + $0x288] ss:$20 sps:$4 sm:$0xff]  }
  0xff   : > { %v851_v53 = vcombine.low %v843_v32, %v850_v33  ;;  %v868_v55 = vcombine.low %v860_v5, %v867_v36  ;;  %v8766_v5 = vld [vmem:[%s12414_s3 + $0x2ac] ss:$20 sps:$4 sm:$0xff]   ;;  %v8769_v36 = vld [vmem:[%s12414_s3 + $0x2b4] ss:$20 sps:$4 sm:$0xff]  }
 0x100   : > { %v993_v59 = vcombine.low %v985_v37, %v992_v38  ;;  %v8764_v38 = vld [vmem:[%s12414_s3 + $0x2a8] ss:$20 sps:$4 sm:$0xff]  }
 0x184   : > { %v718_v41 = vpop.xlane.xlu0 %717 }
 0x185   : > { %v719_v49 = vmul.f32 0.00048828125, %v718_v41  ;;  %v994_v41 = vcombine.low %v930_v0, %v934_v1  ;;  %v1023_v1 = vmul.f32 0.5, %v1019_v48  ;;  %v8773_v48 = vld [vmem:[%s12414_s3 + $0x2d8] ss:$20 sps:$4 sm:$0xff]  }
 0x187   : > { %v720_v57 = vadd.f32 1e-05, %v719_v49  ;;  %v995_v49 = vcombine.low %v938_v2, %v942_v3  ;;  %v1002_v39 = vrot.slane %v994_v41, %v9800_v9  ;;  %v1025_v2 = vmul.f32 0.5, %v1021_v54  ;;  %v8784_v54 = vld [vmem:[%s12414_s3 + $0x324] ss:$20 sps:$4 sm:$0xff]  }
 0x188   : > { %v1026_v3 = vmul.f32 0.5, %v1022_v56  ;;  %v8782_v56 = vld [vmem:[%s12414_s3 + $0x320] ss:$20 sps:$4 sm:$0xff]  }
 0x189   : > { %9650 = vrsqrt.f32 %v720_v57  ;;  %v1009_v43 = vrot.slane %v995_v49, %v9800_v9  ;;  %v959_v57 = vcombine.low %v951_v26, %v958_v27 }
 0x18b   : > { %v1010_v60 = vcombine.low %v1002_v39, %v1009_v43  ;;  %v8767_v39 = vld [vmem:[%s12414_s3 + $0x2b0] ss:$20 sps:$4 sm:$0xff]   ;;  %v8772_v43 = vld [vmem:[%s12414_s3 + $0x2d4] ss:$20 sps:$4 sm:$0xff]  }
 0x193   : > { %v9651_v45 = vpop.eup %9650 }
 0x194   : > { %v729_v50 = vrot.slane %v9651_v45, %v9929_v35  ;;  %v1024_v35 = vmul.f32 0.5, %v1020_v52  ;;  %v8775_v45 = vld [vmem:[%s12414_s3 + $0x2dc] ss:$20 sps:$4 sm:$0xff]   ;;  %v8776_v52 = vld [vmem:[%s12414_s3 + $0x2f8] ss:$20 sps:$4 sm:$0xff]  }
 0x196   : > { %v731_v61 = vmul.f32 %v729_v50, %v9935_v40  ;;  %v732_v62 = vmul.f32 %v729_v50, %v9940_v42  ;;  %v733_v63 = vmul.f32 %v729_v50, %v9945_v44  ;;  %v734_v0 = vmul.f32 %v729_v50, %v9950_v46  ;;  %v8778_v50 = vld [vmem:[%s12414_s3 + $0x2fc] ss:$20 sps:$4 sm:$0xff]  }
 0x197   : > { %v9701_v44 = vmov 0.0  }
 0x198   : > { %v873_v4 = vmul.f32 %v817_v47, %v731_v61  ;;  %v874_v6 = vmul.f32 %v834_v51, %v732_v62  ;;  %v875_v7 = vmul.f32 %v851_v53, %v733_v63  ;;  %v876_v8 = vmul.f32 %v868_v55, %v734_v0  ;;  %v8770_v47 = vld [vmem:[%s12414_s3 + $0x2d0] ss:$20 sps:$4 sm:$0xff]   ;;  %v8779_v53 = vld [vmem:[%s12414_s3 + $0x300] ss:$20 sps:$4 sm:$0xff]  }
 0x199   : > { %v8781_v51 = vld [vmem:[%s12414_s3 + $0x304] ss:$20 sps:$4 sm:$0xff]   ;;  %v8787_v55 = vld [vmem:[%s12414_s3 + $0x32c] ss:$20 sps:$4 sm:$0xff]   ;;  %v8796_v62 = vld [vmem:[%s12414_s3 + $0x374] ss:$20 sps:$4 sm:$0xff]  }
 0x19a   : > { %v1015_v10 = vadd.f32 %v959_v57, %v873_v4  ;;  %v1016_v11 = vadd.f32 %v976_v58, %v874_v6  ;;  %v1017_v12 = vadd.f32 %v993_v59, %v875_v7  ;;  %v1018_v13 = vadd.f32 %v1010_v60, %v876_v8  ;;  %v8785_v57 = vld [vmem:[%s12414_s3 + $0x328] ss:$20 sps:$4 sm:$0xff]   ;;  %v8790_v58 = vld [vmem:[%s12414_s3 + $0x34c] ss:$20 sps:$4 sm:$0xff]   ;;  %v8791_v61 = vld [vmem:[%s12414_s3 + $0x350] ss:$20 sps:$4 sm:$0xff]  }
 0x19b   : > { %v8793_v59 = vld [vmem:[%s12414_s3 + $0x354] ss:$20 sps:$4 sm:$0xff]   ;;  %v8799_v63 = vld [vmem:[%s12414_s3 + $0x37c] ss:$20 sps:$4 sm:$0xff]   ;;  %v8808_v6 = vld [vmem:[%s12414_s3 + $0x3c4] ss:$20 sps:$4 sm:$0xff]  }
 0x19c   : > { %v1027_v14 = vadd.f32 %v1023_v1, %v1015_v10  ;;  %v1028_v40 = vadd.f32 %v1024_v35, %v1016_v11  ;;  %v1029_v15 = vadd.f32 %v1025_v2, %v1017_v12  ;;  %v1030_v42 = vadd.f32 %v1026_v3, %v1018_v13  ;;  %v8788_v60 = vld [vmem:[%s12414_s3 + $0x348] ss:$20 sps:$4 sm:$0xff]   ;;  %v8794_v0 = vld [vmem:[%s12414_s3 + $0x370] ss:$20 sps:$4 sm:$0xff]   ;;  %v8797_v1 = vld [vmem:[%s12414_s3 + $0x378] ss:$20 sps:$4 sm:$0xff]  }
 0x19d   : > { %v8802_v35 = vld [vmem:[%s12414_s3 + $0x39c] ss:$20 sps:$4 sm:$0xff]   ;;  %v8805_v2 = vld [vmem:[%s12414_s3 + $0x3a4] ss:$20 sps:$4 sm:$0xff]   ;;  %v8803_v4 = vld [vmem:[%s12414_s3 + $0x3a0] ss:$20 sps:$4 sm:$0xff]  }
 0x19e   : > { %vm1031_vm2 = vcmp.ge.f32.partialorder %v1027_v14, 1.0  ;;  %vm1032_vm3 = vcmp.ge.f32.partialorder %v1028_v40, 1.0  ;;  %vm1033_vm4 = vcmp.ge.f32.partialorder %v1029_v15, 1.0  ;;  %vm1034_vm5 = vcmp.ge.f32.partialorder %v1030_v42, 1.0  ;;  %v8800_v3 = vld [vmem:[%s12414_s3 + $0x398] ss:$20 sps:$4 sm:$0xff]  }
 0x19f   : > { %v7553_v46 = vsel %vm1031_vm2, 1.0, %v9701_v44  ;;  %v10159_v16 = vsel %vm1032_vm3, 1.0, %v9701_v44  ;;  %v10162_v19 = vsel %vm1033_vm4, 1.0, %v9701_v44  ;;  %v10171_v27 = vsel %vm1034_vm5, 1.0, %v9701_v44  ;;  %v8811_v7 = vld [vmem:[%s12414_s3 + $0x3cc] ss:$20 sps:$4 sm:$0xff]  }
 0x1a0   : > { %vm1043_vm6 = vcmp.gt.f32.partialorder %v7553_v46, 0.0  ;;  %v1066_v20 = vrot.slane %v7553_v46, %v9800_v9  ;;  %v1059_v34 = vcombine.high %v7553_v46, %v7553_v46  ;;  %vm1044_vm7 = vcmp.gt.f32.partialorder %v10159_v16, 0.0  ;;  %v8806_v8 = vld [vmem:[%s12414_s3 + $0x3c0] ss:$20 sps:$4 sm:$0xff]   ;;  %v8809_v10 = vld [vmem:[%s12414_s3 + $0x3c8] ss:$20 sps:$4 sm:$0xff]  }
 0x1a1   : > { %v1047_v41 = vsel %vm1043_vm6, 0.0, %v1027_v14  ;;  %v1048_v49 = vsel %vm1044_vm7, 0.0, %v1028_v40  ;;  %vm1045_vm8 = vcmp.gt.f32.partialorder %v10162_v19, 0.0  ;;  %vm1046_vm9 = vcmp.gt.f32.partialorder %v10171_v27, 0.0  ;;  %v8814_v11 = vld [vmem:[%s12414_s3 + $0x3ec] ss:$20 sps:$4 sm:$0xff]  }
 0x1a2   : > { %1051 = vst [vmem:[#allocation2] sm:$0xff] %v1047_v41  ;;  %v1074_v24 = vcombine.high %v1066_v20, %v1066_v20  ;;  %v10167_v25 = vrot.slane %v1059_v34, %v9800_v9  ;;  %1052 = vst [vmem:[#allocation2 + $0x8] sm:$0xff] %v1048_v49  ;;  %v1049_v26 = vsel %vm1045_vm8, 0.0, %v1029_v15  ;;  %v10183_v32 = vpack.c.bf16 %v1066_v20, %v1066_v20  ;;  %v8817_v12 = vld [vmem:[%s12414_s3 + $0x3f4] ss:$20 sps:$4 sm:$0xff]  }
 0x1a3   : > { %1053 = vst [vmem:[#allocation2 + $0x10] sm:$0xff] %v1049_v26  ;;  %v1050_v37 = vsel %vm1046_vm9, 0.0, %v1030_v42  ;;  %v8812_v13 = vld [vmem:[%s12414_s3 + $0x3e8] ss:$20 sps:$4 sm:$0xff]   ;;  %v8815_v14 = vld [vmem:[%s12414_s3 + $0x3f0] ss:$20 sps:$4 sm:$0xff]  }
 0x1a4   : > { %v10173_v28 = vpack.c.bf16 %v1074_v24, %v1074_v24  ;;  %v1075_v31 = vcombine.high %v10167_v25, %v10167_v25  ;;  %1054 = vst [vmem:[#allocation2 + $0x18] sm:$0xff] %v1050_v37  ;;  %v8820_v40 = vld [vmem:[%s12414_s3 + $0x414] ss:$20 sps:$4 sm:$0xff]   ;;  %v8823_v15 = vld [vmem:[%s12414_s3 + $0x41c] ss:$20 sps:$4 sm:$0xff]  }
 0x1a5   : > { %v8818_v42 = vld [vmem:[%s12414_s3 + $0x410] ss:$20 sps:$4 sm:$0xff]   ;;  %v8821_v46 = vld [vmem:[%s12414_s3 + $0x418] ss:$20 sps:$4 sm:$0xff]   ;;  %v8827_v49 = vld [vmem:[%s12414_s3 + $0x440] ss:$20 sps:$4 sm:$0xff]  }
 0x1a6   : > { %5314 = vmatprep.mubr.bf16.mxu0 %v10173_v28  ;;  %5642 = vmatprep.mubr.bf16.mxu1 %v10173_v28  ;;  %v10187_v33 = vpack.c.bf16 %v1075_v31, %v1075_v31  ;;  %v8826_v20 = vld [vmem:[%s12414_s3 + $0x43c] ss:$20 sps:$4 sm:$0xff]   ;;  %v8829_v34 = vld [vmem:[%s12414_s3 + $0x444] ss:$20 sps:$4 sm:$0xff]   ;;  %v8835_v26 = vld [vmem:[%s12414_s3 + $0x46c] ss:$20 sps:$4 sm:$0xff]  }
 0x1a7   : > { %5315 = vmatmul.mubr.bf16.vlgmr.msra.gmra.mrb[0].mxu0 %v10183_v32  ;;  %5643 = vmatmul.mubr.bf16.vlgmr.msra.gmra.mrb[0].mxu1 %v10183_v32  ;;  %v8824_v41 = vld [vmem:[%s12414_s3 + $0x438] ss:$20 sps:$4 sm:$0xff]   ;;  %v8839_v37 = vld [vmem:[%s12414_s3 + $0x490] ss:$20 sps:$4 sm:$0xff]  }
 0x1a8   : > { %5324 = vmatpush1.bf16.msra.mxu0 %v8758_v29  ;;  %5652 = vmatpush1.bf16.msra.mxu1 %v8761_v30  ;;  %v8832_v24 = vld [vmem:[%s12414_s3 + $0x464] ss:$20 sps:$4 sm:$0xff]   ;;  %v8830_v29 = vld [vmem:[%s12414_s3 + $0x460] ss:$20 sps:$4 sm:$0xff]   ;;  %v8833_v30 = vld [vmem:[%s12414_s3 + $0x468] ss:$20 sps:$4 sm:$0xff]  }
 0x1a9   : > { %5355 = vmatprep.mubr.bf16.mxu0 %v10187_v33  ;;  %5683 = vmatprep.mubr.bf16.mxu1 %v10187_v33  ;;  %v8838_v31 = vld [vmem:[%s12414_s3 + $0x48c] ss:$20 sps:$4 sm:$0xff]  }
 0x1aa   : > { %5325 = vmatprep.subr.bf16.mxu0 %v8766_v5  ;;  %5653 = vmatprep.subr.bf16.mxu1 %v8769_v36  ;;  %v8841_v5 = vld [vmem:[%s12414_s3 + $0x494] ss:$20 sps:$4 sm:$0xff]  }
 0x1ab   : > { %v8836_v36 = vld [vmem:[%s12414_s3 + $0x488] ss:$20 sps:$4 sm:$0xff]  }
 0x1ac   : > { %5326 = vmatpush1.bf16.msra.mxu0 %v8764_v38  ;;  %5654 = vmatpush1.bf16.msra.mxu1 %v8767_v39  ;;  %v8844_v38 = vld [vmem:[%s12414_s3 + $0x4b4] ss:$20 sps:$4 sm:$0xff]   ;;  %v8847_v39 = vld [vmem:[%s12414_s3 + $0x4bc] ss:$20 sps:$4 sm:$0xff]  }
 0x1ad   : > { %5327 = vmatprep.subr.bf16.mxu0 %v8772_v43  ;;  %5655 = vmatprep.subr.bf16.mxu1 %v8775_v45  ;;  %v8842_v43 = vld [vmem:[%s12414_s3 + $0x4b0] ss:$20 sps:$4 sm:$0xff]   ;;  %v8845_v45 = vld [vmem:[%s12414_s3 + $0x4b8] ss:$20 sps:$4 sm:$0xff]  }
 0x1b0   : > { %5328 = vmatpush1.bf16.msra.mxu0 %v8770_v47  ;;  %5656 = vmatpush1.bf16.msra.mxu1 %v8773_v48  ;;  %v8850_v47 = vld [vmem:[%s12414_s3 + $0x4dc] ss:$20 sps:$4 sm:$0xff]   ;;  %v8853_v48 = vld [vmem:[%s12414_s3 + $0x4e4] ss:$20 sps:$4 sm:$0xff]  }
 0x1b1   : > { %5329 = vmatprep.subr.bf16.mxu0 %v8778_v50  ;;  %5657 = vmatprep.subr.bf16.mxu1 %v8781_v51  ;;  %v10370_v50 = vrot.slane %v10159_v16, %v9800_v9  ;;  %v8848_v51 = vld [vmem:[%s12414_s3 + $0x4d8] ss:$20 sps:$4 sm:$0xff]  }
 0x1b4   : > { %5330 = vmatpush1.bf16.msra.mxu0 %v8776_v52  ;;  %5658 = vmatpush1.bf16.msra.mxu1 %v8779_v53  ;;  %v8851_v52 = vld [vmem:[%s12414_s3 + $0x4e0] ss:$20 sps:$4 sm:$0xff]   ;;  %v8856_v53 = vld [vmem:[%s12414_s3 + $0x504] ss:$20 sps:$4 sm:$0xff]  }
 0x1b5   : > { %5331 = vmatprep.subr.bf16.mxu0 %v8784_v54  ;;  %5659 = vmatprep.subr.bf16.mxu1 %v8787_v55  ;;  %v8859_v54 = vld [vmem:[%s12414_s3 + $0x50c] ss:$20 sps:$4 sm:$0xff]   ;;  %v1091_v55 = vcombine.high %v10370_v50, %v10370_v50 }
 0x1b8   : > { %5332 = vmatpush1.bf16.msra.mxu0 %v8782_v56  ;;  %5660 = vmatpush1.bf16.msra.mxu1 %v8785_v57  ;;  %v8854_v56 = vld [vmem:[%s12414_s3 + $0x500] ss:$20 sps:$4 sm:$0xff]   ;;  %v10391_v57 = vpack.c.bf16 %v10167_v25, %v10167_v25  ;;  %v8860_v25 = vld [vmem:[%s12414_s3 + $0x528] ss:$20 sps:$4 sm:$0xff]  }
 0x1b9   : > { %5333 = vmatprep.subr.bf16.mxu0 %v8790_v58  ;;  %5661 = vmatprep.subr.bf16.mxu1 %v8793_v59  ;;  %v8857_v58 = vld [vmem:[%s12414_s3 + $0x508] ss:$20 sps:$4 sm:$0xff]   ;;  %v10396_v59 = vpack.c.bf16 %v1091_v55, %v1091_v55  ;;  %v8931_v55 = vld [vmem:[%s12414_s3 + $0x6ec] ss:$20 sps:$4 sm:$0xff]  }
 0x1bc   : > { %5334 = vmatpush1.bf16.msra.mxu0 %v8788_v60  ;;  %5662 = vmatpush1.bf16.msra.mxu1 %v8791_v61  ;;  %v8862_v60 = vld [vmem:[%s12414_s3 + $0x52c] ss:$20 sps:$4 sm:$0xff]   ;;  %v8865_v61 = vld [vmem:[%s12414_s3 + $0x534] ss:$20 sps:$4 sm:$0xff]  }
 0x1bd   : > { %5335 = vmatprep.subr.bf16.mxu0 %v8796_v62  ;;  %5663 = vmatprep.subr.bf16.mxu1 %v8799_v63  ;;  %v8863_v62 = vld [vmem:[%s12414_s3 + $0x530] ss:$20 sps:$4 sm:$0xff]   ;;  %v8868_v63 = vld [vmem:[%s12414_s3 + $0x554] ss:$20 sps:$4 sm:$0xff]  }
 0x1c0   : > { %5336 = vmatpush1.bf16.msra.mxu0 %v8794_v0  ;;  %5664 = vmatpush1.bf16.msra.mxu1 %v8797_v1  ;;  %v8871_v0 = vld [vmem:[%s12414_s3 + $0x55c] ss:$20 sps:$4 sm:$0xff]  }
 0x1c1   : > { %5337 = vmatprep.subr.bf16.mxu0 %v8802_v35  ;;  %5665 = vmatprep.subr.bf16.mxu1 %v8805_v2  ;;  %v8866_v1 = vld [vmem:[%s12414_s3 + $0x550] ss:$20 sps:$4 sm:$0xff]   ;;  %v8869_v35 = vld [vmem:[%s12414_s3 + $0x558] ss:$20 sps:$4 sm:$0xff]  }
 0x1c2   : > { %v8874_v2 = vld [vmem:[%s12414_s3 + $0x57c] ss:$20 sps:$4 sm:$0xff]  }
 0x1c4   : > { %5338 = vmatpush1.bf16.msra.mxu0 %v8800_v3  ;;  %5666 = vmatpush1.bf16.msra.mxu1 %v8803_v4  ;;  %v8877_v3 = vld [vmem:[%s12414_s3 + $0x584] ss:$20 sps:$4 sm:$0xff]  }
 0x1c5   : > { %5339 = vmatprep.subr.bf16.mxu0 %v8808_v6  ;;  %5667 = vmatprep.subr.bf16.mxu1 %v8811_v7  ;;  %v8872_v4 = vld [vmem:[%s12414_s3 + $0x578] ss:$20 sps:$4 sm:$0xff]   ;;  %v8875_v6 = vld [vmem:[%s12414_s3 + $0x580] ss:$20 sps:$4 sm:$0xff]  }
 0x1c6   : > { %v8880_v7 = vld [vmem:[%s12414_s3 + $0x5a4] ss:$20 sps:$4 sm:$0xff]  }
 0x1c8   : > { %5340 = vmatpush1.bf16.msra.mxu0 %v8806_v8  ;;  %5668 = vmatpush1.bf16.msra.mxu1 %v8809_v10  ;;  %v8883_v8 = vld [vmem:[%s12414_s3 + $0x5ac] ss:$20 sps:$4 sm:$0xff]  }
 0x1c9   : > { %5341 = vmatprep.subr.bf16.mxu0 %v8814_v11  ;;  %5669 = vmatprep.subr.bf16.mxu1 %v8817_v12  ;;  %v8878_v10 = vld [vmem:[%s12414_s3 + $0x5a0] ss:$20 sps:$4 sm:$0xff]   ;;  %v8881_v11 = vld [vmem:[%s12414_s3 + $0x5a8] ss:$20 sps:$4 sm:$0xff]  }
 0x1ca   : > { %v8886_v12 = vld [vmem:[%s12414_s3 + $0x5cc] ss:$20 sps:$4 sm:$0xff]  }
 0x1cc   : > { %5342 = vmatpush1.bf16.msra.mxu0 %v8812_v13  ;;  %5670 = vmatpush1.bf16.msra.mxu1 %v8815_v14  ;;  %v8889_v13 = vld [vmem:[%s12414_s3 + $0x5d4] ss:$20 sps:$4 sm:$0xff]  }
 0x1cd   : > { %5343 = vmatprep.subr.bf16.mxu0 %v8820_v40  ;;  %5671 = vmatprep.subr.bf16.mxu1 %v8823_v15  ;;  %v8884_v14 = vld [vmem:[%s12414_s3 + $0x5c8] ss:$20 sps:$4 sm:$0xff]   ;;  %v8887_v40 = vld [vmem:[%s12414_s3 + $0x5d0] ss:$20 sps:$4 sm:$0xff]  }
 0x1ce   : > { %v8892_v15 = vld [vmem:[%s12414_s3 + $0x5f4] ss:$20 sps:$4 sm:$0xff]  }
 0x1d0   : > { %5344 = vmatpush1.bf16.msra.mxu0 %v8818_v42  ;;  %5672 = vmatpush1.bf16.msra.mxu1 %v8821_v46  ;;  %v8895_v42 = vld [vmem:[%s12414_s3 + $0x5fc] ss:$20 sps:$4 sm:$0xff]  }
 0x1d1   : > { %5345 = vmatprep.subr.bf16.mxu0 %v8826_v20  ;;  %5673 = vmatprep.subr.bf16.mxu1 %v8829_v34  ;;  %v8890_v46 = vld [vmem:[%s12414_s3 + $0x5f0] ss:$20 sps:$4 sm:$0xff]   ;;  %v8893_v20 = vld [vmem:[%s12414_s3 + $0x5f8] ss:$20 sps:$4 sm:$0xff]  }
 0x1d2   : > { %v8898_v34 = vld [vmem:[%s12414_s3 + $0x61c] ss:$20 sps:$4 sm:$0xff]  }
 0x1d4   : > { %5346 = vmatpush1.bf16.msra.mxu0 %v8824_v41  ;;  %5674 = vmatpush1.bf16.msra.mxu1 %v8827_v49  ;;  %v8901_v41 = vld [vmem:[%s12414_s3 + $0x624] ss:$20 sps:$4 sm:$0xff]  }
 0x1d5   : > { %5347 = vmatprep.subr.bf16.mxu0 %v8832_v24  ;;  %5675 = vmatprep.subr.bf16.mxu1 %v8835_v26  ;;  %v8896_v49 = vld [vmem:[%s12414_s3 + $0x618] ss:$20 sps:$4 sm:$0xff]   ;;  %v8899_v24 = vld [vmem:[%s12414_s3 + $0x620] ss:$20 sps:$4 sm:$0xff]  }
 0x1d6   : > { %v8904_v26 = vld [vmem:[%s12414_s3 + $0x644] ss:$20 sps:$4 sm:$0xff]  }
 0x1d8   : > { %5348 = vmatpush1.bf16.msra.mxu0 %v8830_v29  ;;  %5676 = vmatpush1.bf16.msra.mxu1 %v8833_v30  ;;  %v8907_v29 = vld [vmem:[%s12414_s3 + $0x64c] ss:$20 sps:$4 sm:$0xff]  }
 0x1d9   : > { %5349 = vmatprep.subr.bf16.mxu0 %v8838_v31  ;;  %5677 = vmatprep.subr.bf16.mxu1 %v8841_v5  ;;  %v8902_v30 = vld [vmem:[%s12414_s3 + $0x640] ss:$20 sps:$4 sm:$0xff]   ;;  %v8905_v31 = vld [vmem:[%s12414_s3 + $0x648] ss:$20 sps:$4 sm:$0xff]  }
 0x1da   : > { %v8910_v5 = vld [vmem:[%s12414_s3 + $0x66c] ss:$20 sps:$4 sm:$0xff]  }
 0x1dc   : > { %5350 = vmatpush1.bf16.msra.mxu0 %v8836_v36  ;;  %5678 = vmatpush1.bf16.msra.mxu1 %v8839_v37  ;;  %v8913_v36 = vld [vmem:[%s12414_s3 + $0x674] ss:$20 sps:$4 sm:$0xff]  }
 0x1dd   : > { %5351 = vmatprep.subr.bf16.mxu0 %v8844_v38  ;;  %5679 = vmatprep.subr.bf16.mxu1 %v8847_v39  ;;  %v8908_v37 = vld [vmem:[%s12414_s3 + $0x668] ss:$20 sps:$4 sm:$0xff]   ;;  %v8911_v38 = vld [vmem:[%s12414_s3 + $0x670] ss:$20 sps:$4 sm:$0xff]  }
 0x1de   : > { %v8916_v39 = vld [vmem:[%s12414_s3 + $0x694] ss:$20 sps:$4 sm:$0xff]  }
 0x1e0   : > { %5352 = vmatpush1.bf16.msra.mxu0 %v8842_v43  ;;  %5680 = vmatpush1.bf16.msra.mxu1 %v8845_v45  ;;  %v8919_v43 = vld [vmem:[%s12414_s3 + $0x69c] ss:$20 sps:$4 sm:$0xff]  }
 0x1e1   : > { %5353 = vmatprep.subr.bf16.mxu0 %v8850_v47  ;;  %5681 = vmatprep.subr.bf16.mxu1 %v8853_v48  ;;  %v8914_v45 = vld [vmem:[%s12414_s3 + $0x690] ss:$20 sps:$4 sm:$0xff]   ;;  %v8917_v47 = vld [vmem:[%s12414_s3 + $0x698] ss:$20 sps:$4 sm:$0xff]  }
 0x1e2   : > { %v8922_v48 = vld [vmem:[%s12414_s3 + $0x6bc] ss:$20 sps:$4 sm:$0xff]  }
 0x1e4   : > { %5354 = vmatpush1.bf16.msra.mxu0 %v8848_v51  ;;  %5682 = vmatpush1.bf16.msra.mxu1 %v8851_v52  ;;  %v8925_v51 = vld [vmem:[%s12414_s3 + $0x6c4] ss:$20 sps:$4 sm:$0xff]  }
 0x1e5   : > { %5364 = vmatprep.subr.bf16.mxu0 %v8856_v53  ;;  %5692 = vmatprep.subr.bf16.mxu1 %v8859_v54  ;;  %v8920_v52 = vld [vmem:[%s12414_s3 + $0x6b8] ss:$20 sps:$4 sm:$0xff]   ;;  %v8923_v53 = vld [vmem:[%s12414_s3 + $0x6c0] ss:$20 sps:$4 sm:$0xff]  }
 0x1e6   : > { %v8928_v54 = vld [vmem:[%s12414_s3 + $0x6e4] ss:$20 sps:$4 sm:$0xff]  }
 0x1e7   : > { %5356 = vmatmul.mubr.bf16.vlgmr.msra.gmra.mrb[0].mxu0 %v10391_v57  ;;  %5684 = vmatmul.mubr.bf16.vlgmr.msra.gmra.mrb[0].mxu1 %v10391_v57 }
 0x1e8   : > { %5365 = vmatpush1.bf16.msra.mxu0 %v8854_v56  ;;  %5396 = vmatprep.mubr.bf16.mxu0 %v10396_v59  ;;  %v8926_v56 = vld [vmem:[%s12414_s3 + $0x6e0] ss:$20 sps:$4 sm:$0xff]  }
 0x1e9   : > { %5693 = vmatpush1.bf16.msra.mxu1 %v8857_v58  ;;  %5724 = vmatprep.mubr.bf16.mxu1 %v10396_v59  ;;  %v8929_v58 = vld [vmem:[%s12414_s3 + $0x6e8] ss:$20 sps:$4 sm:$0xff]  }
 0x1ea   : > { %5366 = vmatprep.subr.bf16.mxu0 %v8862_v60  ;;  %5694 = vmatprep.subr.bf16.mxu1 %v8865_v61  ;;  %v8934_v60 = vld [vmem:[%s12414_s3 + $0x70c] ss:$20 sps:$4 sm:$0xff]   ;;  %v8937_v61 = vld [vmem:[%s12414_s3 + $0x714] ss:$20 sps:$4 sm:$0xff]  }
 0x1ec   : > { %5367 = vmatpush1.bf16.msra.mxu0 %v8860_v25  ;;  %v8932_v25 = vld [vmem:[%s12414_s3 + $0x708] ss:$20 sps:$4 sm:$0xff]  }
 0x1ed   : > { %5695 = vmatpush1.bf16.msra.mxu1 %v8863_v62  ;;  %5368 = vmatprep.subr.bf16.mxu0 %v8868_v63  ;;  %v8935_v62 = vld [vmem:[%s12414_s3 + $0x710] ss:$20 sps:$4 sm:$0xff]   ;;  %v8940_v63 = vld [vmem:[%s12414_s3 + $0x734] ss:$20 sps:$4 sm:$0xff]  }
 0x1ee   : > { %5696 = vmatprep.subr.bf16.mxu1 %v8871_v0  ;;  %v8943_v0 = vld [vmem:[%s12414_s3 + $0x73c] ss:$20 sps:$4 sm:$0xff]  }
 0x1f0   : > { %5369 = vmatpush1.bf16.msra.mxu0 %v8866_v1  ;;  %v1076_v1 = vcombine.high %v10159_v16, %v10159_v16  ;;  %v8949_v16 = vld [vmem:[%s12414_s3 + $0x764] ss:$20 sps:$4 sm:$0xff]  }
 0x1f1   : > { %5697 = vmatpush1.bf16.msra.mxu1 %v8869_v35  ;;  %5370 = vmatprep.subr.bf16.mxu0 %v8874_v2  ;;  %v8938_v35 = vld [vmem:[%s12414_s3 + $0x730] ss:$20 sps:$4 sm:$0xff]   ;;  %v8941_v2 = vld [vmem:[%s12414_s3 + $0x738] ss:$20 sps:$4 sm:$0xff]  }
 0x1f2   : > { %5698 = vmatprep.subr.bf16.mxu1 %v8877_v3  ;;  %v8946_v3 = vld [vmem:[%s12414_s3 + $0x75c] ss:$20 sps:$4 sm:$0xff]  }
 0x1f4   : > { %5371 = vmatpush1.bf16.msra.mxu0 %v8872_v4  ;;  %v10579_v4 = vrot.slane %v1076_v1, %v9800_v9  ;;  %v9007_v1 = vld [vmem:[%s12414_s3 + $0x8f0] ss:$20 sps:$4 sm:$0xff]  }
 0x1f5   : > { %5699 = vmatpush1.bf16.msra.mxu1 %v8875_v6  ;;  %5372 = vmatprep.subr.bf16.mxu0 %v8880_v7  ;;  %v8944_v6 = vld [vmem:[%s12414_s3 + $0x758] ss:$20 sps:$4 sm:$0xff]   ;;  %v8947_v7 = vld [vmem:[%s12414_s3 + $0x760] ss:$20 sps:$4 sm:$0xff]  }
 0x1f6   : > { %5700 = vmatprep.subr.bf16.mxu1 %v8883_v8  ;;  %v8952_v8 = vld [vmem:[%s12414_s3 + $0x784] ss:$20 sps:$4 sm:$0xff]  }
 0x1f8   : > { %5373 = vmatpush1.bf16.msra.mxu0 %v8878_v10  ;;  %v8955_v10 = vld [vmem:[%s12414_s3 + $0x78c] ss:$20 sps:$4 sm:$0xff]  }
 0x1f9   : > { %5701 = vmatpush1.bf16.msra.mxu1 %v8881_v11  ;;  %5374 = vmatprep.subr.bf16.mxu0 %v8886_v12  ;;  %v1092_v11 = vcombine.high %v10579_v4, %v10579_v4  ;;  %v8950_v12 = vld [vmem:[%s12414_s3 + $0x780] ss:$20 sps:$4 sm:$0xff]  }
 0x1fa   : > { %5702 = vmatprep.subr.bf16.mxu1 %v8889_v13  ;;  %v10600_v13 = vpack.c.bf16 %v10370_v50, %v10370_v50  ;;  %v8956_v50 = vld [vmem:[%s12414_s3 + $0x7a8] ss:$20 sps:$4 sm:$0xff]  }
 0x1fc   : > { %5375 = vmatpush1.bf16.msra.mxu0 %v8884_v14  ;;  %v8953_v14 = vld [vmem:[%s12414_s3 + $0x788] ss:$20 sps:$4 sm:$0xff]  }
 0x1fd   : > { %5703 = vmatpush1.bf16.msra.mxu1 %v8887_v40  ;;  %5376 = vmatprep.subr.bf16.mxu0 %v8892_v15  ;;  %v8958_v40 = vld [vmem:[%s12414_s3 + $0x7ac] ss:$20 sps:$4 sm:$0xff]   ;;  %v10609_v15 = vpack.c.bf16 %v1092_v11, %v1092_v11  ;;  %v9024_v11 = vld [vmem:[%s12414_s3 + $0x964] ss:$20 sps:$4 sm:$0xff]  }
 0x1fe   : > { %5704 = vmatprep.subr.bf16.mxu1 %v8895_v42  ;;  %v8961_v42 = vld [vmem:[%s12414_s3 + $0x7b4] ss:$20 sps:$4 sm:$0xff]  }
 0x200   : > { %5377 = vmatpush1.bf16.msra.mxu0 %v8890_v46  ;;  %v8959_v46 = vld [vmem:[%s12414_s3 + $0x7b0] ss:$20 sps:$4 sm:$0xff]  }
 0x201   : > { %5705 = vmatpush1.bf16.msra.mxu1 %v8893_v20  ;;  %5378 = vmatprep.subr.bf16.mxu0 %v8898_v34  ;;  %v8964_v20 = vld [vmem:[%s12414_s3 + $0x7d4] ss:$20 sps:$4 sm:$0xff]   ;;  %v8967_v34 = vld [vmem:[%s12414_s3 + $0x7dc] ss:$20 sps:$4 sm:$0xff]  }
 0x202   : > { %5706 = vmatprep.subr.bf16.mxu1 %v8901_v41  ;;  %v8962_v41 = vld [vmem:[%s12414_s3 + $0x7d0] ss:$20 sps:$4 sm:$0xff]  }
 0x204   : > { %5379 = vmatpush1.bf16.msra.mxu0 %v8896_v49  ;;  %v8965_v49 = vld [vmem:[%s12414_s3 + $0x7d8] ss:$20 sps:$4 sm:$0xff]  }
 0x205   : > { %5707 = vmatpush1.bf16.msra.mxu1 %v8899_v24  ;;  %5380 = vmatprep.subr.bf16.mxu0 %v8904_v26  ;;  %v8970_v24 = vld [vmem:[%s12414_s3 + $0x7fc] ss:$20 sps:$4 sm:$0xff]   ;;  %v8973_v26 = vld [vmem:[%s12414_s3 + $0x804] ss:$20 sps:$4 sm:$0xff]  }
 0x206   : > { %5708 = vmatprep.subr.bf16.mxu1 %v8907_v29  ;;  %v8968_v29 = vld [vmem:[%s12414_s3 + $0x7f8] ss:$20 sps:$4 sm:$0xff]  }
 0x208   : > { %5381 = vmatpush1.bf16.msra.mxu0 %v8902_v30  ;;  %v8971_v30 = vld [vmem:[%s12414_s3 + $0x800] ss:$20 sps:$4 sm:$0xff]  }
 0x209   : > { %5709 = vmatpush1.bf16.msra.mxu1 %v8905_v31  ;;  %5382 = vmatprep.subr.bf16.mxu0 %v8910_v5  ;;  %v8976_v31 = vld [vmem:[%s12414_s3 + $0x824] ss:$20 sps:$4 sm:$0xff]   ;;  %v8979_v5 = vld [vmem:[%s12414_s3 + $0x82c] ss:$20 sps:$4 sm:$0xff]  }
 0x20a   : > { %5710 = vmatprep.subr.bf16.mxu1 %v8913_v36  ;;  %v8974_v36 = vld [vmem:[%s12414_s3 + $0x820] ss:$20 sps:$4 sm:$0xff]  }
 0x20c   : > { %5383 = vmatpush1.bf16.msra.mxu0 %v8908_v37  ;;  %v8977_v37 = vld [vmem:[%s12414_s3 + $0x828] ss:$20 sps:$4 sm:$0xff]  }
 0x20d   : > { %5711 = vmatpush1.bf16.msra.mxu1 %v8911_v38  ;;  %5384 = vmatprep.subr.bf16.mxu0 %v8916_v39  ;;  %v8982_v38 = vld [vmem:[%s12414_s3 + $0x84c] ss:$20 sps:$4 sm:$0xff]   ;;  %v8985_v39 = vld [vmem:[%s12414_s3 + $0x854] ss:$20 sps:$4 sm:$0xff]  }
 0x20e   : > { %5712 = vmatprep.subr.bf16.mxu1 %v8919_v43  ;;  %v8980_v43 = vld [vmem:[%s12414_s3 + $0x848] ss:$20 sps:$4 sm:$0xff]  }
 0x210   : > { %5385 = vmatpush1.bf16.msra.mxu0 %v8914_v45  ;;  %v8983_v45 = vld [vmem:[%s12414_s3 + $0x850] ss:$20 sps:$4 sm:$0xff]  }
 0x211   : > { %5713 = vmatpush1.bf16.msra.mxu1 %v8917_v47  ;;  %5386 = vmatprep.subr.bf16.mxu0 %v8922_v48  ;;  %v8988_v47 = vld [vmem:[%s12414_s3 + $0x874] ss:$20 sps:$4 sm:$0xff]   ;;  %v8991_v48 = vld [vmem:[%s12414_s3 + $0x87c] ss:$20 sps:$4 sm:$0xff]  }
 0x212   : > { %5714 = vmatprep.subr.bf16.mxu1 %v8925_v51  ;;  %v8986_v51 = vld [vmem:[%s12414_s3 + $0x870] ss:$20 sps:$4 sm:$0xff]  }
 0x214   : > { %5387 = vmatpush1.bf16.msra.mxu0 %v8920_v52  ;;  %v8989_v52 = vld [vmem:[%s12414_s3 + $0x878] ss:$20 sps:$4 sm:$0xff]  }
 0x215   : > { %5715 = vmatpush1.bf16.msra.mxu1 %v8923_v53  ;;  %5388 = vmatprep.subr.bf16.mxu0 %v8928_v54  ;;  %v8994_v53 = vld [vmem:[%s12414_s3 + $0x89c] ss:$20 sps:$4 sm:$0xff]   ;;  %v8997_v54 = vld [vmem:[%s12414_s3 + $0x8a4] ss:$20 sps:$4 sm:$0xff]  }
 0x216   : > { %5716 = vmatprep.subr.bf16.mxu1 %v8931_v55  ;;  %v8992_v55 = vld [vmem:[%s12414_s3 + $0x898] ss:$20 sps:$4 sm:$0xff]  }
 0x218   : > { %5389 = vmatpush1.bf16.msra.mxu0 %v8926_v56  ;;  %v8995_v56 = vld [vmem:[%s12414_s3 + $0x8a0] ss:$20 sps:$4 sm:$0xff]  }
 0x219   : > { %5717 = vmatpush1.bf16.msra.mxu1 %v8929_v58  ;;  %5390 = vmatprep.subr.bf16.mxu0 %v8934_v60  ;;  %v9000_v58 = vld [vmem:[%s12414_s3 + $0x8c4] ss:$20 sps:$4 sm:$0xff]   ;;  %v9003_v60 = vld [vmem:[%s12414_s3 + $0x8cc] ss:$20 sps:$4 sm:$0xff]  }
 0x21a   : > { %5718 = vmatprep.subr.bf16.mxu1 %v8937_v61  ;;  %v8998_v61 = vld [vmem:[%s12414_s3 + $0x8c0] ss:$20 sps:$4 sm:$0xff]  }
 0x21c   : > { %5391 = vmatpush1.bf16.msra.mxu0 %v8932_v25  ;;  %v9001_v25 = vld [vmem:[%s12414_s3 + $0x8c8] ss:$20 sps:$4 sm:$0xff]  }
 0x21d   : > { %5719 = vmatpush1.bf16.msra.mxu1 %v8935_v62  ;;  %5392 = vmatprep.subr.bf16.mxu0 %v8940_v63  ;;  %v9006_v62 = vld [vmem:[%s12414_s3 + $0x8ec] ss:$20 sps:$4 sm:$0xff]   ;;  %v9009_v63 = vld [vmem:[%s12414_s3 + $0x8f4] ss:$20 sps:$4 sm:$0xff]  }
 0x21e   : > { %5720 = vmatprep.subr.bf16.mxu1 %v8943_v0  ;;  %v9004_v0 = vld [vmem:[%s12414_s3 + $0x8e8] ss:$20 sps:$4 sm:$0xff]  }
 0x220   : > { %5393 = vmatpush1.bf16.msra.mxu0 %v8938_v35  ;;  %v9012_v35 = vld [vmem:[%s12414_s3 + $0x914] ss:$20 sps:$4 sm:$0xff]  }
 0x221   : > { %5721 = vmatpush1.bf16.msra.mxu1 %v8941_v2  ;;  %5394 = vmatprep.subr.bf16.mxu0 %v8946_v3  ;;  %v9015_v2 = vld [vmem:[%s12414_s3 + $0x91c] ss:$20 sps:$4 sm:$0xff]  }
 0x222   : > { %5722 = vmatprep.subr.bf16.mxu1 %v8949_v16  ;;  %v9010_v3 = vld [vmem:[%s12414_s3 + $0x910] ss:$20 sps:$4 sm:$0xff]   ;;  %v9013_v16 = vld [vmem:[%s12414_s3 + $0x918] ss:$20 sps:$4 sm:$0xff]  }
 0x224   : > { %5395 = vmatpush1.bf16.msra.mxu0 %v8944_v6  ;;  %v9018_v6 = vld [vmem:[%s12414_s3 + $0x93c] ss:$20 sps:$4 sm:$0xff]  }
 0x225   : > { %5723 = vmatpush1.bf16.msra.mxu1 %v8947_v7  ;;  %5405 = vmatprep.subr.bf16.mxu0 %v8952_v8  ;;  %v9021_v7 = vld [vmem:[%s12414_s3 + $0x944] ss:$20 sps:$4 sm:$0xff]  }
 0x226   : > { %5733 = vmatprep.subr.bf16.mxu1 %v8955_v10  ;;  %v9016_v8 = vld [vmem:[%s12414_s3 + $0x938] ss:$20 sps:$4 sm:$0xff]   ;;  %v9019_v10 = vld [vmem:[%s12414_s3 + $0x940] ss:$20 sps:$4 sm:$0xff]  }
 0x227   : > { %5397 = vmatmul.mubr.bf16.vlgmr.msra.gmra.mrb[0].mxu0 %v10600_v13 }
 0x228   : > { %5725 = vmatmul.mubr.bf16.vlgmr.msra.gmra.mrb[0].mxu1 %v10600_v13  ;;  %5406 = vmatpush1.bf16.msra.mxu0 %v8950_v12  ;;  %v9027_v12 = vld [vmem:[%s12414_s3 + $0x96c] ss:$20 sps:$4 sm:$0xff]  }
 0x229   : > { %5437 = vmatprep.mubr.bf16.mxu0 %v10609_v15  ;;  %5734 = vmatpush1.bf16.msra.mxu1 %v8953_v14  ;;  %v9022_v14 = vld [vmem:[%s12414_s3 + $0x960] ss:$20 sps:$4 sm:$0xff]  }
 0x22a   : > { %5765 = vmatprep.mubr.bf16.mxu1 %v10609_v15  ;;  %5407 = vmatprep.subr.bf16.mxu0 %v8958_v40  ;;  %v9025_v40 = vld [vmem:[%s12414_s3 + $0x968] ss:$20 sps:$4 sm:$0xff]  }
 0x22b   : > { %5735 = vmatprep.subr.bf16.mxu1 %v8961_v42  ;;  %v9030_v42 = vld [vmem:[%s12414_s3 + $0x98c] ss:$20 sps:$4 sm:$0xff]  }
 0x22c   : > { %5408 = vmatpush1.bf16.msra.mxu0 %v8956_v50  ;;  %v9033_v50 = vld [vmem:[%s12414_s3 + $0x994] ss:$20 sps:$4 sm:$0xff]  }
 0x22d   : > { %5736 = vmatpush1.bf16.msra.mxu1 %v8959_v46  ;;  %5409 = vmatprep.subr.bf16.mxu0 %v8964_v20  ;;  %v9028_v46 = vld [vmem:[%s12414_s3 + $0x988] ss:$20 sps:$4 sm:$0xff]   ;;  %v9031_v20 = vld [vmem:[%s12414_s3 + $0x990] ss:$20 sps:$4 sm:$0xff]  }
 0x22e   : > { %5737 = vmatprep.subr.bf16.mxu1 %v8967_v34  ;;  %v9036_v34 = vld [vmem:[%s12414_s3 + $0x9b4] ss:$20 sps:$4 sm:$0xff]  }
 0x230   : > { %5410 = vmatpush1.bf16.msra.mxu0 %v8962_v41  ;;  %v9039_v41 = vld [vmem:[%s12414_s3 + $0x9bc] ss:$20 sps:$4 sm:$0xff]  }
 0x231   : > { %5738 = vmatpush1.bf16.msra.mxu1 %v8965_v49  ;;  %5411 = vmatprep.subr.bf16.mxu0 %v8970_v24  ;;  %v9034_v49 = vld [vmem:[%s12414_s3 + $0x9b0] ss:$20 sps:$4 sm:$0xff]   ;;  %v9037_v24 = vld [vmem:[%s12414_s3 + $0x9b8] ss:$20 sps:$4 sm:$0xff]  }
 0x232   : > { %5739 = vmatprep.subr.bf16.mxu1 %v8973_v26  ;;  %v9042_v26 = vld [vmem:[%s12414_s3 + $0x9dc] ss:$20 sps:$4 sm:$0xff]  }
 0x234   : > { %5412 = vmatpush1.bf16.msra.mxu0 %v8968_v29  ;;  %v9045_v29 = vld [vmem:[%s12414_s3 + $0x9e4] ss:$20 sps:$4 sm:$0xff]  }
 0x235   : > { %5740 = vmatpush1.bf16.msra.mxu1 %v8971_v30  ;;  %5413 = vmatprep.subr.bf16.mxu0 %v8976_v31  ;;  %v10787_v30 = vrot.slane %v10162_v19, %v9800_v9  ;;  %v9040_v31 = vld [vmem:[%s12414_s3 + $0x9d8] ss:$20 sps:$4 sm:$0xff]  }
 0x236   : > { %5741 = vmatprep.subr.bf16.mxu1 %v8979_v5  ;;  %v9043_v5 = vld [vmem:[%s12414_s3 + $0x9e0] ss:$20 sps:$4 sm:$0xff]  }
 0x238   : > { %5414 = vmatpush1.bf16.msra.mxu0 %v8974_v36  ;;  %v9048_v36 = vld [vmem:[%s12414_s3 + $0xa04] ss:$20 sps:$4 sm:$0xff]  }
 0x239   : > { %5742 = vmatpush1.bf16.msra.mxu1 %v8977_v37  ;;  %5415 = vmatprep.subr.bf16.mxu0 %v8982_v38  ;;  %v9051_v37 = vld [vmem:[%s12414_s3 + $0xa0c] ss:$20 sps:$4 sm:$0xff]   ;;  %v1108_v38 = vcombine.high %v10787_v30, %v10787_v30 }
 0x23a   : > { %5743 = vmatprep.subr.bf16.mxu1 %v8985_v39  ;;  %v9046_v39 = vld [vmem:[%s12414_s3 + $0xa00] ss:$20 sps:$4 sm:$0xff]  }
 0x23c   : > { %5416 = vmatpush1.bf16.msra.mxu0 %v8980_v43  ;;  %v10808_v43 = vpack.c.bf16 %v10579_v4, %v10579_v4  ;;  %v9052_v4 = vld [vmem:[%s12414_s3 + $0xa28] ss:$20 sps:$4 sm:$0xff]  }
 0x23d   : > { %5744 = vmatpush1.bf16.msra.mxu1 %v8983_v45  ;;  %5417 = vmatprep.subr.bf16.mxu0 %v8988_v47  ;;  %v9049_v45 = vld [vmem:[%s12414_s3 + $0xa08] ss:$20 sps:$4 sm:$0xff]   ;;  %v9054_v47 = vld [vmem:[%s12414_s3 + $0xa2c] ss:$20 sps:$4 sm:$0xff]  }
 0x23e   : > { %5745 = vmatprep.subr.bf16.mxu1 %v8991_v48  ;;  %v10817_v48 = vpack.c.bf16 %v1108_v38, %v1108_v38  ;;  %v9112_v38 = vld [vmem:[%s12414_s3 + $0xbb8] ss:$20 sps:$4 sm:$0xff]  }
 0x240   : > { %5418 = vmatpush1.bf16.msra.mxu0 %v8986_v51  ;;  %v9057_v51 = vld [vmem:[%s12414_s3 + $0xa34] ss:$20 sps:$4 sm:$0xff]  }
 0x241   : > { %5746 = vmatpush1.bf16.msra.mxu1 %v8989_v52  ;;  %5419 = vmatprep.subr.bf16.mxu0 %v8994_v53  ;;  %v9055_v52 = vld [vmem:[%s12414_s3 + $0xa30] ss:$20 sps:$4 sm:$0xff]   ;;  %v9060_v53 = vld [vmem:[%s12414_s3 + $0xa54] ss:$20 sps:$4 sm:$0xff]  }
 0x242   : > { %5747 = vmatprep.subr.bf16.mxu1 %v8997_v54  ;;  %v9063_v54 = vld [vmem:[%s12414_s3 + $0xa5c] ss:$20 sps:$4 sm:$0xff]  }
 0x244   : > { %5420 = vmatpush1.bf16.msra.mxu0 %v8992_v55  ;;  %v9058_v55 = vld [vmem:[%s12414_s3 + $0xa50] ss:$20 sps:$4 sm:$0xff]  }
 0x245   : > { %5748 = vmatpush1.bf16.msra.mxu1 %v8995_v56  ;;  %5421 = vmatprep.subr.bf16.mxu0 %v9000_v58  ;;  %v9061_v56 = vld [vmem:[%s12414_s3 + $0xa58] ss:$20 sps:$4 sm:$0xff]   ;;  %v9066_v58 = vld [vmem:[%s12414_s3 + $0xa7c] ss:$20 sps:$4 sm:$0xff]  }
 0x246   : > { %5749 = vmatprep.subr.bf16.mxu1 %v9003_v60  ;;  %v9069_v60 = vld [vmem:[%s12414_s3 + $0xa84] ss:$20 sps:$4 sm:$0xff]  }
 0x248   : > { %5422 = vmatpush1.bf16.msra.mxu0 %v8998_v61  ;;  %v9064_v61 = vld [vmem:[%s12414_s3 + $0xa78] ss:$20 sps:$4 sm:$0xff]  }
 0x249   : > { %5750 = vmatpush1.bf16.msra.mxu1 %v9001_v25  ;;  %5423 = vmatprep.subr.bf16.mxu0 %v9006_v62  ;;  %v9067_v25 = vld [vmem:[%s12414_s3 + $0xa80] ss:$20 sps:$4 sm:$0xff]   ;;  %v9072_v62 = vld [vmem:[%s12414_s3 + $0xaa4] ss:$20 sps:$4 sm:$0xff]  }
 0x24a   : > { %5751 = vmatprep.subr.bf16.mxu1 %v9009_v63  ;;  %v9075_v63 = vld [vmem:[%s12414_s3 + $0xaac] ss:$20 sps:$4 sm:$0xff]  }
 0x24c   : > { %5424 = vmatpush1.bf16.msra.mxu0 %v9004_v0  ;;  %v9070_v0 = vld [vmem:[%s12414_s3 + $0xaa0] ss:$20 sps:$4 sm:$0xff]  }
 0x24d   : > { %5752 = vmatpush1.bf16.msra.mxu1 %v9007_v1  ;;  %5425 = vmatprep.subr.bf16.mxu0 %v9012_v35  ;;  %v9073_v1 = vld [vmem:[%s12414_s3 + $0xaa8] ss:$20 sps:$4 sm:$0xff]   ;;  %v9078_v35 = vld [vmem:[%s12414_s3 + $0xacc] ss:$20 sps:$4 sm:$0xff]  }
 0x24e   : > { %5753 = vmatprep.subr.bf16.mxu1 %v9015_v2  ;;  %v9081_v2 = vld [vmem:[%s12414_s3 + $0xad4] ss:$20 sps:$4 sm:$0xff]  }
 0x250   : > { %5426 = vmatpush1.bf16.msra.mxu0 %v9010_v3  ;;  %v9076_v3 = vld [vmem:[%s12414_s3 + $0xac8] ss:$20 sps:$4 sm:$0xff]  }
 0x251   : > { %5754 = vmatpush1.bf16.msra.mxu1 %v9013_v16  ;;  %5427 = vmatprep.subr.bf16.mxu0 %v9018_v6  ;;  %v9079_v16 = vld [vmem:[%s12414_s3 + $0xad0] ss:$20 sps:$4 sm:$0xff]   ;;  %v9084_v6 = vld [vmem:[%s12414_s3 + $0xaf4] ss:$20 sps:$4 sm:$0xff]  }
 0x252   : > { %5755 = vmatprep.subr.bf16.mxu1 %v9021_v7  ;;  %v9087_v7 = vld [vmem:[%s12414_s3 + $0xafc] ss:$20 sps:$4 sm:$0xff]  }
 0x254   : > { %5428 = vmatpush1.bf16.msra.mxu0 %v9016_v8  ;;  %v9082_v8 = vld [vmem:[%s12414_s3 + $0xaf0] ss:$20 sps:$4 sm:$0xff]  }
 0x255   : > { %5756 = vmatpush1.bf16.msra.mxu1 %v9019_v10  ;;  %5429 = vmatprep.subr.bf16.mxu0 %v9024_v11  ;;  %v9085_v10 = vld [vmem:[%s12414_s3 + $0xaf8] ss:$20 sps:$4 sm:$0xff]   ;;  %v9090_v11 = vld [vmem:[%s12414_s3 + $0xb1c] ss:$20 sps:$4 sm:$0xff]  }
 0x256   : > { %5757 = vmatprep.subr.bf16.mxu1 %v9027_v12  ;;  %v9093_v12 = vld [vmem:[%s12414_s3 + $0xb24] ss:$20 sps:$4 sm:$0xff]  }
 0x258   : > { %5430 = vmatpush1.bf16.msra.mxu0 %v9022_v14  ;;  %v9088_v14 = vld [vmem:[%s12414_s3 + $0xb18] ss:$20 sps:$4 sm:$0xff]  }
 0x259   : > { %5758 = vmatpush1.bf16.msra.mxu1 %v9025_v40  ;;  %5431 = vmatprep.subr.bf16.mxu0 %v9030_v42  ;;  %v9091_v40 = vld [vmem:[%s12414_s3 + $0xb20] ss:$20 sps:$4 sm:$0xff]   ;;  %v9096_v42 = vld [vmem:[%s12414_s3 + $0xb44] ss:$20 sps:$4 sm:$0xff]  }
 0x25a   : > { %5759 = vmatprep.subr.bf16.mxu1 %v9033_v50  ;;  %v9099_v50 = vld [vmem:[%s12414_s3 + $0xb4c] ss:$20 sps:$4 sm:$0xff]  }
 0x25c   : > { %5432 = vmatpush1.bf16.msra.mxu0 %v9028_v46  ;;  %v9094_v46 = vld [vmem:[%s12414_s3 + $0xb40] ss:$20 sps:$4 sm:$0xff]  }
 0x25d   : > { %5760 = vmatpush1.bf16.msra.mxu1 %v9031_v20  ;;  %5433 = vmatprep.subr.bf16.mxu0 %v9036_v34  ;;  %v9097_v20 = vld [vmem:[%s12414_s3 + $0xb48] ss:$20 sps:$4 sm:$0xff]   ;;  %v9102_v34 = vld [vmem:[%s12414_s3 + $0xb6c] ss:$20 sps:$4 sm:$0xff]  }
 0x25e   : > { %5761 = vmatprep.subr.bf16.mxu1 %v9039_v41  ;;  %v9105_v41 = vld [vmem:[%s12414_s3 + $0xb74] ss:$20 sps:$4 sm:$0xff]  }
 0x260   : > { %5434 = vmatpush1.bf16.msra.mxu0 %v9034_v49  ;;  %v9100_v49 = vld [vmem:[%s12414_s3 + $0xb68] ss:$20 sps:$4 sm:$0xff]  }
 0x261   : > { %5762 = vmatpush1.bf16.msra.mxu1 %v9037_v24  ;;  %5435 = vmatprep.subr.bf16.mxu0 %v9042_v26  ;;  %v9103_v24 = vld [vmem:[%s12414_s3 + $0xb70] ss:$20 sps:$4 sm:$0xff]   ;;  %v9108_v26 = vld [vmem:[%s12414_s3 + $0xb94] ss:$20 sps:$4 sm:$0xff]  }
 0x262   : > { %5763 = vmatprep.subr.bf16.mxu1 %v9045_v29  ;;  %v9111_v29 = vld [vmem:[%s12414_s3 + $0xb9c] ss:$20 sps:$4 sm:$0xff]  }
 0x264   : > { %5436 = vmatpush1.bf16.msra.mxu0 %v9040_v31  ;;  %v9106_v31 = vld [vmem:[%s12414_s3 + $0xb90] ss:$20 sps:$4 sm:$0xff]  }
 0x265   : > { %5764 = vmatpush1.bf16.msra.mxu1 %v9043_v5  ;;  %5446 = vmatprep.subr.bf16.mxu0 %v9048_v36  ;;  %v9109_v5 = vld [vmem:[%s12414_s3 + $0xb98] ss:$20 sps:$4 sm:$0xff]   ;;  %v9114_v36 = vld [vmem:[%s12414_s3 + $0xbbc] ss:$20 sps:$4 sm:$0xff]  }
 0x266   : > { %5774 = vmatprep.subr.bf16.mxu1 %v9051_v37  ;;  %v9117_v37 = vld [vmem:[%s12414_s3 + $0xbc4] ss:$20 sps:$4 sm:$0xff]  }
 0x267   : > { %5438 = vmatmul.mubr.bf16.vlgmr.msra.gmra.mrb[0].mxu0 %v10808_v43 }
 0x268   : > { %5766 = vmatmul.mubr.bf16.vlgmr.msra.gmra.mrb[0].mxu1 %v10808_v43  ;;  %5447 = vmatpush1.bf16.msra.mxu0 %v9046_v39  ;;  %v9115_v39 = vld [vmem:[%s12414_s3 + $0xbc0] ss:$20 sps:$4 sm:$0xff]  }
 0x269   : > { %5478 = vmatprep.mubr.bf16.mxu0 %v10817_v48  ;;  %5775 = vmatpush1.bf16.msra.mxu1 %v9049_v45  ;;  %v9120_v45 = vld [vmem:[%s12414_s3 + $0xbe4] ss:$20 sps:$4 sm:$0xff]  }
 0x26a   : > { %5806 = vmatprep.mubr.bf16.mxu1 %v10817_v48  ;;  %5448 = vmatprep.subr.bf16.mxu0 %v9054_v47  ;;  %v9123_v47 = vld [vmem:[%s12414_s3 + $0xbec] ss:$20 sps:$4 sm:$0xff]  }
 0x26b   : > { %5776 = vmatprep.subr.bf16.mxu1 %v9057_v51  ;;  %v9118_v51 = vld [vmem:[%s12414_s3 + $0xbe0] ss:$20 sps:$4 sm:$0xff]  }
 0x26c   : > { %5449 = vmatpush1.bf16.msra.mxu0 %v9052_v4  ;;  %v9121_v4 = vld [vmem:[%s12414_s3 + $0xbe8] ss:$20 sps:$4 sm:$0xff]  }
 0x26d   : > { %5777 = vmatpush1.bf16.msra.mxu1 %v9055_v52  ;;  %5450 = vmatprep.subr.bf16.mxu0 %v9060_v53  ;;  %v9126_v52 = vld [vmem:[%s12414_s3 + $0xc0c] ss:$20 sps:$4 sm:$0xff]   ;;  %v9129_v53 = vld [vmem:[%s12414_s3 + $0xc14] ss:$20 sps:$4 sm:$0xff]  }
 0x26e   : > { %5778 = vmatprep.subr.bf16.mxu1 %v9063_v54  ;;  %v9124_v54 = vld [vmem:[%s12414_s3 + $0xc08] ss:$20 sps:$4 sm:$0xff]  }
 0x270   : > { %5451 = vmatpush1.bf16.msra.mxu0 %v9058_v55  ;;  %v9127_v55 = vld [vmem:[%s12414_s3 + $0xc10] ss:$20 sps:$4 sm:$0xff]  }
 0x271   : > { %5779 = vmatpush1.bf16.msra.mxu1 %v9061_v56  ;;  %5452 = vmatprep.subr.bf16.mxu0 %v9066_v58  ;;  %v9132_v56 = vld [vmem:[%s12414_s3 + $0xc34] ss:$20 sps:$4 sm:$0xff]   ;;  %v9135_v58 = vld [vmem:[%s12414_s3 + $0xc3c] ss:$20 sps:$4 sm:$0xff]  }
 0x272   : > { %5780 = vmatprep.subr.bf16.mxu1 %v9069_v60  ;;  %v1093_v60 = vcombine.high %v10162_v19, %v10162_v19  ;;  %v9141_v19 = vld [vmem:[%s12414_s3 + $0xc64] ss:$20 sps:$4 sm:$0xff]  }
 0x274   : > { %5453 = vmatpush1.bf16.msra.mxu0 %v9064_v61  ;;  %v9130_v61 = vld [vmem:[%s12414_s3 + $0xc30] ss:$20 sps:$4 sm:$0xff]  }
 0x275   : > { %5781 = vmatpush1.bf16.msra.mxu1 %v9067_v25  ;;  %5454 = vmatprep.subr.bf16.mxu0 %v9072_v62  ;;  %v9133_v25 = vld [vmem:[%s12414_s3 + $0xc38] ss:$20 sps:$4 sm:$0xff]   ;;  %v9138_v62 = vld [vmem:[%s12414_s3 + $0xc5c] ss:$20 sps:$4 sm:$0xff]  }
 0x276   : > { %5782 = vmatprep.subr.bf16.mxu1 %v9075_v63  ;;  %v10996_v63 = vrot.slane %v1093_v60, %v9800_v9  ;;  %v9198_v60 = vld [vmem:[%s12414_s3 + $0xdec] ss:$20 sps:$4 sm:$0xff]  }
 0x278   : > { %5455 = vmatpush1.bf16.msra.mxu0 %v9070_v0  ;;  %v9136_v0 = vld [vmem:[%s12414_s3 + $0xc58] ss:$20 sps:$4 sm:$0xff]  }
 0x279   : > { %5783 = vmatpush1.bf16.msra.mxu1 %v9073_v1  ;;  %5456 = vmatprep.subr.bf16.mxu0 %v9078_v35  ;;  %v9139_v1 = vld [vmem:[%s12414_s3 + $0xc60] ss:$20 sps:$4 sm:$0xff]   ;;  %v9144_v35 = vld [vmem:[%s12414_s3 + $0xc84] ss:$20 sps:$4 sm:$0xff]  }
 0x27a   : > { %5784 = vmatprep.subr.bf16.mxu1 %v9081_v2  ;;  %v9147_v2 = vld [vmem:[%s12414_s3 + $0xc8c] ss:$20 sps:$4 sm:$0xff]  }
 0x27c   : > { %5457 = vmatpush1.bf16.msra.mxu0 %v9076_v3  ;;  %v1109_v3 = vcombine.high %v10996_v63, %v10996_v63 }
 0x27d   : > { %5785 = vmatpush1.bf16.msra.mxu1 %v9079_v16  ;;  %5458 = vmatprep.subr.bf16.mxu0 %v9084_v6  ;;  %v9142_v16 = vld [vmem:[%s12414_s3 + $0xc80] ss:$20 sps:$4 sm:$0xff]   ;;  %v11017_v6 = vpack.c.bf16 %v10787_v30, %v10787_v30  ;;  %v9148_v30 = vld [vmem:[%s12414_s3 + $0xca8] ss:$20 sps:$4 sm:$0xff]  }
 0x27e   : > { %5786 = vmatprep.subr.bf16.mxu1 %v9087_v7  ;;  %v9145_v7 = vld [vmem:[%s12414_s3 + $0xc88] ss:$20 sps:$4 sm:$0xff]  }
 0x280   : > { %5459 = vmatpush1.bf16.msra.mxu0 %v9082_v8  ;;  %v9150_v8 = vld [vmem:[%s12414_s3 + $0xcac] ss:$20 sps:$4 sm:$0xff]  }
 0x281   : > { %5787 = vmatpush1.bf16.msra.mxu1 %v9085_v10  ;;  %5460 = vmatprep.subr.bf16.mxu0 %v9090_v11  ;;  %v11026_v10 = vpack.c.bf16 %v1109_v3, %v1109_v3  ;;  %v9153_v11 = vld [vmem:[%s12414_s3 + $0xcb4] ss:$20 sps:$4 sm:$0xff]   ;;  %v9213_v3 = vld [vmem:[%s12414_s3 + $0xe44] ss:$20 sps:$4 sm:$0xff]  }
 0x282   : > { %5788 = vmatprep.subr.bf16.mxu1 %v9093_v12  ;;  %v9151_v12 = vld [vmem:[%s12414_s3 + $0xcb0] ss:$20 sps:$4 sm:$0xff]  }
 0x284   : > { %5461 = vmatpush1.bf16.msra.mxu0 %v9088_v14  ;;  %v9156_v14 = vld [vmem:[%s12414_s3 + $0xcd4] ss:$20 sps:$4 sm:$0xff]  }
 0x285   : > { %5789 = vmatpush1.bf16.msra.mxu1 %v9091_v40  ;;  %5462 = vmatprep.subr.bf16.mxu0 %v9096_v42  ;;  %v9159_v40 = vld [vmem:[%s12414_s3 + $0xcdc] ss:$20 sps:$4 sm:$0xff]  }
 0x286   : > { %5790 = vmatprep.subr.bf16.mxu1 %v9099_v50  ;;  %v9154_v42 = vld [vmem:[%s12414_s3 + $0xcd0] ss:$20 sps:$4 sm:$0xff]   ;;  %v9157_v50 = vld [vmem:[%s12414_s3 + $0xcd8] ss:$20 sps:$4 sm:$0xff]  }
 0x288   : > { %5463 = vmatpush1.bf16.msra.mxu0 %v9094_v46  ;;  %v9162_v46 = vld [vmem:[%s12414_s3 + $0xcfc] ss:$20 sps:$4 sm:$0xff]  }
 0x289   : > { %5791 = vmatpush1.bf16.msra.mxu1 %v9097_v20  ;;  %5464 = vmatprep.subr.bf16.mxu0 %v9102_v34  ;;  %v9165_v20 = vld [vmem:[%s12414_s3 + $0xd04] ss:$20 sps:$4 sm:$0xff]  }
 0x28a   : > { %5792 = vmatprep.subr.bf16.mxu1 %v9105_v41  ;;  %v9160_v34 = vld [vmem:[%s12414_s3 + $0xcf8] ss:$20 sps:$4 sm:$0xff]   ;;  %v9163_v41 = vld [vmem:[%s12414_s3 + $0xd00] ss:$20 sps:$4 sm:$0xff]  }
 0x28c   : > { %5465 = vmatpush1.bf16.msra.mxu0 %v9100_v49  ;;  %v9168_v49 = vld [vmem:[%s12414_s3 + $0xd24] ss:$20 sps:$4 sm:$0xff]  }
 0x28d   : > { %5793 = vmatpush1.bf16.msra.mxu1 %v9103_v24  ;;  %5466 = vmatprep.subr.bf16.mxu0 %v9108_v26  ;;  %v9171_v24 = vld [vmem:[%s12414_s3 + $0xd2c] ss:$20 sps:$4 sm:$0xff]  }
 0x28e   : > { %5794 = vmatprep.subr.bf16.mxu1 %v9111_v29  ;;  %v9166_v26 = vld [vmem:[%s12414_s3 + $0xd20] ss:$20 sps:$4 sm:$0xff]   ;;  %v9169_v29 = vld [vmem:[%s12414_s3 + $0xd28] ss:$20 sps:$4 sm:$0xff]  }
 0x290   : > { %5467 = vmatpush1.bf16.msra.mxu0 %v9106_v31  ;;  %v9174_v31 = vld [vmem:[%s12414_s3 + $0xd4c] ss:$20 sps:$4 sm:$0xff]  }
 0x291   : > { %5795 = vmatpush1.bf16.msra.mxu1 %v9109_v5  ;;  %5468 = vmatprep.subr.bf16.mxu0 %v9114_v36  ;;  %v9177_v5 = vld [vmem:[%s12414_s3 + $0xd54] ss:$20 sps:$4 sm:$0xff]  }
 0x292   : > { %5796 = vmatprep.subr.bf16.mxu1 %v9117_v37  ;;  %v9172_v36 = vld [vmem:[%s12414_s3 + $0xd48] ss:$20 sps:$4 sm:$0xff]   ;;  %v9175_v37 = vld [vmem:[%s12414_s3 + $0xd50] ss:$20 sps:$4 sm:$0xff]  }
 0x294   : > { %5469 = vmatpush1.bf16.msra.mxu0 %v9112_v38  ;;  %v9180_v38 = vld [vmem:[%s12414_s3 + $0xd74] ss:$20 sps:$4 sm:$0xff]  }
 0x295   : > { %5797 = vmatpush1.bf16.msra.mxu1 %v9115_v39  ;;  %5470 = vmatprep.subr.bf16.mxu0 %v9120_v45  ;;  %v9183_v39 = vld [vmem:[%s12414_s3 + $0xd7c] ss:$20 sps:$4 sm:$0xff]  }
 0x296   : > { %5798 = vmatprep.subr.bf16.mxu1 %v9123_v47  ;;  %v9178_v45 = vld [vmem:[%s12414_s3 + $0xd70] ss:$20 sps:$4 sm:$0xff]   ;;  %v9181_v47 = vld [vmem:[%s12414_s3 + $0xd78] ss:$20 sps:$4 sm:$0xff]  }
 0x298   : > { %5471 = vmatpush1.bf16.msra.mxu0 %v9118_v51  ;;  %v9186_v51 = vld [vmem:[%s12414_s3 + $0xd9c] ss:$20 sps:$4 sm:$0xff]  }
 0x299   : > { %5799 = vmatpush1.bf16.msra.mxu1 %v9121_v4  ;;  %5472 = vmatprep.subr.bf16.mxu0 %v9126_v52  ;;  %v9189_v4 = vld [vmem:[%s12414_s3 + $0xda4] ss:$20 sps:$4 sm:$0xff]  }
 0x29a   : > { %5800 = vmatprep.subr.bf16.mxu1 %v9129_v53  ;;  %v9184_v52 = vld [vmem:[%s12414_s3 + $0xd98] ss:$20 sps:$4 sm:$0xff]   ;;  %v9187_v53 = vld [vmem:[%s12414_s3 + $0xda0] ss:$20 sps:$4 sm:$0xff]  }
 0x29c   : > { %5473 = vmatpush1.bf16.msra.mxu0 %v9124_v54  ;;  %v9192_v54 = vld [vmem:[%s12414_s3 + $0xdc4] ss:$20 sps:$4 sm:$0xff]  }
 0x29d   : > { %5801 = vmatpush1.bf16.msra.mxu1 %v9127_v55  ;;  %5474 = vmatprep.subr.bf16.mxu0 %v9132_v56  ;;  %v9195_v55 = vld [vmem:[%s12414_s3 + $0xdcc] ss:$20 sps:$4 sm:$0xff]  }
 0x29e   : > { %5802 = vmatprep.subr.bf16.mxu1 %v9135_v58  ;;  %v9190_v56 = vld [vmem:[%s12414_s3 + $0xdc0] ss:$20 sps:$4 sm:$0xff]   ;;  %v9193_v58 = vld [vmem:[%s12414_s3 + $0xdc8] ss:$20 sps:$4 sm:$0xff]  }
 0x2a0   : > { %5475 = vmatpush1.bf16.msra.mxu0 %v9130_v61  ;;  %v9201_v61 = vld [vmem:[%s12414_s3 + $0xdf4] ss:$20 sps:$4 sm:$0xff]  }
 0x2a1   : > { %5803 = vmatpush1.bf16.msra.mxu1 %v9133_v25  ;;  %5476 = vmatprep.subr.bf16.mxu0 %v9138_v62  ;;  %v9196_v25 = vld [vmem:[%s12414_s3 + $0xde8] ss:$20 sps:$4 sm:$0xff]   ;;  %v9199_v62 = vld [vmem:[%s12414_s3 + $0xdf0] ss:$20 sps:$4 sm:$0xff]  }
 0x2a2   : > { %5804 = vmatprep.subr.bf16.mxu1 %v9141_v19  ;;  %v9204_v19 = vld [vmem:[%s12414_s3 + $0xe14] ss:$20 sps:$4 sm:$0xff]  }
 0x2a4   : > { %5477 = vmatpush1.bf16.msra.mxu0 %v9136_v0  ;;  %v9207_v0 = vld [vmem:[%s12414_s3 + $0xe1c] ss:$20 sps:$4 sm:$0xff]  }
 0x2a5   : > { %5805 = vmatpush1.bf16.msra.mxu1 %v9139_v1  ;;  %5487 = vmatprep.subr.bf16.mxu0 %v9144_v35  ;;  %v9202_v1 = vld [vmem:[%s12414_s3 + $0xe10] ss:$20 sps:$4 sm:$0xff]   ;;  %v9205_v35 = vld [vmem:[%s12414_s3 + $0xe18] ss:$20 sps:$4 sm:$0xff]  }
 0x2a6   : > { %5815 = vmatprep.subr.bf16.mxu1 %v9147_v2  ;;  %v9210_v2 = vld [vmem:[%s12414_s3 + $0xe3c] ss:$20 sps:$4 sm:$0xff]  }
 0x2a7   : > { %5479 = vmatmul.mubr.bf16.vlgmr.msra.gmra.mrb[0].mxu0 %v11017_v6 }
 0x2a8   : > { %5807 = vmatmul.mubr.bf16.vlgmr.msra.gmra.mrb[0].mxu1 %v11017_v6  ;;  %5488 = vmatpush1.bf16.msra.mxu0 %v9142_v16  ;;  %v9208_v16 = vld [vmem:[%s12414_s3 + $0xe38] ss:$20 sps:$4 sm:$0xff]  }
 0x2a9   : > { %5519 = vmatprep.mubr.bf16.mxu0 %v11026_v10  ;;  %5816 = vmatpush1.bf16.msra.mxu1 %v9145_v7  ;;  %v9211_v7 = vld [vmem:[%s12414_s3 + $0xe40] ss:$20 sps:$4 sm:$0xff]  }
 0x2aa   : > { %5847 = vmatprep.mubr.bf16.mxu1 %v11026_v10  ;;  %5489 = vmatprep.subr.bf16.mxu0 %v9150_v8  ;;  %v9216_v8 = vld [vmem:[%s12414_s3 + $0xe64] ss:$20 sps:$4 sm:$0xff]  }
 0x2ab   : > { %5817 = vmatprep.subr.bf16.mxu1 %v9153_v11  ;;  %v9219_v11 = vld [vmem:[%s12414_s3 + $0xe6c] ss:$20 sps:$4 sm:$0xff]  }
 0x2ac   : > { %5490 = vmatpush1.bf16.msra.mxu0 %v9148_v30  ;;  %v9214_v30 = vld [vmem:[%s12414_s3 + $0xe60] ss:$20 sps:$4 sm:$0xff]  }
 0x2ad   : > { %5818 = vmatpush1.bf16.msra.mxu1 %v9151_v12  ;;  %5491 = vmatprep.subr.bf16.mxu0 %v9156_v14  ;;  %v9217_v12 = vld [vmem:[%s12414_s3 + $0xe68] ss:$20 sps:$4 sm:$0xff]   ;;  %v9222_v14 = vld [vmem:[%s12414_s3 + $0xe8c] ss:$20 sps:$4 sm:$0xff]  }
 0x2ae   : > { %5819 = vmatprep.subr.bf16.mxu1 %v9159_v40  ;;  %v9225_v40 = vld [vmem:[%s12414_s3 + $0xe94] ss:$20 sps:$4 sm:$0xff]  }
 0x2b0   : > { %5492 = vmatpush1.bf16.msra.mxu0 %v9154_v42  ;;  %v9220_v42 = vld [vmem:[%s12414_s3 + $0xe88] ss:$20 sps:$4 sm:$0xff]  }
 0x2b1   : > { %5820 = vmatpush1.bf16.msra.mxu1 %v9157_v50  ;;  %5493 = vmatprep.subr.bf16.mxu0 %v9162_v46  ;;  %v9223_v50 = vld [vmem:[%s12414_s3 + $0xe90] ss:$20 sps:$4 sm:$0xff]   ;;  %v9228_v46 = vld [vmem:[%s12414_s3 + $0xeb4] ss:$20 sps:$4 sm:$0xff]  }
 0x2b2   : > { %5821 = vmatprep.subr.bf16.mxu1 %v9165_v20  ;;  %v9231_v20 = vld [vmem:[%s12414_s3 + $0xebc] ss:$20 sps:$4 sm:$0xff]  }
 0x2b4   : > { %5494 = vmatpush1.bf16.msra.mxu0 %v9160_v34  ;;  %v9226_v34 = vld [vmem:[%s12414_s3 + $0xeb0] ss:$20 sps:$4 sm:$0xff]  }
 0x2b5   : > { %5822 = vmatpush1.bf16.msra.mxu1 %v9163_v41  ;;  %5495 = vmatprep.subr.bf16.mxu0 %v9168_v49  ;;  %v9229_v41 = vld [vmem:[%s12414_s3 + $0xeb8] ss:$20 sps:$4 sm:$0xff]   ;;  %v9234_v49 = vld [vmem:[%s12414_s3 + $0xedc] ss:$20 sps:$4 sm:$0xff]  }
 0x2b6   : > { %5823 = vmatprep.subr.bf16.mxu1 %v9171_v24  ;;  %v9237_v24 = vld [vmem:[%s12414_s3 + $0xee4] ss:$20 sps:$4 sm:$0xff]  }
 0x2b8   : > { %5496 = vmatpush1.bf16.msra.mxu0 %v9166_v26  ;;  %v11204_v26 = vrot.slane %v10171_v27, %v9800_v9 }
 0x2b9   : > { %5824 = vmatpush1.bf16.msra.mxu1 %v9169_v29  ;;  %5497 = vmatprep.subr.bf16.mxu0 %v9174_v31  ;;  %v9232_v29 = vld [vmem:[%s12414_s3 + $0xed8] ss:$20 sps:$4 sm:$0xff]   ;;  %v9235_v31 = vld [vmem:[%s12414_s3 + $0xee0] ss:$20 sps:$4 sm:$0xff]  }
 0x2ba   : > { %5825 = vmatprep.subr.bf16.mxu1 %v9177_v5  ;;  %v9240_v5 = vld [vmem:[%s12414_s3 + $0xf04] ss:$20 sps:$4 sm:$0xff]  }
 0x2bc   : > { %5498 = vmatpush1.bf16.msra.mxu0 %v9172_v36  ;;  %v9243_v36 = vld [vmem:[%s12414_s3 + $0xf0c] ss:$20 sps:$4 sm:$0xff]  }
 0x2bd   : > { %5826 = vmatpush1.bf16.msra.mxu1 %v9175_v37  ;;  %5499 = vmatprep.subr.bf16.mxu0 %v9180_v38  ;;  %v1125_v37 = vcombine.high %v11204_v26, %v11204_v26  ;;  %v9238_v38 = vld [vmem:[%s12414_s3 + $0xf00] ss:$20 sps:$4 sm:$0xff]  }
 0x2be   : > { %5827 = vmatprep.subr.bf16.mxu1 %v9183_v39  ;;  %v11225_v39 = vpack.c.bf16 %v10996_v63, %v10996_v63  ;;  %v9244_v63 = vld [vmem:[%s12414_s3 + $0xf28] ss:$20 sps:$4 sm:$0xff]  }
 0x2c0   : > { %5500 = vmatpush1.bf16.msra.mxu0 %v9178_v45  ;;  %v9241_v45 = vld [vmem:[%s12414_s3 + $0xf08] ss:$20 sps:$4 sm:$0xff]  }
 0x2c1   : > { %5828 = vmatpush1.bf16.msra.mxu1 %v9181_v47  ;;  %5501 = vmatprep.subr.bf16.mxu0 %v9186_v51  ;;  %v9246_v47 = vld [vmem:[%s12414_s3 + $0xf2c] ss:$20 sps:$4 sm:$0xff]   ;;  %v11234_v51 = vpack.c.bf16 %v1125_v37, %v1125_v37 }
 0x2c2   : > { %5829 = vmatprep.subr.bf16.mxu1 %v9189_v4  ;;  %v9249_v4 = vld [vmem:[%s12414_s3 + $0xf34] ss:$20 sps:$4 sm:$0xff]   ;;  %v9301_v37 = vld [vmem:[%s12414_s3 + $0x1098] ss:$20 sps:$4 sm:$0xff]  }
 0x2c4   : > { %5502 = vmatpush1.bf16.msra.mxu0 %v9184_v52  ;;  %v9247_v52 = vld [vmem:[%s12414_s3 + $0xf30] ss:$20 sps:$4 sm:$0xff]  }
 0x2c5   : > { %5830 = vmatpush1.bf16.msra.mxu1 %v9187_v53  ;;  %5503 = vmatprep.subr.bf16.mxu0 %v9192_v54  ;;  %v9252_v53 = vld [vmem:[%s12414_s3 + $0xf54] ss:$20 sps:$4 sm:$0xff]   ;;  %v9255_v54 = vld [vmem:[%s12414_s3 + $0xf5c] ss:$20 sps:$4 sm:$0xff]  }
 0x2c6   : > { %5831 = vmatprep.subr.bf16.mxu1 %v9195_v55  ;;  %v9250_v55 = vld [vmem:[%s12414_s3 + $0xf50] ss:$20 sps:$4 sm:$0xff]  }
 0x2c8   : > { %5504 = vmatpush1.bf16.msra.mxu0 %v9190_v56  ;;  %v9253_v56 = vld [vmem:[%s12414_s3 + $0xf58] ss:$20 sps:$4 sm:$0xff]  }
 0x2c9   : > { %5832 = vmatpush1.bf16.msra.mxu1 %v9193_v58  ;;  %5505 = vmatprep.subr.bf16.mxu0 %v9198_v60  ;;  %v9258_v58 = vld [vmem:[%s12414_s3 + $0xf7c] ss:$20 sps:$4 sm:$0xff]   ;;  %v9261_v60 = vld [vmem:[%s12414_s3 + $0xf84] ss:$20 sps:$4 sm:$0xff]  }
 0x2ca   : > { %5833 = vmatprep.subr.bf16.mxu1 %v9201_v61  ;;  %v9256_v61 = vld [vmem:[%s12414_s3 + $0xf78] ss:$20 sps:$4 sm:$0xff]  }
 0x2cc   : > { %5506 = vmatpush1.bf16.msra.mxu0 %v9196_v25  ;;  %v9259_v25 = vld [vmem:[%s12414_s3 + $0xf80] ss:$20 sps:$4 sm:$0xff]  }
 0x2cd   : > { %5834 = vmatpush1.bf16.msra.mxu1 %v9199_v62  ;;  %5507 = vmatprep.subr.bf16.mxu0 %v9204_v19  ;;  %v9264_v62 = vld [vmem:[%s12414_s3 + $0xfa4] ss:$20 sps:$4 sm:$0xff]   ;;  %v9267_v19 = vld [vmem:[%s12414_s3 + $0xfac] ss:$20 sps:$4 sm:$0xff]  }
 0x2ce   : > { %5835 = vmatprep.subr.bf16.mxu1 %v9207_v0  ;;  %v9262_v0 = vld [vmem:[%s12414_s3 + $0xfa0] ss:$20 sps:$4 sm:$0xff]  }
 0x2d0   : > { %5508 = vmatpush1.bf16.msra.mxu0 %v9202_v1  ;;  %v9265_v1 = vld [vmem:[%s12414_s3 + $0xfa8] ss:$20 sps:$4 sm:$0xff]  }
 0x2d1   : > { %5836 = vmatpush1.bf16.msra.mxu1 %v9205_v35  ;;  %5509 = vmatprep.subr.bf16.mxu0 %v9210_v2  ;;  %v9270_v35 = vld [vmem:[%s12414_s3 + $0xfcc] ss:$20 sps:$4 sm:$0xff]   ;;  %v9273_v2 = vld [vmem:[%s12414_s3 + $0xfd4] ss:$20 sps:$4 sm:$0xff]  }
 0x2d2   : > { %5837 = vmatprep.subr.bf16.mxu1 %v9213_v3  ;;  %v9268_v3 = vld [vmem:[%s12414_s3 + $0xfc8] ss:$20 sps:$4 sm:$0xff]  }
 0x2d4   : > { %5510 = vmatpush1.bf16.msra.mxu0 %v9208_v16  ;;  %v9271_v16 = vld [vmem:[%s12414_s3 + $0xfd0] ss:$20 sps:$4 sm:$0xff]  }
 0x2d5   : > { %5838 = vmatpush1.bf16.msra.mxu1 %v9211_v7  ;;  %5511 = vmatprep.subr.bf16.mxu0 %v9216_v8  ;;  %v9276_v7 = vld [vmem:[%s12414_s3 + $0xff4] ss:$20 sps:$4 sm:$0xff]   ;;  %v9279_v8 = vld [vmem:[%s12414_s3 + $0xffc] ss:$20 sps:$4 sm:$0xff]  }
 0x2d6   : > { %5839 = vmatprep.subr.bf16.mxu1 %v9219_v11  ;;  %v9274_v11 = vld [vmem:[%s12414_s3 + $0xff0] ss:$20 sps:$4 sm:$0xff]  }
 0x2d8   : > { %5512 = vmatpush1.bf16.msra.mxu0 %v9214_v30  ;;  %v9277_v30 = vld [vmem:[%s12414_s3 + $0xff8] ss:$20 sps:$4 sm:$0xff]  }
 0x2d9   : > { %5840 = vmatpush1.bf16.msra.mxu1 %v9217_v12  ;;  %5513 = vmatprep.subr.bf16.mxu0 %v9222_v14  ;;  %v9282_v12 = vld [vmem:[%s12414_s3 + $0x101c] ss:$20 sps:$4 sm:$0xff]   ;;  %v9285_v14 = vld [vmem:[%s12414_s3 + $0x1024] ss:$20 sps:$4 sm:$0xff]  }
 0x2da   : > { %5841 = vmatprep.subr.bf16.mxu1 %v9225_v40  ;;  %v9280_v40 = vld [vmem:[%s12414_s3 + $0x1018] ss:$20 sps:$4 sm:$0xff]  }
 0x2dc   : > { %5514 = vmatpush1.bf16.msra.mxu0 %v9220_v42  ;;  %v9283_v42 = vld [vmem:[%s12414_s3 + $0x1020] ss:$20 sps:$4 sm:$0xff]  }
 0x2dd   : > { %5842 = vmatpush1.bf16.msra.mxu1 %v9223_v50  ;;  %5515 = vmatprep.subr.bf16.mxu0 %v9228_v46  ;;  %v9288_v50 = vld [vmem:[%s12414_s3 + $0x1044] ss:$20 sps:$4 sm:$0xff]   ;;  %v9291_v46 = vld [vmem:[%s12414_s3 + $0x104c] ss:$20 sps:$4 sm:$0xff]  }
 0x2de   : > { %5843 = vmatprep.subr.bf16.mxu1 %v9231_v20  ;;  %v9286_v20 = vld [vmem:[%s12414_s3 + $0x1040] ss:$20 sps:$4 sm:$0xff]  }
 0x2e0   : > { %5516 = vmatpush1.bf16.msra.mxu0 %v9226_v34  ;;  %v9289_v34 = vld [vmem:[%s12414_s3 + $0x1048] ss:$20 sps:$4 sm:$0xff]  }
 0x2e1   : > { %5844 = vmatpush1.bf16.msra.mxu1 %v9229_v41  ;;  %5517 = vmatprep.subr.bf16.mxu0 %v9234_v49  ;;  %v9294_v41 = vld [vmem:[%s12414_s3 + $0x106c] ss:$20 sps:$4 sm:$0xff]   ;;  %v9297_v49 = vld [vmem:[%s12414_s3 + $0x1074] ss:$20 sps:$4 sm:$0xff]  }
 0x2e2   : > { %5845 = vmatprep.subr.bf16.mxu1 %v9237_v24  ;;  %v9292_v24 = vld [vmem:[%s12414_s3 + $0x1068] ss:$20 sps:$4 sm:$0xff]  }
 0x2e4   : > { %5518 = vmatpush1.bf16.msra.mxu0 %v9232_v29  ;;  %v9295_v29 = vld [vmem:[%s12414_s3 + $0x1070] ss:$20 sps:$4 sm:$0xff]  }
 0x2e5   : > { %5846 = vmatpush1.bf16.msra.mxu1 %v9235_v31  ;;  %5528 = vmatprep.subr.bf16.mxu0 %v9240_v5  ;;  %v9300_v31 = vld [vmem:[%s12414_s3 + $0x1094] ss:$20 sps:$4 sm:$0xff]   ;;  %v9303_v5 = vld [vmem:[%s12414_s3 + $0x109c] ss:$20 sps:$4 sm:$0xff]  }
 0x2e6   : > { %5856 = vmatprep.subr.bf16.mxu1 %v9243_v36  ;;  %v9298_v36 = vld [vmem:[%s12414_s3 + $0x1090] ss:$20 sps:$4 sm:$0xff]  }
 0x2e7   : > { %5520 = vmatmul.mubr.bf16.vlgmr.msra.gmra.mrb[0].mxu0 %v11225_v39 }
 0x2e8   : > { %5848 = vmatmul.mubr.bf16.vlgmr.msra.gmra.mrb[0].mxu1 %v11225_v39  ;;  %5529 = vmatpush1.bf16.msra.mxu0 %v9238_v38  ;;  %v9306_v38 = vld [vmem:[%s12414_s3 + $0x10bc] ss:$20 sps:$4 sm:$0xff]  }
 0x2e9   : > { %5560 = vmatprep.mubr.bf16.mxu0 %v11234_v51  ;;  %5857 = vmatpush1.bf16.msra.mxu1 %v9241_v45  ;;  %v9309_v45 = vld [vmem:[%s12414_s3 + $0x10c4] ss:$20 sps:$4 sm:$0xff]  }
 0x2ea   : > { %5888 = vmatprep.mubr.bf16.mxu1 %v11234_v51  ;;  %5530 = vmatprep.subr.bf16.mxu0 %v9246_v47  ;;  %v9304_v47 = vld [vmem:[%s12414_s3 + $0x10b8] ss:$20 sps:$4 sm:$0xff]  }
 0x2eb   : > { %5858 = vmatprep.subr.bf16.mxu1 %v9249_v4  ;;  %v9307_v4 = vld [vmem:[%s12414_s3 + $0x10c0] ss:$20 sps:$4 sm:$0xff]  }
 0x2ec   : > { %5531 = vmatpush1.bf16.msra.mxu0 %v9244_v63  ;;  %v9312_v63 = vld [vmem:[%s12414_s3 + $0x10e4] ss:$20 sps:$4 sm:$0xff]  }
 0x2ed   : > { %5859 = vmatpush1.bf16.msra.mxu1 %v9247_v52  ;;  %5532 = vmatprep.subr.bf16.mxu0 %v9252_v53  ;;  %v9315_v52 = vld [vmem:[%s12414_s3 + $0x10ec] ss:$20 sps:$4 sm:$0xff]  }
 0x2ee   : > { %5860 = vmatprep.subr.bf16.mxu1 %v9255_v54  ;;  %v9310_v53 = vld [vmem:[%s12414_s3 + $0x10e0] ss:$20 sps:$4 sm:$0xff]   ;;  %v9313_v54 = vld [vmem:[%s12414_s3 + $0x10e8] ss:$20 sps:$4 sm:$0xff]  }
 0x2f0   : > { %5533 = vmatpush1.bf16.msra.mxu0 %v9250_v55  ;;  %v9318_v55 = vld [vmem:[%s12414_s3 + $0x110c] ss:$20 sps:$4 sm:$0xff]  }
 0x2f1   : > { %5861 = vmatpush1.bf16.msra.mxu1 %v9253_v56  ;;  %5534 = vmatprep.subr.bf16.mxu0 %v9258_v58  ;;  %v9321_v56 = vld [vmem:[%s12414_s3 + $0x1114] ss:$20 sps:$4 sm:$0xff]  }
 0x2f2   : > { %5862 = vmatprep.subr.bf16.mxu1 %v9261_v60  ;;  %v9316_v58 = vld [vmem:[%s12414_s3 + $0x1108] ss:$20 sps:$4 sm:$0xff]   ;;  %v9319_v60 = vld [vmem:[%s12414_s3 + $0x1110] ss:$20 sps:$4 sm:$0xff]  }
 0x2f4   : > { %5535 = vmatpush1.bf16.msra.mxu0 %v9256_v61  ;;  %v9324_v61 = vld [vmem:[%s12414_s3 + $0x1134] ss:$20 sps:$4 sm:$0xff]  }
 0x2f5   : > { %5863 = vmatpush1.bf16.msra.mxu1 %v9259_v25  ;;  %5536 = vmatprep.subr.bf16.mxu0 %v9264_v62  ;;  %v9327_v25 = vld [vmem:[%s12414_s3 + $0x113c] ss:$20 sps:$4 sm:$0xff]   ;;  %v1110_v62 = vcombine.high %v10171_v27, %v10171_v27  ;;  %v9333_v27 = vld [vmem:[%s12414_s3 + $0x1164] ss:$20 sps:$4 sm:$0xff]  }
 0x2f6   : > { %5864 = vmatprep.subr.bf16.mxu1 %v9267_v19  ;;  %v9322_v19 = vld [vmem:[%s12414_s3 + $0x1130] ss:$20 sps:$4 sm:$0xff]  }
 0x2f8   : > { %5537 = vmatpush1.bf16.msra.mxu0 %v9262_v0  ;;  %v9325_v0 = vld [vmem:[%s12414_s3 + $0x1138] ss:$20 sps:$4 sm:$0xff]  }
 0x2f9   : > { %5865 = vmatpush1.bf16.msra.mxu1 %v9265_v1  ;;  %5538 = vmatprep.subr.bf16.mxu0 %v9270_v35  ;;  %v9330_v1 = vld [vmem:[%s12414_s3 + $0x115c] ss:$20 sps:$4 sm:$0xff]   ;;  %v11413_v35 = vrot.slane %v1110_v62, %v9800_v9  ;;  %v9387_v62 = vld [vmem:[%s12414_s3 + $0x12cc] ss:$20 sps:$4 sm:$0xff]  }
 0x2fa   : > { %5866 = vmatprep.subr.bf16.mxu1 %v9273_v2  ;;  %v9328_v2 = vld [vmem:[%s12414_s3 + $0x1158] ss:$20 sps:$4 sm:$0xff]  }
 0x2fc   : > { %5539 = vmatpush1.bf16.msra.mxu0 %v9268_v3  ;;  %v9331_v3 = vld [vmem:[%s12414_s3 + $0x1160] ss:$20 sps:$4 sm:$0xff]  }
 0x2fd   : > { %5867 = vmatpush1.bf16.msra.mxu1 %v9271_v16  ;;  %5540 = vmatprep.subr.bf16.mxu0 %v9276_v7  ;;  %v9336_v16 = vld [vmem:[%s12414_s3 + $0x1184] ss:$20 sps:$4 sm:$0xff]   ;;  %v9339_v7 = vld [vmem:[%s12414_s3 + $0x118c] ss:$20 sps:$4 sm:$0xff]  }
 0x2fe   : > { %5868 = vmatprep.subr.bf16.mxu1 %v9279_v8  ;;  %v1126_v8 = vcombine.high %v11413_v35, %v11413_v35 }
 0x300   : > { %5541 = vmatpush1.bf16.msra.mxu0 %v9274_v11  ;;  %v9334_v11 = vld [vmem:[%s12414_s3 + $0x1180] ss:$20 sps:$4 sm:$0xff]  }
 0x301   : > { %5869 = vmatpush1.bf16.msra.mxu1 %v9277_v30  ;;  %5542 = vmatprep.subr.bf16.mxu0 %v9282_v12  ;;  %v11434_v30 = vpack.c.bf16 %v11204_v26, %v11204_v26  ;;  %v9337_v12 = vld [vmem:[%s12414_s3 + $0x1188] ss:$20 sps:$4 sm:$0xff]  }
 0x302   : > { %5870 = vmatprep.subr.bf16.mxu1 %v9285_v14  ;;  %v9342_v14 = vld [vmem:[%s12414_s3 + $0x11ac] ss:$20 sps:$4 sm:$0xff]   ;;  %v9340_v26 = vld [vmem:[%s12414_s3 + $0x11a8] ss:$20 sps:$4 sm:$0xff]  }
 0x304   : > { %5543 = vmatpush1.bf16.msra.mxu0 %v9280_v40  ;;  %v11443_v40 = vpack.c.bf16 %v1126_v8, %v1126_v8  ;;  %v9394_v8 = vld [vmem:[%s12414_s3 + $0x1310] ss:$20 sps:$4 sm:$0xff]  }
 0x305   : > { %5871 = vmatpush1.bf16.msra.mxu1 %v9283_v42  ;;  %5544 = vmatprep.subr.bf16.mxu0 %v9288_v50  ;;  %v9345_v42 = vld [vmem:[%s12414_s3 + $0x11b4] ss:$20 sps:$4 sm:$0xff]   ;;  %v9343_v50 = vld [vmem:[%s12414_s3 + $0x11b0] ss:$20 sps:$4 sm:$0xff]  }
 0x306   : > { %5872 = vmatprep.subr.bf16.mxu1 %v9291_v46  ;;  %v9348_v46 = vld [vmem:[%s12414_s3 + $0x11d4] ss:$20 sps:$4 sm:$0xff]  }
 0x308   : > { %5545 = vmatpush1.bf16.msra.mxu0 %v9286_v20  ;;  %v9351_v20 = vld [vmem:[%s12414_s3 + $0x11dc] ss:$20 sps:$4 sm:$0xff]  }
 0x309   : > { %5873 = vmatpush1.bf16.msra.mxu1 %v9289_v34  ;;  %5546 = vmatprep.subr.bf16.mxu0 %v9294_v41  ;;  %v9346_v34 = vld [vmem:[%s12414_s3 + $0x11d0] ss:$20 sps:$4 sm:$0xff]   ;;  %v9349_v41 = vld [vmem:[%s12414_s3 + $0x11d8] ss:$20 sps:$4 sm:$0xff]  }
 0x30a   : > { %5874 = vmatprep.subr.bf16.mxu1 %v9297_v49  ;;  %v9354_v49 = vld [vmem:[%s12414_s3 + $0x11fc] ss:$20 sps:$4 sm:$0xff]  }
 0x30c   : > { %5547 = vmatpush1.bf16.msra.mxu0 %v9292_v24  ;;  %v9357_v24 = vld [vmem:[%s12414_s3 + $0x1204] ss:$20 sps:$4 sm:$0xff]  }
 0x30d   : > { %5875 = vmatpush1.bf16.msra.mxu1 %v9295_v29  ;;  %5548 = vmatprep.subr.bf16.mxu0 %v9300_v31  ;;  %v9352_v29 = vld [vmem:[%s12414_s3 + $0x11f8] ss:$20 sps:$4 sm:$0xff]   ;;  %v9355_v31 = vld [vmem:[%s12414_s3 + $0x1200] ss:$20 sps:$4 sm:$0xff]  }
 0x30e   : > { %5876 = vmatprep.subr.bf16.mxu1 %v9303_v5  ;;  %v9360_v5 = vld [vmem:[%s12414_s3 + $0x1224] ss:$20 sps:$4 sm:$0xff]  }
 0x310   : > { %5549 = vmatpush1.bf16.msra.mxu0 %v9298_v36  ;;  %v9363_v36 = vld [vmem:[%s12414_s3 + $0x122c] ss:$20 sps:$4 sm:$0xff]  }
 0x311   : > { %5877 = vmatpush1.bf16.msra.mxu1 %v9301_v37  ;;  %5550 = vmatprep.subr.bf16.mxu0 %v9306_v38  ;;  %v9358_v37 = vld [vmem:[%s12414_s3 + $0x1220] ss:$20 sps:$4 sm:$0xff]   ;;  %v9361_v38 = vld [vmem:[%s12414_s3 + $0x1228] ss:$20 sps:$4 sm:$0xff]  }
 0x312   : > { %5878 = vmatprep.subr.bf16.mxu1 %v9309_v45  ;;  %v9366_v45 = vld [vmem:[%s12414_s3 + $0x124c] ss:$20 sps:$4 sm:$0xff]  }
 0x314   : > { %5551 = vmatpush1.bf16.msra.mxu0 %v9304_v47  ;;  %v9369_v47 = vld [vmem:[%s12414_s3 + $0x1254] ss:$20 sps:$4 sm:$0xff]  }
 0x315   : > { %5879 = vmatpush1.bf16.msra.mxu1 %v9307_v4  ;;  %5552 = vmatprep.subr.bf16.mxu0 %v9312_v63  ;;  %v9364_v4 = vld [vmem:[%s12414_s3 + $0x1248] ss:$20 sps:$4 sm:$0xff]   ;;  %v9367_v63 = vld [vmem:[%s12414_s3 + $0x1250] ss:$20 sps:$4 sm:$0xff]  }
 0x316   : > { %5880 = vmatprep.subr.bf16.mxu1 %v9315_v52  ;;  %v9372_v52 = vld [vmem:[%s12414_s3 + $0x1274] ss:$20 sps:$4 sm:$0xff]  }
 0x318   : > { %5553 = vmatpush1.bf16.msra.mxu0 %v9310_v53  ;;  %v9375_v53 = vld [vmem:[%s12414_s3 + $0x127c] ss:$20 sps:$4 sm:$0xff]  }
 0x319   : > { %5881 = vmatpush1.bf16.msra.mxu1 %v9313_v54  ;;  %5554 = vmatprep.subr.bf16.mxu0 %v9318_v55  ;;  %v9370_v54 = vld [vmem:[%s12414_s3 + $0x1270] ss:$20 sps:$4 sm:$0xff]   ;;  %v9373_v55 = vld [vmem:[%s12414_s3 + $0x1278] ss:$20 sps:$4 sm:$0xff]  }
 0x31a   : > { %5882 = vmatprep.subr.bf16.mxu1 %v9321_v56  ;;  %v9378_v56 = vld [vmem:[%s12414_s3 + $0x129c] ss:$20 sps:$4 sm:$0xff]  }
 0x31c   : > { %5555 = vmatpush1.bf16.msra.mxu0 %v9316_v58  ;;  %v9381_v58 = vld [vmem:[%s12414_s3 + $0x12a4] ss:$20 sps:$4 sm:$0xff]  }
 0x31d   : > { %5883 = vmatpush1.bf16.msra.mxu1 %v9319_v60  ;;  %5556 = vmatprep.subr.bf16.mxu0 %v9324_v61  ;;  %v9376_v60 = vld [vmem:[%s12414_s3 + $0x1298] ss:$20 sps:$4 sm:$0xff]   ;;  %v9379_v61 = vld [vmem:[%s12414_s3 + $0x12a0] ss:$20 sps:$4 sm:$0xff]  }
 0x31e   : > { %5884 = vmatprep.subr.bf16.mxu1 %v9327_v25  ;;  %v9384_v25 = vld [vmem:[%s12414_s3 + $0x12c4] ss:$20 sps:$4 sm:$0xff]  }
 0x320   : > { %5557 = vmatpush1.bf16.msra.mxu0 %v9322_v19  ;;  %v9382_v19 = vld [vmem:[%s12414_s3 + $0x12c0] ss:$20 sps:$4 sm:$0xff]  }
 0x321   : > { %5885 = vmatpush1.bf16.msra.mxu1 %v9325_v0  ;;  %5558 = vmatprep.subr.bf16.mxu0 %v9330_v1  ;;  %v9385_v0 = vld [vmem:[%s12414_s3 + $0x12c8] ss:$20 sps:$4 sm:$0xff]   ;;  %v9390_v1 = vld [vmem:[%s12414_s3 + $0x12ec] ss:$20 sps:$4 sm:$0xff]  }
 0x322   : > { %5886 = vmatprep.subr.bf16.mxu1 %v9333_v27  ;;  %v9393_v27 = vld [vmem:[%s12414_s3 + $0x12f4] ss:$20 sps:$4 sm:$0xff]  }
 0x324   : > { %5559 = vmatpush1.bf16.msra.mxu0 %v9328_v2  ;;  %v9388_v2 = vld [vmem:[%s12414_s3 + $0x12e8] ss:$20 sps:$4 sm:$0xff]  }
 0x325   : > { %5887 = vmatpush1.bf16.msra.mxu1 %v9331_v3  ;;  %5569 = vmatprep.subr.bf16.mxu0 %v9336_v16  ;;  %v9391_v3 = vld [vmem:[%s12414_s3 + $0x12f0] ss:$20 sps:$4 sm:$0xff]   ;;  %v9396_v16 = vld [vmem:[%s12414_s3 + $0x1314] ss:$20 sps:$4 sm:$0xff]  }
 0x326   : > { %5897 = vmatprep.subr.bf16.mxu1 %v9339_v7  ;;  %v9399_v7 = vld [vmem:[%s12414_s3 + $0x131c] ss:$20 sps:$4 sm:$0xff]  }
 0x327   : > { %5561 = vmatmul.mubr.bf16.vlgmr.msra.gmra.mrb[0].mxu0 %v11434_v30 }
 0x328   : > { %5889 = vmatmul.mubr.bf16.vlgmr.msra.gmra.mrb[0].mxu1 %v11434_v30  ;;  %5570 = vmatpush1.bf16.msra.mxu0 %v9334_v11  ;;  %v9397_v11 = vld [vmem:[%s12414_s3 + $0x1318] ss:$20 sps:$4 sm:$0xff]  }
 0x329   : > { %5601 = vmatprep.mubr.bf16.mxu0 %v11443_v40  ;;  %5898 = vmatpush1.bf16.msra.mxu1 %v9337_v12  ;;  %v9402_v12 = vld [vmem:[%s12414_s3 + $0x133c] ss:$20 sps:$4 sm:$0xff]  }
 0x32a   : > { %5929 = vmatprep.mubr.bf16.mxu1 %v11443_v40  ;;  %5571 = vmatprep.subr.bf16.mxu0 %v9342_v14  ;;  %v9405_v14 = vld [vmem:[%s12414_s3 + $0x1344] ss:$20 sps:$4 sm:$0xff]  }
 0x32b   : > { %5899 = vmatprep.subr.bf16.mxu1 %v9345_v42  ;;  %v9400_v42 = vld [vmem:[%s12414_s3 + $0x1338] ss:$20 sps:$4 sm:$0xff]  }
 0x32c   : > { %5572 = vmatpush1.bf16.msra.mxu0 %v9340_v26  ;;  %v9403_v26 = vld [vmem:[%s12414_s3 + $0x1340] ss:$20 sps:$4 sm:$0xff]  }
 0x32d   : > { %5900 = vmatpush1.bf16.msra.mxu1 %v9343_v50  ;;  %5573 = vmatprep.subr.bf16.mxu0 %v9348_v46  ;;  %v9408_v50 = vld [vmem:[%s12414_s3 + $0x1364] ss:$20 sps:$4 sm:$0xff]   ;;  %v9411_v46 = vld [vmem:[%s12414_s3 + $0x136c] ss:$20 sps:$4 sm:$0xff]  }
 0x32e   : > { %5901 = vmatprep.subr.bf16.mxu1 %v9351_v20  ;;  %v9406_v20 = vld [vmem:[%s12414_s3 + $0x1360] ss:$20 sps:$4 sm:$0xff]  }
 0x330   : > { %5574 = vmatpush1.bf16.msra.mxu0 %v9346_v34  ;;  %v9409_v34 = vld [vmem:[%s12414_s3 + $0x1368] ss:$20 sps:$4 sm:$0xff]  }
 0x331   : > { %5902 = vmatpush1.bf16.msra.mxu1 %v9349_v41  ;;  %5575 = vmatprep.subr.bf16.mxu0 %v9354_v49  ;;  %v9414_v41 = vld [vmem:[%s12414_s3 + $0x138c] ss:$20 sps:$4 sm:$0xff]   ;;  %v9417_v49 = vld [vmem:[%s12414_s3 + $0x1394] ss:$20 sps:$4 sm:$0xff]  }
 0x332   : > { %5903 = vmatprep.subr.bf16.mxu1 %v9357_v24  ;;  %v9412_v24 = vld [vmem:[%s12414_s3 + $0x1388] ss:$20 sps:$4 sm:$0xff]  }
 0x334   : > { %5576 = vmatpush1.bf16.msra.mxu0 %v9352_v29  ;;  %v9415_v29 = vld [vmem:[%s12414_s3 + $0x1390] ss:$20 sps:$4 sm:$0xff]  }
 0x335   : > { %5904 = vmatpush1.bf16.msra.mxu1 %v9355_v31  ;;  %5577 = vmatprep.subr.bf16.mxu0 %v9360_v5  ;;  %v9420_v31 = vld [vmem:[%s12414_s3 + $0x13b4] ss:$20 sps:$4 sm:$0xff]   ;;  %v9423_v5 = vld [vmem:[%s12414_s3 + $0x13bc] ss:$20 sps:$4 sm:$0xff]  }
 0x336   : > { %5905 = vmatprep.subr.bf16.mxu1 %v9363_v36  ;;  %v9418_v36 = vld [vmem:[%s12414_s3 + $0x13b0] ss:$20 sps:$4 sm:$0xff]  }
 0x338   : > { %5578 = vmatpush1.bf16.msra.mxu0 %v9358_v37  ;;  %v9421_v37 = vld [vmem:[%s12414_s3 + $0x13b8] ss:$20 sps:$4 sm:$0xff]  }
 0x339   : > { %5906 = vmatpush1.bf16.msra.mxu1 %v9361_v38  ;;  %5579 = vmatprep.subr.bf16.mxu0 %v9366_v45  ;;  %v9426_v38 = vld [vmem:[%s12414_s3 + $0x13dc] ss:$20 sps:$4 sm:$0xff]   ;;  %v9429_v45 = vld [vmem:[%s12414_s3 + $0x13e4] ss:$20 sps:$4 sm:$0xff]  }
 0x33a   : > { %5907 = vmatprep.subr.bf16.mxu1 %v9369_v47  ;;  %v9424_v47 = vld [vmem:[%s12414_s3 + $0x13d8] ss:$20 sps:$4 sm:$0xff]  }
 0x33c   : > { %5580 = vmatpush1.bf16.msra.mxu0 %v9364_v4  ;;  %v9427_v4 = vld [vmem:[%s12414_s3 + $0x13e0] ss:$20 sps:$4 sm:$0xff]  }
 0x33d   : > { %5908 = vmatpush1.bf16.msra.mxu1 %v9367_v63  ;;  %5581 = vmatprep.subr.bf16.mxu0 %v9372_v52  ;;  %v9430_v63 = vld [vmem:[%s12414_s3 + $0x150] ss:$20 sps:$4 sm:$0xff]  }
 0x33e   : > { %5909 = vmatprep.subr.bf16.mxu1 %v9375_v53  ;;  %v9431_v52 = vld [vmem:[%s12414_s3 + $0x3d0] ss:$20 sps:$4 sm:$0xff]  }
 0x33f   : > { %v9432_v53 = vld [vmem:[%s12414_s3 + $0x10] ss:$20 sps:$4 sm:$0xff]  }
 0x340   : > { %5582 = vmatpush1.bf16.msra.mxu0 %v9370_v54  ;;  %v11636_v54 = vpack.c.bf16 %v11413_v35, %v11413_v35  ;;  %v9436_v35 = vld [vmem:[%s12414_s3 + $0x38] ss:$20 sps:$4 sm:$0xff]  }
 0x341   : > { %5910 = vmatpush1.bf16.msra.mxu1 %v9373_v55  ;;  %5583 = vmatprep.subr.bf16.mxu0 %v9378_v56  ;;  %v9433_v55 = vld [vmem:[%s12414_s3 + $0x290] ss:$20 sps:$4 sm:$0xff]   ;;  %v9434_v56 = vld [vmem:[%s12414_s3 + $0x178] ss:$20 sps:$4 sm:$0xff]  }
 0x342   : > { %5911 = vmatprep.subr.bf16.mxu1 %v9381_v58  ;;  %v9435_v58 = vld [vmem:[%s12414_s3 + $0x3f8] ss:$20 sps:$4 sm:$0xff]  }
 0x344   : > { %5584 = vmatpush1.bf16.msra.mxu0 %v9376_v60  ;;  %v9437_v60 = vld [vmem:[%s12414_s3 + $0x2b8] ss:$20 sps:$4 sm:$0xff]  }
 0x345   : > { %5912 = vmatpush1.bf16.msra.mxu1 %v9379_v61  ;;  %5585 = vmatprep.subr.bf16.mxu0 %v9384_v25  ;;  %v9438_v61 = vld [vmem:[%s12414_s3 + $0x1a0] ss:$20 sps:$4 sm:$0xff]  }
 0x346   : > { %5913 = vmatprep.subr.bf16.mxu1 %v9387_v62  ;;  %v9439_v25 = vld [vmem:[%s12414_s3 + $0x420] ss:$20 sps:$4 sm:$0xff]  }
 0x347   : > { %v9441_v62 = vld [vmem:[%s12414_s3 + $0x2e0] ss:$20 sps:$4 sm:$0xff]  }
 0x348   : > { %5586 = vmatpush1.bf16.msra.mxu0 %v9382_v19  ;;  %v9443_v19 = vld [vmem:[%s12414_s3 + $0x448] ss:$20 sps:$4 sm:$0xff]  }
 0x349   : > { %5914 = vmatpush1.bf16.msra.mxu1 %v9385_v0  ;;  %5587 = vmatprep.subr.bf16.mxu0 %v9390_v1  ;;  %v9444_v0 = vld [vmem:[%s12414_s3 + $0x88] ss:$20 sps:$4 sm:$0xff]  }
 0x34a   : > { %5915 = vmatprep.subr.bf16.mxu1 %v9393_v27  ;;  %v9445_v1 = vld [vmem:[%s12414_s3 + $0x308] ss:$20 sps:$4 sm:$0xff]   ;;  %v9446_v27 = vld [vmem:[%s12414_s3 + $0x1f0] ss:$20 sps:$4 sm:$0xff]  }
 0x34c   : > { %5588 = vmatpush1.bf16.msra.mxu0 %v9388_v2  ;;  %v9447_v2 = vld [vmem:[%s12414_s3 + $0x470] ss:$20 sps:$4 sm:$0xff]  }
 0x34d   : > { %5916 = vmatpush1.bf16.msra.mxu1 %v9391_v3  ;;  %5589 = vmatprep.subr.bf16.mxu0 %v9396_v16  ;;  %v9448_v3 = vld [vmem:[%s12414_s3 + $0xb0] ss:$20 sps:$4 sm:$0xff]  }
 0x34e   : > { %5917 = vmatprep.subr.bf16.mxu1 %v9399_v7  ;;  %v9449_v16 = vld [vmem:[%s12414_s3 + $0x330] ss:$20 sps:$4 sm:$0xff]   ;;  %v9450_v7 = vld [vmem:[%s12414_s3 + $0x218] ss:$20 sps:$4 sm:$0xff]  }
 0x350   : > { %5590 = vmatpush1.bf16.msra.mxu0 %v9394_v8  ;;  %v9451_v8 = vld [vmem:[%s12414_s3 + $0x498] ss:$20 sps:$4 sm:$0xff]  }
 0x351   : > { %5918 = vmatpush1.bf16.msra.mxu1 %v9397_v11  ;;  %5591 = vmatprep.subr.bf16.mxu0 %v9402_v12  ;;  %v9452_v11 = vld [vmem:[%s12414_s3 + $0xd8] ss:$20 sps:$4 sm:$0xff]  }
 0x352   : > { %5919 = vmatprep.subr.bf16.mxu1 %v9405_v14  ;;  %v9453_v12 = vld [vmem:[%s12414_s3 + $0x358] ss:$20 sps:$4 sm:$0xff]   ;;  %v9454_v14 = vld [vmem:[%s12414_s3 + $0x240] ss:$20 sps:$4 sm:$0xff]  }
 0x354   : > { %5592 = vmatpush1.bf16.msra.mxu0 %v9400_v42  ;;  %v9455_v42 = vld [vmem:[%s12414_s3 + $0x4c0] ss:$20 sps:$4 sm:$0xff]  }
 0x355   : > { %5920 = vmatpush1.bf16.msra.mxu1 %v9403_v26  ;;  %5593 = vmatprep.subr.bf16.mxu0 %v9408_v50  ;;  %v9456_v26 = vld [vmem:[%s12414_s3 + $0x100] ss:$20 sps:$4 sm:$0xff]  }
 0x356   : > { %5921 = vmatprep.subr.bf16.mxu1 %v9411_v46  ;;  %v9457_v50 = vld [vmem:[%s12414_s3 + $0x380] ss:$20 sps:$4 sm:$0xff]   ;;  %v9458_v46 = vld [vmem:[%s12414_s3 + $0x268] ss:$20 sps:$4 sm:$0xff]  }
 0x358   : > { %5594 = vmatpush1.bf16.msra.mxu0 %v9406_v20  ;;  %v9459_v20 = vld [vmem:[%s12414_s3 + $0x4e8] ss:$20 sps:$4 sm:$0xff]  }
 0x359   : > { %5922 = vmatpush1.bf16.msra.mxu1 %v9409_v34  ;;  %5595 = vmatprep.subr.bf16.mxu0 %v9414_v41  ;;  %v9460_v34 = vld [vmem:[%s12414_s3 + $0x128] ss:$20 sps:$4 sm:$0xff]  }
 0x35a   : > { %5923 = vmatprep.subr.bf16.mxu1 %v9417_v49  ;;  %v9461_v41 = vld [vmem:[%s12414_s3 + $0x3a8] ss:$20 sps:$4 sm:$0xff]   ;;  %v9462_v49 = vld [vmem:[%s12414_s3 + $0x650] ss:$20 sps:$4 sm:$0xff]  }
 0x35c   : > { %5596 = vmatpush1.bf16.msra.mxu0 %v9412_v24  ;;  %v9463_v24 = vld [vmem:[%s12414_s3 + $0x8d0] ss:$20 sps:$4 sm:$0xff]  }
 0x35d   : > { %5924 = vmatpush1.bf16.msra.mxu1 %v9415_v29  ;;  %5597 = vmatprep.subr.bf16.mxu0 %v9420_v31  ;;  %v9464_v29 = vld [vmem:[%s12414_s3 + $0x510] ss:$20 sps:$4 sm:$0xff]  }
 0x35e   : > { %5925 = vmatprep.subr.bf16.mxu1 %v9423_v5  ;;  %v9465_v31 = vld [vmem:[%s12414_s3 + $0x790] ss:$20 sps:$4 sm:$0xff]   ;;  %v9466_v5 = vld [vmem:[%s12414_s3 + $0x678] ss:$20 sps:$4 sm:$0xff]  }
 0x360   : > { %5598 = vmatpush1.bf16.msra.mxu0 %v9418_v36  ;;  %v9467_v36 = vld [vmem:[%s12414_s3 + $0x8f8] ss:$20 sps:$4 sm:$0xff]  }
 0x361   : > { %5926 = vmatpush1.bf16.msra.mxu1 %v9421_v37  ;;  %5599 = vmatprep.subr.bf16.mxu0 %v9426_v38  ;;  %v9468_v37 = vld [vmem:[%s12414_s3 + $0x538] ss:$20 sps:$4 sm:$0xff]  }
 0x362   : > { %5927 = vmatprep.subr.bf16.mxu1 %v9429_v45  ;;  %v9469_v38 = vld [vmem:[%s12414_s3 + $0x7b8] ss:$20 sps:$4 sm:$0xff]   ;;  %v9473_v45 = vld [vmem:[%s12414_s3 + $0x7e0] ss:$20 sps:$4 sm:$0xff]  }
 0x364   : > { %5600 = vmatpush1.bf16.msra.mxu0 %v9424_v47  ;;  %v9475_v47 = vld [vmem:[%s12414_s3 + $0x948] ss:$20 sps:$4 sm:$0xff]  }
 0x365   : > { %5928 = vmatpush1.bf16.msra.mxu1 %v9427_v4  ;;  %8296 = vmatprep.subr.bf16.mxu0 %v9430_v63  ;;  %v9476_v4 = vld [vmem:[%s12414_s3 + $0x588] ss:$20 sps:$4 sm:$0xff]  }
 0x366   : > { %8318 = vmatprep.subr.bf16.mxu1 %v9431_v52  ;;  %v9477_v63 = vld [vmem:[%s12414_s3 + $0x808] ss:$20 sps:$4 sm:$0xff]   ;;  %v9478_v52 = vld [vmem:[%s12414_s3 + $0x6f0] ss:$20 sps:$4 sm:$0xff]  }
 0x367   : > { %5602 = vmatmul.mubr.bf16.vlgmr.msra.gmra.mrb[0].mxu0 %v11636_v54 }
 0x368   : > { %5930 = vmatmul.mubr.bf16.vlgmr.msra.gmra.mrb[0].mxu1 %v11636_v54  ;;  %8297 = vmatpush3.bf16.msra.mxu0 %v9432_v53  ;;  %v9479_v53 = vld [vmem:[%s12414_s3 + $0x970] ss:$20 sps:$4 sm:$0xff]  }
 0x369   : > { %5970 = vmatprep.mubr.bf16.mxu0 %v10173_v28  ;;  %8319 = vmatpush3.bf16.msra.mxu1 %v9433_v55  ;;  %v9440_v28 = vld [vmem:[%s12414_s3 + $0x60] ss:$20 sps:$4 sm:$0xff]   ;;  %v9480_v55 = vld [vmem:[%s12414_s3 + $0x5b0] ss:$20 sps:$4 sm:$0xff]  }
 0x36a   : > { %6010 = vmatprep.mubr.bf16.mxu1 %v10187_v33  ;;  %8298 = vmatprep.subr.bf16.mxu0 %v9434_v56  ;;  %v9442_v33 = vld [vmem:[%s12414_s3 + $0x1c8] ss:$20 sps:$4 sm:$0xff]   ;;  %v9481_v56 = vld [vmem:[%s12414_s3 + $0x830] ss:$20 sps:$4 sm:$0xff]  }
 0x36b   : > { %8320 = vmatprep.subr.bf16.mxu1 %v9435_v58  ;;  %v9482_v58 = vld [vmem:[%s12414_s3 + $0x718] ss:$20 sps:$4 sm:$0xff]  }
 0x36c   : > { %8299 = vmatpush3.bf16.msra.mxu0 %v9436_v35  ;;  %v9483_v35 = vld [vmem:[%s12414_s3 + $0x998] ss:$20 sps:$4 sm:$0xff]  }
 0x36d   : > { %8321 = vmatpush3.bf16.msra.mxu1 %v9437_v60  ;;  %8300 = vmatprep.subr.bf16.mxu0 %v9438_v61  ;;  %v9484_v60 = vld [vmem:[%s12414_s3 + $0x5d8] ss:$20 sps:$4 sm:$0xff]  }
 0x36e   : > { %8322 = vmatprep.subr.bf16.mxu1 %v9439_v25  ;;  %v9485_v61 = vld [vmem:[%s12414_s3 + $0x858] ss:$20 sps:$4 sm:$0xff]   ;;  %v9486_v25 = vld [vmem:[%s12414_s3 + $0x740] ss:$20 sps:$4 sm:$0xff]  }
 0x370   : > { %8301 = vmatpush3.bf16.msra.mxu0 %v9440_v28  ;;  %v9487_v28 = vld [vmem:[%s12414_s3 + $0x9c0] ss:$20 sps:$4 sm:$0xff]  }
 0x371   : > { %8323 = vmatpush3.bf16.msra.mxu1 %v9441_v62  ;;  %8302 = vmatprep.subr.bf16.mxu0 %v9442_v33  ;;  %v9488_v62 = vld [vmem:[%s12414_s3 + $0x600] ss:$20 sps:$4 sm:$0xff]  }
 0x372   : > { %8324 = vmatprep.subr.bf16.mxu1 %v9443_v19  ;;  %v9489_v33 = vld [vmem:[%s12414_s3 + $0x880] ss:$20 sps:$4 sm:$0xff]   ;;  %v9490_v19 = vld [vmem:[%s12414_s3 + $0x768] ss:$20 sps:$4 sm:$0xff]  }
 0x374   : > { %8303 = vmatpush3.bf16.msra.mxu0 %v9444_v0  ;;  %v9491_v0 = vld [vmem:[%s12414_s3 + $0x9e8] ss:$20 sps:$4 sm:$0xff]  }
 0x375   : > { %8325 = vmatpush3.bf16.msra.mxu1 %v9445_v1  ;;  %8304 = vmatprep.subr.bf16.mxu0 %v9446_v27  ;;  %v9492_v1 = vld [vmem:[%s12414_s3 + $0x628] ss:$20 sps:$4 sm:$0xff]  }
 0x376   : > { %8326 = vmatprep.subr.bf16.mxu1 %v9447_v2  ;;  %v9493_v27 = vld [vmem:[%s12414_s3 + $0x8a8] ss:$20 sps:$4 sm:$0xff]   ;;  %v9494_v2 = vld [vmem:[%s12414_s3 + $0xb50] ss:$20 sps:$4 sm:$0xff]  }
 0x378   : > { %8305 = vmatpush3.bf16.msra.mxu0 %v9448_v3  ;;  %v9495_v3 = vld [vmem:[%s12414_s3 + $0xdd0] ss:$20 sps:$4 sm:$0xff]  }
 0x379   : > { %8327 = vmatpush3.bf16.msra.mxu1 %v9449_v16  ;;  %8306 = vmatprep.subr.bf16.mxu0 %v9450_v7  ;;  %v9496_v16 = vld [vmem:[%s12414_s3 + $0xa10] ss:$20 sps:$4 sm:$0xff]  }
 0x37a   : > { %8328 = vmatprep.subr.bf16.mxu1 %v9451_v8  ;;  %v9497_v7 = vld [vmem:[%s12414_s3 + $0xc90] ss:$20 sps:$4 sm:$0xff]   ;;  %v9498_v8 = vld [vmem:[%s12414_s3 + $0xb78] ss:$20 sps:$4 sm:$0xff]  }
 0x37c   : > { %8307 = vmatpush3.bf16.msra.mxu0 %v9452_v11  ;;  %v9499_v11 = vld [vmem:[%s12414_s3 + $0xdf8] ss:$20 sps:$4 sm:$0xff]  }
 0x37d   : > { %8329 = vmatpush3.bf16.msra.mxu1 %v9453_v12  ;;  %8308 = vmatprep.subr.bf16.mxu0 %v9454_v14  ;;  %v9500_v12 = vld [vmem:[%s12414_s3 + $0xa38] ss:$20 sps:$4 sm:$0xff]  }
 0x37e   : > { %8330 = vmatprep.subr.bf16.mxu1 %v9455_v42  ;;  %v9501_v14 = vld [vmem:[%s12414_s3 + $0xcb8] ss:$20 sps:$4 sm:$0xff]   ;;  %v9505_v42 = vld [vmem:[%s12414_s3 + $0xce0] ss:$20 sps:$4 sm:$0xff]  }
 0x380   : > { %8309 = vmatpush3.bf16.msra.mxu0 %v9456_v26  ;;  %v9507_v26 = vld [vmem:[%s12414_s3 + $0xe48] ss:$20 sps:$4 sm:$0xff]  }
 0x381   : > { %8331 = vmatpush3.bf16.msra.mxu1 %v9457_v50  ;;  %8310 = vmatprep.subr.bf16.mxu0 %v9458_v46  ;;  %v9508_v50 = vld [vmem:[%s12414_s3 + $0xa88] ss:$20 sps:$4 sm:$0xff]  }
 0x382   : > { %8332 = vmatprep.subr.bf16.mxu1 %v9459_v20  ;;  %v9509_v46 = vld [vmem:[%s12414_s3 + $0xd08] ss:$20 sps:$4 sm:$0xff]   ;;  %v9510_v20 = vld [vmem:[%s12414_s3 + $0xbf0] ss:$20 sps:$4 sm:$0xff]  }
 0x384   : > { %8311 = vmatpush3.bf16.msra.mxu0 %v9460_v34  ;;  %v9511_v34 = vld [vmem:[%s12414_s3 + $0xe70] ss:$20 sps:$4 sm:$0xff]  }
 0x385   : > { %8333 = vmatpush3.bf16.msra.mxu1 %v9461_v41  ;;  %8340 = vmatprep.subr.bf16.mxu0 %v9462_v49  ;;  %v9512_v41 = vld [vmem:[%s12414_s3 + $0xab0] ss:$20 sps:$4 sm:$0xff]  }
 0x386   : > { %8362 = vmatprep.subr.bf16.mxu1 %v9463_v24  ;;  %v9513_v49 = vld [vmem:[%s12414_s3 + $0xd30] ss:$20 sps:$4 sm:$0xff]   ;;  %v9514_v24 = vld [vmem:[%s12414_s3 + $0xc18] ss:$20 sps:$4 sm:$0xff]  }
 0x387   : > { %5971 = vmatmul.mubr.bf16.vlgmr.msra.gmra.mrb[4].mxu0 %v10183_v32  ;;  %v9470_v32 = vld [vmem:[%s12414_s3 + $0x6a0] ss:$20 sps:$4 sm:$0xff]  }
 0x388   : > { %6011 = vmatmul.mubr.bf16.vlgmr.msra.gmra.mrb[4].mxu1 %v10391_v57  ;;  %8341 = vmatpush3.bf16.msra.mxu0 %v9464_v29  ;;  %v9471_v57 = vld [vmem:[%s12414_s3 + $0x920] ss:$20 sps:$4 sm:$0xff]   ;;  %v9515_v29 = vld [vmem:[%s12414_s3 + $0xe98] ss:$20 sps:$4 sm:$0xff]  }
 0x389   : > { %6050 = vmatprep.mubr.bf16.mxu0 %v10396_v59  ;;  %8363 = vmatpush3.bf16.msra.mxu1 %v9465_v31  ;;  %v9472_v59 = vld [vmem:[%s12414_s3 + $0x560] ss:$20 sps:$4 sm:$0xff]   ;;  %v9516_v31 = vld [vmem:[%s12414_s3 + $0xad8] ss:$20 sps:$4 sm:$0xff]  }
 0x38a   : > { %6090 = vmatprep.mubr.bf16.mxu1 %v10609_v15  ;;  %8342 = vmatprep.subr.bf16.mxu0 %v9466_v5  ;;  %v9474_v15 = vld [vmem:[%s12414_s3 + $0x6c8] ss:$20 sps:$4 sm:$0xff]   ;;  %v9517_v5 = vld [vmem:[%s12414_s3 + $0xd58] ss:$20 sps:$4 sm:$0xff]  }
 0x38b   : > { %8364 = vmatprep.subr.bf16.mxu1 %v9467_v36  ;;  %v9518_v36 = vld [vmem:[%s12414_s3 + $0xc40] ss:$20 sps:$4 sm:$0xff]  }
 0x38c   : > { %8343 = vmatpush3.bf16.msra.mxu0 %v9468_v37  ;;  %v9519_v37 = vld [vmem:[%s12414_s3 + $0xec0] ss:$20 sps:$4 sm:$0xff]  }
 0x38d   : > { %8365 = vmatpush3.bf16.msra.mxu1 %v9469_v38  ;;  %8344 = vmatprep.subr.bf16.mxu0 %v9470_v32  ;;  %v9520_v38 = vld [vmem:[%s12414_s3 + $0xb00] ss:$20 sps:$4 sm:$0xff]  }
 0x38e   : > { %8366 = vmatprep.subr.bf16.mxu1 %v9471_v57  ;;  %v9521_v32 = vld [vmem:[%s12414_s3 + $0xd80] ss:$20 sps:$4 sm:$0xff]   ;;  %v9522_v57 = vld [vmem:[%s12414_s3 + $0xc68] ss:$20 sps:$4 sm:$0xff]  }
 0x390   : > { %8345 = vmatpush3.bf16.msra.mxu0 %v9472_v59  ;;  %v9523_v59 = vld [vmem:[%s12414_s3 + $0xee8] ss:$20 sps:$4 sm:$0xff]  }
 0x391   : > { %8367 = vmatpush3.bf16.msra.mxu1 %v9473_v45  ;;  %8346 = vmatprep.subr.bf16.mxu0 %v9474_v15  ;;  %v9524_v45 = vld [vmem:[%s12414_s3 + $0xb28] ss:$20 sps:$4 sm:$0xff]  }
 0x392   : > { %8368 = vmatprep.subr.bf16.mxu1 %v9475_v47  ;;  %v9525_v15 = vld [vmem:[%s12414_s3 + $0xda8] ss:$20 sps:$4 sm:$0xff]   ;;  %v9526_v47 = vld [vmem:[%s12414_s3 + $0x1050] ss:$20 sps:$4 sm:$0xff]  }
 0x394   : > { %8347 = vmatpush3.bf16.msra.mxu0 %v9476_v4  ;;  %v9527_v4 = vld [vmem:[%s12414_s3 + $0x12d0] ss:$20 sps:$4 sm:$0xff]  }
 0x395   : > { %8369 = vmatpush3.bf16.msra.mxu1 %v9477_v63  ;;  %8348 = vmatprep.subr.bf16.mxu0 %v9478_v52  ;;  %v9528_v63 = vld [vmem:[%s12414_s3 + $0xf10] ss:$20 sps:$4 sm:$0xff]  }
 0x396   : > { %8370 = vmatprep.subr.bf16.mxu1 %v9479_v53  ;;  %v9529_v52 = vld [vmem:[%s12414_s3 + $0x1190] ss:$20 sps:$4 sm:$0xff]   ;;  %v9530_v53 = vld [vmem:[%s12414_s3 + $0x1078] ss:$20 sps:$4 sm:$0xff]  }
 0x398   : > { %8349 = vmatpush3.bf16.msra.mxu0 %v9480_v55  ;;  %v9531_v55 = vld [vmem:[%s12414_s3 + $0x12f8] ss:$20 sps:$4 sm:$0xff]  }
 0x399   : > { %8371 = vmatpush3.bf16.msra.mxu1 %v9481_v56  ;;  %8350 = vmatprep.subr.bf16.mxu0 %v9482_v58  ;;  %v9532_v56 = vld [vmem:[%s12414_s3 + $0xf38] ss:$20 sps:$4 sm:$0xff]  }
 0x39a   : > { %8372 = vmatprep.subr.bf16.mxu1 %v9483_v35  ;;  %v9533_v58 = vld [vmem:[%s12414_s3 + $0x11b8] ss:$20 sps:$4 sm:$0xff]   ;;  %v9537_v35 = vld [vmem:[%s12414_s3 + $0x11e0] ss:$20 sps:$4 sm:$0xff]  }
 0x39c   : > { %8351 = vmatpush3.bf16.msra.mxu0 %v9484_v60  ;;  %v9539_v60 = vld [vmem:[%s12414_s3 + $0x1348] ss:$20 sps:$4 sm:$0xff]  }
 0x39d   : > { %8373 = vmatpush3.bf16.msra.mxu1 %v9485_v61  ;;  %8352 = vmatprep.subr.bf16.mxu0 %v9486_v25  ;;  %v9540_v61 = vld [vmem:[%s12414_s3 + $0xf88] ss:$20 sps:$4 sm:$0xff]  }
 0x39e   : > { %8374 = vmatprep.subr.bf16.mxu1 %v9487_v28  ;;  %v9541_v25 = vld [vmem:[%s12414_s3 + $0x1208] ss:$20 sps:$4 sm:$0xff]   ;;  %v9542_v28 = vld [vmem:[%s12414_s3 + $0x10f0] ss:$20 sps:$4 sm:$0xff]  }
 0x3a0   : > { %8353 = vmatpush3.bf16.msra.mxu0 %v9488_v62  ;;  %v9543_v62 = vld [vmem:[%s12414_s3 + $0x1370] ss:$20 sps:$4 sm:$0xff]  }
 0x3a1   : > { %8375 = vmatpush3.bf16.msra.mxu1 %v9489_v33  ;;  %8354 = vmatprep.subr.bf16.mxu0 %v9490_v19  ;;  %v9544_v33 = vld [vmem:[%s12414_s3 + $0xfb0] ss:$20 sps:$4 sm:$0xff]  }
 0x3a2   : > { %8376 = vmatprep.subr.bf16.mxu1 %v9491_v0  ;;  %v9545_v19 = vld [vmem:[%s12414_s3 + $0x1230] ss:$20 sps:$4 sm:$0xff]   ;;  %v9546_v0 = vld [vmem:[%s12414_s3 + $0x1118] ss:$20 sps:$4 sm:$0xff]  }
 0x3a4   : > { %8355 = vmatpush3.bf16.msra.mxu0 %v9492_v1  ;;  %v9547_v1 = vld [vmem:[%s12414_s3 + $0x1398] ss:$20 sps:$4 sm:$0xff]  }
 0x3a5   : > { %8377 = vmatpush3.bf16.msra.mxu1 %v9493_v27  ;;  %8384 = vmatprep.subr.bf16.mxu0 %v9494_v2  ;;  %v9548_v27 = vld [vmem:[%s12414_s3 + $0xfd8] ss:$20 sps:$4 sm:$0xff]  }
 0x3a6   : > { %8406 = vmatprep.subr.bf16.mxu1 %v9495_v3  ;;  %v9549_v2 = vld [vmem:[%s12414_s3 + $0x1258] ss:$20 sps:$4 sm:$0xff]   ;;  %v9550_v3 = vld [vmem:[%s12414_s3 + $0x1140] ss:$20 sps:$4 sm:$0xff]  }
 0x3a7   : > { %6051 = vmatmul.mubr.bf16.vlgmr.msra.gmra.mrb[8].mxu0 %v10600_v13  ;;  %v9502_v13 = vld [vmem:[%s12414_s3 + $0xba0] ss:$20 sps:$4 sm:$0xff]  }
 0x3a8   : > { %6091 = vmatmul.mubr.bf16.vlgmr.msra.gmra.mrb[8].mxu1 %v10808_v43  ;;  %8385 = vmatpush3.bf16.msra.mxu0 %v9496_v16  ;;  %v9503_v43 = vld [vmem:[%s12414_s3 + $0xe20] ss:$20 sps:$4 sm:$0xff]  }
 0x3a9   : > { %6130 = vmatprep.mubr.bf16.mxu0 %v10817_v48  ;;  %8407 = vmatpush3.bf16.msra.mxu1 %v9497_v7  ;;  %v9504_v48 = vld [vmem:[%s12414_s3 + $0xa60] ss:$20 sps:$4 sm:$0xff]  }
 0x3aa   : > { %6170 = vmatprep.mubr.bf16.mxu1 %v11026_v10  ;;  %8386 = vmatprep.subr.bf16.mxu0 %v9498_v8  ;;  %v9506_v10 = vld [vmem:[%s12414_s3 + $0xbc8] ss:$20 sps:$4 sm:$0xff]   ;;  %v9551_v16 = vld [vmem:[%s12414_s3 + $0x13c0] ss:$20 sps:$4 sm:$0xff]  }
 0x3ab   : > { %8408 = vmatprep.subr.bf16.mxu1 %v9499_v11  ;;  %v9552_v7 = vld [vmem:[%s12414_s3 + $0x1000] ss:$20 sps:$4 sm:$0xff]   ;;  %v9554_v11 = vld [vmem:[%s12414_s3 + $0x1168] ss:$20 sps:$4 sm:$0xff]  }
 0x3ac   : > { %8387 = vmatpush3.bf16.msra.mxu0 %v9500_v12  ;;  %v9553_v8 = vld [vmem:[%s12414_s3 + $0x1280] ss:$20 sps:$4 sm:$0xff]   ;;  %v9555_v12 = vld [vmem:[%s12414_s3 + $0x13e8] ss:$20 sps:$4 sm:$0xff]  }
 0x3ad   : > { %8409 = vmatpush3.bf16.msra.mxu1 %v9501_v14  ;;  %8388 = vmatprep.subr.bf16.mxu0 %v9502_v13  ;;  %v9556_v14 = vld [vmem:[%s12414_s3 + $0x1028] ss:$20 sps:$4 sm:$0xff]  }
 0x3ae   : > { %8410 = vmatprep.subr.bf16.mxu1 %v9503_v43  ;;  %v9557_v13 = vld [vmem:[%s12414_s3 + $0x12a8] ss:$20 sps:$4 sm:$0xff]  }
 0x3b0   : > { %8389 = vmatpush3.bf16.msra.mxu0 %v9504_v48 }
 0x3b1   : > { %8411 = vmatpush3.bf16.msra.mxu1 %v9505_v42  ;;  %8390 = vmatprep.subr.bf16.mxu0 %v9506_v10 }
 0x3b2   : > { %8412 = vmatprep.subr.bf16.mxu1 %v9507_v26 }
 0x3b4   : > { %8391 = vmatpush3.bf16.msra.mxu0 %v9508_v50 }
 0x3b5   : > { %8413 = vmatpush3.bf16.msra.mxu1 %v9509_v46  ;;  %8392 = vmatprep.subr.bf16.mxu0 %v9510_v20 }
 0x3b6   : > { %8414 = vmatprep.subr.bf16.mxu1 %v9511_v34  ;;  %v1927_v34 = vld [vmem:[%s12415_s4] sm:$0x1f] }
 0x3b8   : > { %8393 = vmatpush3.bf16.msra.mxu0 %v9512_v41 }
 0x3b9   : > { %8415 = vmatpush3.bf16.msra.mxu1 %v9513_v49  ;;  %8394 = vmatprep.subr.bf16.mxu0 %v9514_v24  ;;  %v1948_v49 = vrot.slane %v1927_v34, %v10105_v23 }
 0x3ba   : > { %8416 = vmatprep.subr.bf16.mxu1 %v9515_v29 }
 0x3bc   : > { %8395 = vmatpush3.bf16.msra.mxu0 %v9516_v31 }
 0x3bd   : > { %8417 = vmatpush3.bf16.msra.mxu1 %v9517_v5  ;;  %8396 = vmatprep.subr.bf16.mxu0 %v9518_v36 }
 0x3be   : > { %8418 = vmatprep.subr.bf16.mxu1 %v9519_v37 }
 0x3c0   : > { %8397 = vmatpush3.bf16.msra.mxu0 %v9520_v38 }
 0x3c1   : > { %8419 = vmatpush3.bf16.msra.mxu1 %v9521_v32  ;;  %8398 = vmatprep.subr.bf16.mxu0 %v9522_v57 }
 0x3c2   : > { %8420 = vmatprep.subr.bf16.mxu1 %v9523_v59 }
 0x3c4   : > { %8399 = vmatpush3.bf16.msra.mxu0 %v9524_v45 }
 0x3c5   : > { %8421 = vmatpush3.bf16.msra.mxu1 %v9525_v15  ;;  %8428 = vmatprep.subr.bf16.mxu0 %v9526_v47 }
 0x3c6   : > { %8450 = vmatprep.subr.bf16.mxu1 %v9527_v4 }
 0x3c7   : > { %6131 = vmatmul.mubr.bf16.vlgmr.msra.gmra.mrb[12].mxu0 %v11017_v6  ;;  %v9534_v6 = vld [vmem:[%s12414_s3 + $0x10a0] ss:$20 sps:$4 sm:$0xff]  }
 0x3c8   : > { %6171 = vmatmul.mubr.bf16.vlgmr.msra.gmra.mrb[12].mxu1 %v11225_v39  ;;  %8429 = vmatpush3.bf16.msra.mxu0 %v9528_v63  ;;  %v9535_v39 = vld [vmem:[%s12414_s3 + $0x1320] ss:$20 sps:$4 sm:$0xff]  }
 0x3c9   : > { %6210 = vmatprep.mubr.bf16.mxu0 %v11234_v51  ;;  %8451 = vmatpush3.bf16.msra.mxu1 %v9529_v52  ;;  %v9536_v51 = vld [vmem:[%s12414_s3 + $0xf60] ss:$20 sps:$4 sm:$0xff]  }
 0x3ca   : > { %6250 = vmatprep.mubr.bf16.mxu1 %v11443_v40  ;;  %8430 = vmatprep.subr.bf16.mxu0 %v9530_v53  ;;  %v9538_v40 = vld [vmem:[%s12414_s3 + $0x10c8] ss:$20 sps:$4 sm:$0xff]  }
 0x3cb   : > { %8452 = vmatprep.subr.bf16.mxu1 %v9531_v55 }
 0x3cc   : > { %8431 = vmatpush3.bf16.msra.mxu0 %v9532_v56 }
 0x3cd   : > { %8453 = vmatpush3.bf16.msra.mxu1 %v9533_v58  ;;  %8432 = vmatprep.subr.bf16.mxu0 %v9534_v6 }
 0x3ce   : > { %8454 = vmatprep.subr.bf16.mxu1 %v9535_v39 }
 0x3d0   : > { %8433 = vmatpush3.bf16.msra.mxu0 %v9536_v51 }
 0x3d1   : > { %8455 = vmatpush3.bf16.msra.mxu1 %v9537_v35  ;;  %8434 = vmatprep.subr.bf16.mxu0 %v9538_v40 }
 0x3d2   : > { %8456 = vmatprep.subr.bf16.mxu1 %v9539_v60 }
 0x3d4   : > { %8435 = vmatpush3.bf16.msra.mxu0 %v9540_v61 }
 0x3d5   : > { %8457 = vmatpush3.bf16.msra.mxu1 %v9541_v25  ;;  %8436 = vmatprep.subr.bf16.mxu0 %v9542_v28 }
 0x3d6   : > { %8458 = vmatprep.subr.bf16.mxu1 %v9543_v62 }
 0x3d8   : > { %8437 = vmatpush3.bf16.msra.mxu0 %v9544_v33 }
 0x3d9   : > { %8459 = vmatpush3.bf16.msra.mxu1 %v9545_v19  ;;  %8438 = vmatprep.subr.bf16.mxu0 %v9546_v0 }
 0x3da   : > { %8460 = vmatprep.subr.bf16.mxu1 %v9547_v1  ;;  %v1932_v1 = vrot.slane %v1927_v34, %v10087_v17 }
 0x3dc   : > { %8439 = vmatpush3.bf16.msra.mxu0 %v9548_v27  ;;  %v1936_v27 = vrot.slane %v1927_v34, %v10090_v18 }
 0x3dd   : > { %8461 = vmatpush3.bf16.msra.mxu1 %v9549_v2  ;;  %8440 = vmatprep.subr.bf16.mxu0 %v9550_v3 }
 0x3de   : > { %8462 = vmatprep.subr.bf16.mxu1 %v9551_v16  ;;  %v1940_v16 = vrot.slane %v1927_v34, %v10099_v21 }
 0x3e0   : > { %8441 = vmatpush3.bf16.msra.mxu0 %v9552_v7 }
 0x3e1   : > { %8463 = vmatpush3.bf16.msra.mxu1 %v9553_v8  ;;  %8442 = vmatprep.subr.bf16.mxu0 %v9554_v11 }
 0x3e2   : > { %8464 = vmatprep.subr.bf16.mxu1 %v9555_v12  ;;  %v1944_v12 = vrot.slane %v1927_v34, %v10102_v22 }
 0x3e4   : > { %8443 = vmatpush3.bf16.msra.mxu0 %v9556_v14 }
 0x3e5   : > { %8465 = vmatpush3.bf16.msra.mxu1 %v9557_v13 }
 0x3e7   : > { %6211 = vmatmul.mubr.bf16.vlgmr.msra.gmra.mrb[16].mxu0 %v11434_v30 }
 0x3e8   : > { %6251 = vmatmul.mubr.bf16.vlgmr.msra.gmra.mrb[16].mxu1 %v11636_v54 }
 0x43a   : > { %v5603_v43 = vpop.f32.mrb[0].mxu0 }
 0x43b   : > { %v5931_v48 = vpop.f32.mrb[0].mxu1  ;;  %v5605_v42 = vpop.f32.mrb[1].mxu0  ;;  %v8577_v2 = vadd.f32 %v5603_v43, %v1932_v1  ;;  %v9566_v1 = vld [vmem:[%s12418_s7 + $0x88] sm:$0xff]  }
 0x43c   : > { %v5933_v10 = vpop.f32.mrb[1].mxu1  ;;  %v5607_v26 = vpop.f32.mrb[2].mxu0  ;;  %v8578_v3 = vadd.f32 %v5605_v42, %v1936_v27  ;;  %v8579_v11 = vadd.f32 %v5931_v48, %v1940_v16  ;;  %v9565_v27 = vld [vmem:[%s12418_s7 + $0x50] sm:$0xff]  }
 0x43d   : > { %v5935_v50 = vpop.f32.mrb[2].mxu1  ;;  %v5608_v46 = vpop.f32.mrb[3].mxu0  ;;  %v6260_v7 = vsel %vm545_vm1, %v8577_v2, 0.0  ;;  %v9570_v16 = vld [vmem:[%s12418_s7 + $0x90] sm:$0xff]  }
 0x43e   : > { %v5936_v20 = vpop.f32.mrb[3].mxu1  ;;  %v6261_v8 = vsel %vm545_vm1, %v8578_v3, 0.0  ;;  %v6263_v46 = vsel %vm545_vm1, %v8579_v11, 0.0 }
 0x43f   : > { %v6262_v14 = vadd.f32 %v6261_v8, %v6260_v7  ;;  %v8580_v20 = vadd.f32 %v5933_v10, %v1944_v12  ;;  %v9569_v7 = vld [vmem:[%s12418_s7 + $0x58] sm:$0xff]  }
 0x440   : > { %v9572_v8 = vld [vmem:[%s12418_s7 + $0xd8] sm:$0xff]  }
 0x441   : > { %v6265_v48 = vsel %vm545_vm1, %v8580_v20, 0.0  ;;  %v9574_v12 = vld [vmem:[%s12418_s7 + $0x98] sm:$0xff]  }
 0x45a   : > { %v8312_v41 = vpop.f32.mrb[4].mxu0 }
 0x45b   : > { %v8334_v24 = vpop.f32.mrb[4].mxu1  ;;  %v8313_v29 = vpop.f32.mrb[5].mxu0 }
 0x45c   : > { %v8314_v30 = vadd.f32 %v8313_v29, %v8312_v41  ;;  %v8335_v31 = vpop.f32.mrb[5].mxu1  ;;  %v8315_v54 = vpop.f32.mrb[6].mxu0 }
 0x45d   : > { %v8336_v5 = vadd.f32 %v8335_v31, %v8334_v24  ;;  %v8337_v36 = vpop.f32.mrb[6].mxu1  ;;  %v8316_v37 = vpop.f32.mrb[7].mxu0 }
 0x45e   : > { %v5973_v38 = vadd.f32 %v8314_v30, %v1948_v49  ;;  %v8338_v32 = vpop.f32.mrb[7].mxu1  ;;  %v6264_v30 = vadd.f32 %v6263_v46, %v6262_v14  ;;  %v9573_v14 = vld [vmem:[%s12418_s7 + $0x60] sm:$0xff]   ;;  %v9577_v46 = vld [vmem:[%s12418_s7 + $0x68] sm:$0xff]  }
 0x460   : > { %v6013_v57 = vadd.f32 %v8336_v5, %v5973_v38  ;;  %v6266_v5 = vadd.f32 %v6265_v48, %v6264_v30  ;;  %v9585_v30 = vld [vmem:[%s12418_s7 + $0x78] sm:$0xff]  }
 0x461   : > { %v9589_v48 = vld [vmem:[%s12418_s7 + $0xb8] sm:$0xff]  }
 0x47a   : > { %v8356_v59 = vpop.f32.mrb[8].mxu0 }
 0x47b   : > { %v8378_v45 = vpop.f32.mrb[8].mxu1  ;;  %v8357_v15 = vpop.f32.mrb[9].mxu0 }
 0x47c   : > { %v8358_v47 = vadd.f32 %v8357_v15, %v8356_v59  ;;  %v8379_v4 = vpop.f32.mrb[9].mxu1  ;;  %v8359_v63 = vpop.f32.mrb[10].mxu0 }
 0x47d   : > { %v8380_v52 = vadd.f32 %v8379_v4, %v8378_v45  ;;  %v8381_v53 = vpop.f32.mrb[10].mxu1  ;;  %v8360_v55 = vpop.f32.mrb[11].mxu0 }
 0x47e   : > { %v6053_v56 = vadd.f32 %v8358_v47, %v6013_v57  ;;  %v8382_v58 = vpop.f32.mrb[11].mxu1 }
 0x480   : > { %v6093_v6 = vadd.f32 %v8380_v52, %v6053_v56 }
 0x49a   : > { %v8400_v39 = vpop.f32.mrb[12].mxu0 }
 0x49b   : > { %v8422_v51 = vpop.f32.mrb[12].mxu1  ;;  %v8401_v35 = vpop.f32.mrb[13].mxu0 }
 0x49c   : > { %v8402_v40 = vadd.f32 %v8401_v35, %v8400_v39  ;;  %v8423_v60 = vpop.f32.mrb[13].mxu1  ;;  %v8403_v61 = vpop.f32.mrb[14].mxu0 }
 0x49d   : > { %v8424_v25 = vadd.f32 %v8423_v60, %v8422_v51  ;;  %v8425_v28 = vpop.f32.mrb[14].mxu1  ;;  %v8404_v62 = vpop.f32.mrb[15].mxu0  ;;  %v9558_v61 = vld [vmem:[%s12418_s7 + $0x40] sm:$0xff]  }
 0x49e   : > { %v6133_v33 = vadd.f32 %v8402_v40, %v6093_v6  ;;  %v8426_v19 = vpop.f32.mrb[15].mxu1  ;;  %v9560_v28 = vld [vmem:[%s12418_s7 + $0xc0] sm:$0xff]   ;;  %v9561_v62 = vld [vmem:[%s12418_s7 + $0x48] sm:$0xff]   ;;  %8472 = vmatprep.subr.bf16.mxu0 %v9558_v61 }
 0x49f   : > { %8494 = vmatprep.subr.bf16.mxu1 %v9560_v28  ;;  %v9564_v19 = vld [vmem:[%s12418_s7 + $0xc8] sm:$0xff]  }
 0x4a0   : > { %v6173_v0 = vadd.f32 %v8424_v25, %v6133_v33  ;;  %v9559_v25 = vld [vmem:[%s12418_s7] sm:$0xff]  }
 0x4a1   : > { %v9562_v33 = vld [vmem:[%s12418_s7 + $0x80] sm:$0xff]   ;;  %8473 = vmatpush3.bf16.msra.mxu0 %v9559_v25 }
 0x4a2   : > { %8495 = vmatpush3.bf16.msra.mxu1 %v9562_v33  ;;  %8474 = vmatprep.subr.bf16.mxu0 %v9561_v62 }
 0x4a3   : > { %8496 = vmatprep.subr.bf16.mxu1 %v9564_v19  ;;  %v6366_v19 = vld [vmem:[#allocation3 + $0x8] sm:$0x3] }
 0x4a6   : > { %8497 = vmatpush3.bf16.msra.mxu1 %v9566_v1 }
 0x4ba   : > { %v8444_v13 = vpop.f32.mrb[16].mxu0 }
 0x4bb   : > { %v8466_v26 = vpop.f32.mrb[16].mxu1  ;;  %v8445_v50 = vpop.f32.mrb[17].mxu0 }
 0x4bc   : > { %v8446_v41 = vadd.f32 %v8445_v50, %v8444_v13  ;;  %v8467_v49 = vpop.f32.mrb[17].mxu1  ;;  %v8447_v43 = vpop.f32.mrb[18].mxu0  ;;  %v9576_v13 = vld [vmem:[%s12418_s7 + $0xe0] sm:$0xff]  }
 0x4bd   : > { %v8468_v42 = vadd.f32 %v8467_v49, %v8466_v26  ;;  %v8469_v24 = vpop.f32.mrb[18].mxu1  ;;  %v8448_v29 = vpop.f32.mrb[19].mxu0  ;;  %v9575_v26 = vld [vmem:[%s12418_s7 + $0x20] sm:$0xff]   ;;  %v9582_v49 = vld [vmem:[%s12418_s7 + $0xa8] sm:$0xff]   ;;  %v9581_v43 = vld [vmem:[%s12418_s7 + $0x70] sm:$0xff]  }
 0x4be   : > { %v6213_v31 = vadd.f32 %v8446_v41, %v6173_v0  ;;  %v8470_v54 = vpop.f32.mrb[19].mxu1  ;;  %v9563_v0 = vld [vmem:[%s12418_s7 + $0x8] sm:$0xff]   ;;  %v9578_v50 = vld [vmem:[%s12418_s7 + $0xa0] sm:$0xff]   ;;  %v9583_v24 = vld [vmem:[%s12418_s7 + $0x30] sm:$0xff]  }
 0x4bf   : > { %8475 = vmatpush3.bf16.msra.mxu0 %v9563_v0  ;;  %v9579_v41 = vld [vmem:[%s12418_s7 + $0x28] sm:$0xff]   ;;  %v9586_v29 = vld [vmem:[%s12418_s7 + $0xb0] sm:$0xff]   ;;  %v9587_v54 = vld [vmem:[%s12418_s7 + $0x38] sm:$0xff]  }
 0x4c0   : > { %v6253_v34 = vadd.f32 %v8468_v42, %v6213_v31  ;;  %8476 = vmatprep.subr.bf16.mxu0 %v9565_v27  ;;  %v9584_v42 = vld [vmem:[%s12418_s7 + $0xf0] sm:$0xff]   ;;  %v9588_v31 = vld [vmem:[%s12418_s7 + $0xf8] sm:$0xff]  }
 0x4c2   : > { %v6268_v36 = vsel %vm6267_vm10, %v6253_v34, 0.0 }
 0x4c3   : > { %v6269_v37 = vadd.f32 %v6268_v36, %v6266_v5 }
 0x4c5   : > { %6270 = vadd.xlane.f32.xlu1 %v6269_v37  ;;  %v6258_v37 = vld [vmem:[%s12416_s5] sm:$0x1f] }
 0x552   : > { %v6271_v38 = vpop.xlane.xlu1 %6270 }
 0x553   : > { %v6273_v10 = vmul.f32 0.0017361111, %v6271_v38  ;;  %v6259_v38 = vld [vmem:[%s12417_s6] sm:$0x1f] }
 0x554   : > { %v6354_v61 = vrot.slane %v6259_v38, %v10105_v23 }
 0x555   : > { %v12044_v32 = vsub.f32 %v8577_v2, %v6273_v10  ;;  %v12046_v57 = vsub.f32 %v8578_v3, %v6273_v10  ;;  %v12048_v59 = vsub.f32 %v8579_v11, %v6273_v10  ;;  %v12050_v45 = vsub.f32 %v8580_v20, %v6273_v10  ;;  %v9568_v2 = vld [vmem:[%s12418_s7 + $0xd0] sm:$0xff]   ;;  %v9571_v11 = vld [vmem:[%s12418_s7 + $0x18] sm:$0xff]   ;;  %v9580_v20 = vld [vmem:[%s12418_s7 + $0xe8] sm:$0xff]  }
 0x556   : > { %v12052_v15 = vsub.f32 %v6253_v34, %v6273_v10  ;;  %v9567_v3 = vld [vmem:[%s12418_s7 + $0x10] sm:$0xff]   ;;  %8498 = vmatprep.subr.bf16.mxu1 %v9568_v2  ;;  %v6307_v10 = vrot.slane %v6258_v37, %v10087_v17 }
 0x557   : > { %v6279_v47 = vmul.f32 %v12044_v32, %v12044_v32  ;;  %v6280_v4 = vmul.f32 %v12046_v57, %v12046_v57  ;;  %v6281_v63 = vmul.f32 %v12048_v59, %v12048_v59  ;;  %v6282_v52 = vmul.f32 %v12050_v45, %v12050_v45  ;;  %8477 = vmatpush3.bf16.msra.mxu0 %v9567_v3  ;;  %v6365_v3 = vld [vmem:[#allocation3] sm:$0xff] }
 0x558   : > { %v6283_v58 = vmul.f32 %v12052_v15, %v12052_v15  ;;  %8499 = vmatpush3.bf16.msra.mxu1 %v9570_v16  ;;  %8478 = vmatprep.subr.bf16.mxu0 %v9569_v7  ;;  %v6368_v16 = vmul.f32 0.5, %v6366_v19 }
 0x559   : > { %v6284_v53 = vsel %vm545_vm1, %v6279_v47, 0.0  ;;  %v6285_v55 = vsel %vm545_vm1, %v6280_v4, 0.0  ;;  %v6287_v6 = vsel %vm545_vm1, %v6281_v63, 0.0  ;;  %v6289_v51 = vsel %vm545_vm1, %v6282_v52, 0.0  ;;  %8500 = vmatprep.subr.bf16.mxu1 %v9572_v8 }
 0x55a   : > { %v6286_v56 = vadd.f32 %v6285_v55, %v6284_v53  ;;  %v6291_v40 = vsel %vm6267_vm10, %v6283_v58, 0.0  ;;  %v6311_v47 = vrot.slane %v6258_v37, %v10090_v18  ;;  %v6315_v4 = vrot.slane %v6258_v37, %v10099_v21 }
 0x55b   : > { %8479 = vmatpush3.bf16.msra.mxu0 %v9571_v11  ;;  %v6319_v63 = vrot.slane %v6258_v37, %v10102_v22  ;;  %v6338_v52 = vrot.slane %v6259_v38, %v10087_v17  ;;  %v6342_v55 = vrot.slane %v6259_v38, %v10090_v18  ;;  %v6350_v58 = vrot.slane %v6259_v38, %v10102_v22 }
 0x55c   : > { %v6288_v39 = vadd.f32 %v6287_v6, %v6286_v56  ;;  %8501 = vmatpush3.bf16.msra.mxu1 %v9574_v12  ;;  %8480 = vmatprep.subr.bf16.mxu0 %v9573_v14  ;;  %v6346_v56 = vrot.slane %v6259_v38, %v10099_v21  ;;  %v6323_v6 = vrot.slane %v6258_v37, %v10105_v23 }
 0x55d   : > { %8502 = vmatprep.subr.bf16.mxu1 %v9576_v13 }
 0x55e   : > { %v6290_v35 = vadd.f32 %v6289_v51, %v6288_v39 }
 0x55f   : > { %8481 = vmatpush3.bf16.msra.mxu0 %v9575_v26 }
 0x560   : > { %v6292_v60 = vadd.f32 %v6291_v40, %v6290_v35  ;;  %8503 = vmatpush3.bf16.msra.mxu1 %v9578_v50  ;;  %8482 = vmatprep.subr.bf16.mxu0 %v9577_v46 }
 0x561   : > { %8504 = vmatprep.subr.bf16.mxu1 %v9580_v20 }
 0x562   : > { %6293 = vadd.xlane.f32.xlu1 %v6292_v60 }
 0x563   : > { %8483 = vmatpush3.bf16.msra.mxu0 %v9579_v41 }
 0x564   : > { %8505 = vmatpush3.bf16.msra.mxu1 %v9582_v49  ;;  %8484 = vmatprep.subr.bf16.mxu0 %v9581_v43 }
 0x565   : > { %8506 = vmatprep.subr.bf16.mxu1 %v9584_v42 }
 0x567   : > { %8485 = vmatpush3.bf16.msra.mxu0 %v9583_v24  ;;  %v9590_v24 = vld [vmem:[%s12418_s7 + $0x100] sm:$0xff]  }
 0x568   : > { %8507 = vmatpush3.bf16.msra.mxu1 %v9586_v29  ;;  %8486 = vmatprep.subr.bf16.mxu0 %v9585_v30 }
 0x569   : > { %8508 = vmatprep.subr.bf16.mxu1 %v9588_v31 }
 0x56b   : > { %8487 = vmatpush3.bf16.msra.mxu0 %v9587_v54 }
 0x56c   : > { %8565 = vmatprep.subr.bf16.mxu0 %v9701_v44  ;;  %8509 = vmatpush3.bf16.msra.mxu1 %v9589_v48  ;;  %v9591_v48 = vld [vmem:[%s12418_s7 + $0x108] sm:$0xff]  }
 0x5ef   : > { %v6294_v34 = vpop.xlane.xlu1 %6293 }
 0x5f0   : > { %v6295_v5 = vmul.f32 0.0017361111, %v6294_v34  ;;  %v9592_v34 = vld [vmem:[%s12418_s7 + $0x110] sm:$0xff]  }
 0x5f2   : > { %v6296_v36 = vadd.f32 1e-05, %v6295_v5  ;;  %v9593_v5 = vld [vmem:[%s12418_s7 + $0x118] sm:$0xff]  }
 0x5f4   : > { %9652 = vrsqrt.f32 %v6296_v36 }
 0x5fe   : > { %v9653_v53 = vpop.eup %9652 }
 0x5ff   : > { %v6298_v39 = vmul.f32 %v9653_v53, %v12044_v32  ;;  %v6299_v51 = vmul.f32 %v9653_v53, %v12046_v57  ;;  %v6300_v35 = vmul.f32 %v9653_v53, %v12048_v59  ;;  %v6301_v40 = vmul.f32 %v9653_v53, %v12050_v45 }
 0x600   : > { %v6302_v60 = vmul.f32 %v9653_v53, %v12052_v15  ;;  %v6367_v15 = vmul.f32 0.5, %v6365_v3  ;;  %v9597_v3 = vld [vmem:[%s12422_s11 + $0x8] ss:$16 sps:$4 sm:$0xff]  }
 0x601   : > { %v6329_v25 = vmul.f32 %v6307_v10, %v6298_v39  ;;  %v6330_v28 = vmul.f32 %v6311_v47, %v6299_v51  ;;  %v6331_v62 = vmul.f32 %v6315_v4, %v6300_v35  ;;  %v6332_v33 = vmul.f32 %v6319_v63, %v6301_v40  ;;  %v8199_v10 = vld [vmem:[%s12419_s8] ss:$0 sm:$0xff] }
 0x602   : > { %v6333_v0 = vmul.f32 %v6323_v6, %v6302_v60 }
 0x603   : > { %v6360_v1 = vadd.f32 %v6338_v52, %v6329_v25  ;;  %v6361_v27 = vadd.f32 %v6342_v55, %v6330_v28  ;;  %v6362_v2 = vadd.f32 %v6346_v56, %v6331_v62  ;;  %v6363_v32 = vadd.f32 %v6350_v58, %v6332_v33 }
 0x604   : > { %v6364_v57 = vadd.f32 %v6354_v61, %v6333_v0 }
 0x605   : > { %v6374_v59 = vcombine.low %v6360_v1, %v6361_v27  ;;  %v6375_v7 = vcombine.low %v6362_v2, %v6363_v32  ;;  %v9596_v27 = vld [vmem:[%s12422_s11 + $0x4] ss:$16 sps:$4 sm:$0xff]   ;;  %v9599_v2 = vld [vmem:[%s12422_s11 + $0xc] ss:$16 sps:$4 sm:$0xff]   ;;  %v9594_v32 = vld [vmem:[%s12422_s11] ss:$16 sps:$4 sm:$0xff]  }
 0x606   : > { %v6397_v45 = vrot.slane %v6364_v57, %v9800_v9  ;;  %7030 = vmatprep.subr.bf16.mxu1 %v9596_v27  ;;  %v9600_v57 = vld [vmem:[%s12422_s11 + $0x20] ss:$16 sps:$4 sm:$0xff]  }
 0x607   : > { %v6382_v23 = vrot.slane %v6374_v59, %v9800_v9  ;;  %v6389_v8 = vrot.slane %v6375_v7, %v9800_v9  ;;  %v9603_v59 = vld [vmem:[%s12422_s11 + $0x28] ss:$16 sps:$4 sm:$0xff]   ;;  %v9605_v7 = vld [vmem:[%s12422_s11 + $0x2c] ss:$16 sps:$4 sm:$0xff]   ;;  %v9643_v27 = vld [vmem:[%s12424_s13 + $0x30] sm:$0xff]  }
 0x608   : > { %v6401_v11 = vadd.f32 %v6397_v45, %v6368_v16  ;;  %v9602_v16 = vld [vmem:[%s12422_s11 + $0x24] ss:$16 sps:$4 sm:$0xff]  }
 0x609   : > { %v6390_v12 = vcombine.low %v6382_v23, %v6389_v8  ;;  %v9608_v45 = vld [vmem:[%s12422_s11 + $0x44] ss:$16 sps:$4 sm:$0xff]   ;;  %v9606_v23 = vld [vmem:[%s12422_s11 + $0x40] ss:$16 sps:$4 sm:$0xff]   ;;  %v9609_v8 = vld [vmem:[%s12422_s11 + $0x48] ss:$16 sps:$4 sm:$0xff]  }
 0x60a   : > { %vm6403_vm11 = vcmp.ge.f32.partialorder %v6401_v11, 1.0 }
 0x60b   : > { %v6400_v14 = vadd.f32 %v6390_v12, %v6367_v15  ;;  %v8198_v13 = vsel %vm6403_vm11, 1.0, %v9701_v44  ;;  %v9611_v15 = vld [vmem:[%s12422_s11 + $0x4c] ss:$16 sps:$4 sm:$0xff]  }
 0x60c   : > { %vm6409_vm12 = vcmp.gt.f32.partialorder %v8198_v13, 0.0  ;;  %v6439_v36 = vrot.slane %v8198_v13, %v9800_v9  ;;  %v9617_v12 = vld [vmem:[%s12422_s11 + $0x6c] ss:$16 sps:$4 sm:$0xff]   ;;  %v9612_v13 = vld [vmem:[%s12422_s11 + $0x60] ss:$16 sps:$4 sm:$0xff]  }
 0x60d   : > { %vm6402_vm13 = vcmp.ge.f32.partialorder %v6400_v14, 1.0  ;;  %v6411_v26 = vsel %vm6409_vm12, 0.0, %v6401_v11  ;;  %v9614_v11 = vld [vmem:[%s12422_s11 + $0x64] ss:$16 sps:$4 sm:$0xff]  }
 0x60e   : > { %v8197_v50 = vsel %vm6402_vm13, 1.0, %v9701_v44  ;;  %6413 = vst.msk [vmem:[#allocation3 + $0x8] sm:$0x3] %vm6267_vm10, %v6411_v26  ;;  %v6449_v37 = vpack.c.bf16 %v6439_v36, %v6439_v36  ;;  %v9615_v26 = vld [vmem:[%s12422_s11 + $0x68] ss:$16 sps:$4 sm:$0xff]   ;;  %v9619_v36 = vld [vmem:[%s12424_s13] sm:$0xff]  }
 0x60f   : > { %vm6408_vm14 = vcmp.gt.f32.partialorder %v8197_v50, 0.0  ;;  %v6423_v46 = vrot.slane %v8197_v50, %v9800_v9  ;;  %v6416_v20 = vcombine.high %v8197_v50, %v8197_v50  ;;  %v9618_v50 = vld [vmem:[%s12424_s13 + $0x40] sm:$0xff]  }
 0x610   : > { %v6410_v41 = vsel %vm6408_vm14, 0.0, %v6400_v14  ;;  %v9703_v14 = vmov 0  }
 0x611   : > { %6412 = vst [vmem:[#allocation3] sm:$0xff] %v6410_v41  ;;  %v6431_v49 = vcombine.high %v6423_v46, %v6423_v46  ;;  %v6430_v43 = vrot.slane %v6416_v20, %v9800_v9  ;;  %v6445_v30 = vpack.c.bf16 %v6423_v46, %v6423_v46  ;;  %v9620_v46 = vld [vmem:[%s12424_s13 + $0xc0] sm:$0xff]  }
 0x613   : > { %v6446_v42 = vpack.c.bf16 %v6431_v49, %v6431_v49  ;;  %v6432_v29 = vcombine.high %v6430_v43, %v6430_v43  ;;  %v6447_v54 = vpack.c.bf16 %v6430_v43, %v6430_v43 }
 0x615   : > { %6781 = vmatprep.mubr.bf16.mxu0 %v6446_v42  ;;  %v6448_v31 = vpack.c.bf16 %v6432_v29, %v6432_v29  ;;  %v8237_v42 = vld [vmem:[%s12420_s9] ss:$0 sm:$0xff] }
 0x616   : > { %6782 = vmatmul.mubr.bf16.vlgmr.msra.gmra.mrb[20].mxu0 %v6445_v30  ;;  %v8238_v30 = vld [vmem:[%s12421_s10] ss:$0 sm:$0xff] }
 0x617   : > { %8566 = vmatpush3.bf16.msra.mxu0 %v9590_v24  ;;  %6821 = vmatprep.mubr.bf16.mxu1 %v6448_v31  ;;  %v6899_v24 = vld [vmem:[#allocation4] sm:$0x3] }
 0x618   : > { %6822 = vmatmul.mubr.bf16.vlgmr.msra.gmra.mrb[20].mxu1 %v6447_v54  ;;  %8567 = vmatprep.subr.bf16.mxu0 %v9701_v44  ;;  %v6900_v54 = vmul.f32 0.5, %v6899_v24 }
 0x619   : > { %8573 = vmatprep.mubr.msk.bf16.mxu0 %vm9702_vm15, %v9701_v44  ;;  %7031 = vmatpush1.bf16.msra.mxu1 %v9594_v32  ;;  %v9645_v32 = vld [vmem:[%s12424_s13 + $0xb0] sm:$0xff]  }
 0x61a   : > { %7032 = vmatprep.subr.bf16.mxu1 %v9602_v16  ;;  %7062 = vmatprep.mubr.bf16.mxu1 %v9703_v14  ;;  %v9649_v16 = vld [vmem:[%s12424_s13 + $0xb8] sm:$0xff]  }
 0x61b   : > { %8568 = vmatpush3.bf16.msra.mxu0 %v9591_v48 }
 0x61c   : > { %8569 = vmatprep.subr.bf16.mxu0 %v9701_v44 }
 0x61d   : > { %7033 = vmatpush1.bf16.msra.mxu1 %v9600_v57  ;;  %v9647_v57 = vld [vmem:[%s12424_s13 + $0x38] sm:$0xff]  }
 0x61e   : > { %7034 = vmatprep.subr.bf16.mxu1 %v9608_v45 }
 0x61f   : > { %8570 = vmatpush3.bf16.msra.mxu0 %v9592_v34 }
 0x620   : > { %8571 = vmatprep.subr.bf16.mxu0 %v9701_v44 }
 0x621   : > { %7035 = vmatpush1.bf16.msra.mxu1 %v9606_v23 }
 0x622   : > { %7036 = vmatprep.subr.bf16.mxu1 %v9614_v11 }
 0x623   : > { %8572 = vmatpush3.bf16.msra.mxu0 %v9593_v5 }
 0x624   : > { %7071 = vmatprep.subr.bf16.mxu0 %v9599_v2  ;;  %v9646_v2 = vld [vmem:[%s12424_s13 + $0x78] sm:$0xff]  }
 0x625   : > { %7037 = vmatpush1.bf16.msra.mxu1 %v9612_v13 }
 0x626   : > { %8574 = vmatmul.mubr.msk.bf16.vlgmr.msra.gmra.mrb[24].mxu0 %vm6745_vm0, %v6449_v37  ;;  %8521 = vmatprep.subr.bf16.mxu1 %v9618_v50  ;;  %v9621_v37 = vld [vmem:[%s12424_s13 + $0x80] sm:$0xff]  }
 0x627   : > { %7072 = vmatpush1.bf16.msra.mxu0 %v9597_v3  ;;  %7103 = vmatprep.mubr.bf16.mxu0 %v9703_v14  ;;  %v9648_v3 = vld [vmem:[%s12424_s13 + $0xf8] sm:$0xff]  }
 0x628   : > { %7073 = vmatprep.subr.bf16.mxu0 %v9605_v7 }
 0x62b   : > { %7074 = vmatpush1.bf16.msra.mxu0 %v9603_v59  ;;  %v6925_v59 = vld [vmem:[%s12423_s12] sm:$0xf] }
 0x62c   : > { %7075 = vmatprep.subr.bf16.mxu0 %v9611_v15  ;;  %v6930_v7 = vrot.slane %v6925_v59, %v10087_v17  ;;  %v6938_v45 = vrot.slane %v6925_v59, %v10099_v21  ;;  %v6934_v15 = vrot.slane %v6925_v59, %v10090_v18  ;;  %v6942_v23 = vrot.slane %v6925_v59, %v10102_v22 }
 0x62f   : > { %7076 = vmatpush1.bf16.msra.mxu0 %v9609_v8 }
 0x630   : > { %7077 = vmatprep.subr.bf16.mxu0 %v9617_v12 }
 0x633   : > { %7078 = vmatpush1.bf16.msra.mxu0 %v9615_v26 }
 0x634   : > { %8543 = vmatprep.subr.bf16.mxu0 %v9620_v46 }
 0x6e9   : > { %v8488_v38 = vpop.f32.mrb[20].mxu0 }
 0x6ea   : > { %v8489_v47 = vpop.f32.mrb[21].mxu0 }
 0x6eb   : > { %v8490_v4 = vadd.f32 %v8489_v47, %v8488_v38  ;;  %v8491_v63 = vpop.f32.mrb[22].mxu0  ;;  %v8510_v52 = vpop.f32.mrb[20].mxu1  ;;  %v9624_v47 = vld [vmem:[%s12424_s13 + $0xc8] sm:$0xff]  }
 0x6ec   : > { %v8492_v53 = vpop.f32.mrb[23].mxu0  ;;  %v8511_v55 = vpop.f32.mrb[21].mxu1  ;;  %v9623_v63 = vld [vmem:[%s12424_s13 + $0x8] sm:$0xff]  }
 0x6ed   : > { %v6784_v56 = vadd.f32 %v8490_v4, %v8199_v10  ;;  %v8512_v58 = vadd.f32 %v8511_v55, %v8510_v52  ;;  %v8513_v6 = vpop.f32.mrb[22].mxu1  ;;  %v9622_v10 = vld [vmem:[%s12424_s13 + $0x48] sm:$0xff]   ;;  %v9626_v53 = vld [vmem:[%s12424_s13 + $0x50] sm:$0xff]  }
 0x6ee   : > { %v8514_v39 = vpop.f32.mrb[23].mxu1  ;;  %v9625_v52 = vld [vmem:[%s12424_s13 + $0x88] sm:$0xff]   ;;  %v9628_v55 = vld [vmem:[%s12424_s13 + $0xd0] sm:$0xff]   ;;  %v9630_v6 = vld [vmem:[%s12424_s13 + $0x58] sm:$0xff]  }
 0x6ef   : > { %v6824_v51 = vadd.f32 %v8512_v58, %v6784_v56  ;;  %v9627_v56 = vld [vmem:[%s12424_s13 + $0x10] sm:$0xff]   ;;  %v9631_v39 = vld [vmem:[%s12424_s13 + $0x18] sm:$0xff]  }
 0x6f0   : > { %v9629_v58 = vld [vmem:[%s12424_s13 + $0x90] sm:$0xff]  }
 0x6f9   : > { %v6863_v35 = vpop.f32.mrb[24].mxu0 }
 0x6fa   : > { %v6864_v40 = vadd.f32 %v6863_v35, %v6824_v51  ;;  %v8575_v60 = vpop.f32.mrb[25].mxu0  ;;  %v9632_v51 = vld [vmem:[%s12424_s13 + $0xd8] sm:$0xff]  }
 0x6fb   : > { %v6866_v61 = vpop.f32.mrb[26].mxu0  ;;  %v9633_v35 = vld [vmem:[%s12424_s13 + $0x98] sm:$0xff]   ;;  %v9635_v60 = vld [vmem:[%s12424_s13 + $0x20] sm:$0xff]  }
 0x6fc   : > { %v8576_v25 = vpop.f32.mrb[27].mxu0  ;;  %v6871_v28 = vsel %vm6267_vm10, %v6864_v40, 0.0  ;;  %v9636_v61 = vld [vmem:[%s12424_s13 + $0xe0] sm:$0xff]  }
 0x6fd   : > { %6872 = vadd.xlane.f32.xlu0 %v6871_v28  ;;  %v9637_v25 = vld [vmem:[%s12424_s13 + $0xa0] sm:$0xff]   ;;  %v9638_v28 = vld [vmem:[%s12424_s13 + $0x68] sm:$0xff]  }
 0x78a   : > { %v6873_v62 = vpop.xlane.xlu0 %6872 }
 0x78b   : > { %v6875_v33 = vmul.f32 0.015625, %v6873_v62  ;;  %v9640_v62 = vld [vmem:[%s12424_s13 + $0xe8] sm:$0xff]  }
 0x78d   : > { %v6876_v19 = vsub.f32 %v6864_v40, %v6875_v33  ;;  %v9634_v40 = vld [vmem:[%s12424_s13 + $0x60] sm:$0xff]   ;;  %v9639_v33 = vld [vmem:[%s12424_s13 + $0x28] sm:$0xff]  }
 0x78f   : > { %v6877_v0 = vmul.f32 %v6876_v19, %v6876_v19 }
 0x791   : > { %v6878_v1 = vsel %vm6267_vm10, %v6877_v0, 0.0  ;;  %v9641_v0 = vld [vmem:[%s12424_s13 + $0xa8] sm:$0xff]  }
 0x792   : > { %6879 = vadd.xlane.f32.xlu1 %v6878_v1  ;;  %v9644_v1 = vld [vmem:[%s12424_s13 + $0xf0] sm:$0xff]  }
 0x81f   : > { %v6880_v20 = vpop.xlane.xlu1 %6879 }
 0x820   : > { %v6881_v41 = vmul.f32 0.015625, %v6880_v20 }
 0x822   : > { %v6882_v49 = vadd.f32 1e-05, %v6881_v41 }
 0x824   : > { %9654 = vrsqrt.f32 %v6882_v49  ;;  %v7112_v49 = vld [vmem:[#allocation5] sm:$0xff] }
 0x825   : > { %v7113_v18 = vmul.f32 0.5, %v7112_v49 }
 0x82e   : > { %v9655_v43 = vpop.eup %9654 }
 0x82f   : > { %v6884_v29 = vmul.f32 %v9655_v43, %v6876_v19  ;;  %v9642_v19 = vld [vmem:[%s12424_s13 + $0x70] sm:$0xff]  }
 0x831   : > { %v6891_v31 = vmul.f32 %v8237_v42, %v6884_v29 }
 0x833   : > { %v6898_v48 = vadd.f32 %v8238_v30, %v6891_v31 }
 0x835   : > { %v6901_v34 = vadd.f32 %v6900_v54, %v6898_v48 }
 0x837   : > { %vm6902_vm1 = vcmp.ge.f32.partialorder %v6901_v34, 1.0 }
 0x838   : > { %v8239_v5 = vsel %vm6902_vm1, 1.0, %v9701_v44 }
 0x839   : > { %vm6905_vm2 = vcmp.gt.f32.partialorder %v8239_v5, 0.0  ;;  %v6908_v38 = vpack.c.bf16 %v8239_v5, %v8239_v5 }
 0x83a   : > { %v6906_v4 = vsel %vm6905_vm2, 0.0, %v6901_v34 }
 0x83b   : > { %6907 = vst.msk [vmem:[#allocation4] sm:$0x3] %vm6267_vm10, %v6906_v4  ;;  %8256 = vmatmul.mubr.msk.bf16.vlgmr.msra.gmra.mrb[24].mxu1 %vm6745_vm0, %v6908_v38  ;;  %8257 = vmatmul.mubr.msk.bf16.vlgmr.msra.gmra.mrb[28].mxu0 %vm6745_vm0, %v6908_v38 }
 0x83c   : > { %8522 = vmatpush3.bf16.msra.mxu1 %v9619_v36  ;;  %8544 = vmatpush3.bf16.msra.mxu0 %v9621_v37 }
 0x83d   : > { %8523 = vmatprep.subr.bf16.mxu1 %v9622_v10  ;;  %8545 = vmatprep.subr.bf16.mxu0 %v9624_v47 }
 0x840   : > { %8524 = vmatpush3.bf16.msra.mxu1 %v9623_v63  ;;  %8546 = vmatpush3.bf16.msra.mxu0 %v9625_v52 }
 0x841   : > { %8525 = vmatprep.subr.bf16.mxu1 %v9626_v53  ;;  %8547 = vmatprep.subr.bf16.mxu0 %v9628_v55 }
 0x844   : > { %8526 = vmatpush3.bf16.msra.mxu1 %v9627_v56  ;;  %8548 = vmatpush3.bf16.msra.mxu0 %v9629_v58 }
 0x845   : > { %8527 = vmatprep.subr.bf16.mxu1 %v9630_v6  ;;  %8549 = vmatprep.subr.bf16.mxu0 %v9632_v51  ;;  %v7505_v51 = vld [vmem:[#allocation6] sm:$0x3] }
 0x848   : > { %8528 = vmatpush3.bf16.msra.mxu1 %v9631_v39  ;;  %8550 = vmatpush3.bf16.msra.mxu0 %v9633_v35 }
 0x849   : > { %8529 = vmatprep.subr.bf16.mxu1 %v9634_v40  ;;  %8551 = vmatprep.subr.bf16.mxu0 %v9636_v61 }
 0x84c   : > { %8530 = vmatpush3.bf16.msra.mxu1 %v9635_v60  ;;  %8552 = vmatpush3.bf16.msra.mxu0 %v9637_v25 }
 0x84d   : > { %8531 = vmatprep.subr.bf16.mxu1 %v9638_v28  ;;  %8553 = vmatprep.subr.bf16.mxu0 %v9640_v62 }
 0x850   : > { %8532 = vmatpush3.bf16.msra.mxu1 %v9639_v33  ;;  %8554 = vmatpush3.bf16.msra.mxu0 %v9641_v0 }
 0x851   : > { %8533 = vmatprep.subr.bf16.mxu1 %v9642_v19  ;;  %8555 = vmatprep.subr.bf16.mxu0 %v9644_v1 }
 0x854   : > { %8534 = vmatpush3.bf16.msra.mxu1 %v9643_v27  ;;  %8556 = vmatpush3.bf16.msra.mxu0 %v9645_v32 }
 0x855   : > { %8535 = vmatprep.subr.bf16.mxu1 %v9646_v2  ;;  %8557 = vmatprep.subr.bf16.mxu0 %v9648_v3 }
 0x858   : > { %8536 = vmatpush3.bf16.msra.mxu1 %v9647_v57  ;;  %8558 = vmatpush3.bf16.msra.mxu0 %v9649_v16 }
 0x90e   : > { %v7064_v8 = vpop.f32.mrb[24].mxu1  ;;  %v7105_v11 = vpop.f32.mrb[28].mxu0 }
 0x90f   : > { %v7065_v12 = vadd.f32 %v7064_v8, %v6930_v7  ;;  %v7106_v14 = vadd.f32 %v7105_v11, %v6938_v45  ;;  %v7066_v13 = vpop.f32.mrb[25].mxu1  ;;  %v7107_v26 = vpop.f32.mrb[29].mxu0 }
 0x910   : > { %v7067_v50 = vadd.f32 %v7066_v13, %v6934_v15  ;;  %v7108_v46 = vadd.f32 %v7107_v26, %v6942_v23  ;;  %v7068_v20 = vpop.f32.mrb[26].mxu1  ;;  %v7109_v41 = vpop.f32.mrb[30].mxu0 }
 0x911   : > { %v7069_v43 = vpop.f32.mrb[27].mxu1  ;;  %v7110_v42 = vpop.f32.mrb[31].mxu0 }
 0x912   : > { %v7118_v17 = vcombine.low %v7065_v12, %v7067_v50  ;;  %v7119_v24 = vcombine.low %v7106_v14, %v7108_v46 }
 0x914   : > { %v7126_v21 = vrot.slane %v7118_v17, %v9800_v9  ;;  %v7133_v22 = vrot.slane %v7119_v24, %v9800_v9 }
 0x916   : > { %v7134_v29 = vcombine.low %v7126_v21, %v7133_v22 }
 0x918   : > { %v7136_v30 = vadd.f32 %v7134_v29, %v7113_v18 }
 0x91a   : > { %vm7137_vm3 = vcmp.ge.f32.partialorder %v7136_v30, 1.0 }
 0x91b   : > { %v8258_v31 = vsel %vm7137_vm3, 1.0, %v9701_v44 }
 0x91c   : > { %vm7140_vm4 = vcmp.gt.f32.partialorder %v8258_v31, 0.0  ;;  %v7151_v54 = vrot.slane %v8258_v31, %v9800_v9  ;;  %v7144_v48 = vcombine.high %v8258_v31, %v8258_v31 }
 0x91d   : > { %v7141_v34 = vsel %vm7140_vm4, 0.0, %v7136_v30 }
 0x91e   : > { %7142 = vst [vmem:[#allocation5] sm:$0xff] %v7141_v34  ;;  %v7159_v5 = vcombine.high %v7151_v54, %v7151_v54  ;;  %v7158_v36 = vrot.slane %v7144_v48, %v9800_v9  ;;  %v7165_v10 = vpack.c.bf16 %v7151_v54, %v7151_v54 }
 0x920   : > { %v7166_v37 = vpack.c.bf16 %v7159_v5, %v7159_v5  ;;  %v7160_v38 = vcombine.high %v7158_v36, %v7158_v36  ;;  %v7167_v4 = vpack.c.bf16 %v7158_v36, %v7158_v36 }
 0x922   : > { %7457 = vmatprep.mubr.bf16.mxu1 %v7166_v37  ;;  %v7168_v47 = vpack.c.bf16 %v7160_v38, %v7160_v38 }
 0x923   : > { %7458 = vmatmul.mubr.bf16.vlgmr.msra.gmra.mrb[28].mxu1 %v7165_v10 }
 0x924   : > { %7497 = vmatprep.mubr.bf16.mxu0 %v7168_v47 }
 0x925   : > { %7498 = vmatmul.mubr.bf16.vlgmr.msra.gmra.mrb[32].mxu0 %v7167_v4 }
 0x9f6   : > { %v8537_v63 = vpop.f32.mrb[28].mxu1 }
 0x9f7   : > { %v8538_v44 = vpop.f32.mrb[29].mxu1 }
 0x9f8   : > { %v8539_v52 = vadd.f32 %v8538_v44, %v8537_v63  ;;  %v8540_v53 = vpop.f32.mrb[30].mxu1  ;;  %v8559_v55 = vpop.f32.mrb[32].mxu0 }
 0x9f9   : > { %v8541_v56 = vpop.f32.mrb[31].mxu1  ;;  %v8560_v58 = vpop.f32.mrb[33].mxu0 }
 0x9fa   : > { %v8561_v6 = vadd.f32 %v8560_v58, %v8559_v55  ;;  %v8562_v39 = vpop.f32.mrb[34].mxu0  ;;  %7511 = sbr.rel (%p8291_p4) target bundleno = 2571 (0xa0b), region = 84 }
 0x9fb   : > { %v8563_v9 = vpop.f32.mrb[35].mxu0 }
 0x9fc   : > { %v7500_v35 = vadd.f32 %v8561_v6, %v8539_v52 }
 0x9fe   : > { %v7506_v40 = vadd.f32 %v7505_v51, %v7500_v35 }
 0xa00   : > { %7507 = vst [vmem:[#allocation6] sm:$0x3] %v7506_v40 }
 0xa07   : > { %v7512_v60 = vld [vmem:[#allocation6] sm:$0x3] }
 0xa08   : > { %v7513_v61 = vmul.f32 0.125, %v7512_v60 }
 0xa0a   : > { %7514 = vst [vmem:[#allocation7] sm:$0x3] %v7513_v61 }
 0xa0b PF: > { %p8641_p5 = scmp.eq.s32.totalorder %s9786_s30, 7  ;;  %s9704_s17 = smov [#allocation7]  }
 0xa0c   : > { %s7522_s18 = sshll.u32 %s9704_s17, 4  ;;  %s7523_s18 = int_to_ptr.vmem [resolvable:$true] %s7522_s18 }
 0xa0d   : > { %s9660_s19 = scalar_lea.vmem %s7523_s18, 32  ;;  %p9667_p9 = scmp.lt.s32.totalorder %s7523_s18, %s7523_s18 }
 0xa0e   : > { %p9661_p6 = scmp.ne.s32.totalorder %s7523_s18, %s9660_s19  ;;  %p9668_p10 = scmp.lt.s32.totalorder %s9660_s19, %s9660_s19 }
 0xa10   : > { %p9662_p7 = pnand %p9661_p6, %p8641_p5  ;;  %p9669_p11 = por %p9668_p10, %p9667_p9 }
 0xa12   : > { %p9663_p8 = pneg %p9662_p7 }
 0xa14   : > { %p9670_p12 = pnand %p9669_p11, %p9663_p8 }
 0xa16   : > { %9673 = shalt.err (!%p9670_p12)
}
 0xa17   : > { %s9674_s22 = scalar_lea.hbm %s12425_s14, 32 }
 0xa18   : > { %p9675_p13 = scmp.ne.s32.totalorder %s12425_s14, %s9674_s22  ;;  %p9680_p2 = scmp.lt.u32.totalorder %s9674_s22, %s12425_s14 }
 0xa1a   : > { %p9676_p0 = pnand %p9675_p13, %p8641_p5 }
 0xa1c   : > { %p9677_p1 = pneg %p9676_p0 }
 0xa1e   : > { %p9682_p3 = pnand %p9680_p2, %p9677_p1 }
 0xa20   : > { %9685 = shalt.err (!%p9682_p3)
}
 0xa21   : > { %8638 = dma.vmem_to_hbm [thread:$0]  (%p8641_p5), %s7523_s18, 32, %s12425_s14, [#allocation8]  }
 0xa22   : > { %9691 = dma.done.wait (%p8641_p5), [#allocation8], 32  }
 0xa23   : > { %9693 = vsyncadd (%p8641_p5), [#allocation8], 4294967264 }
 0xa24 PF: > { %s25_s29 = sadd.s32 1, %s9696_s29  }
 0xa25   : > { %p22_p4 = scmp.ge.s32.totalorder %s25_s29, 10  }
 0xa27   :  { %24 = sbr.rel (!%p22_p4) target bundleno = 1 (0x1), region = 108 }
 0xa2e   :  { %7535 = vsyncpa [#allocation8], 1 }
 0xa2f   :  { %7537 = vsyncpa [#allocation8 + $0x1], 1 }

</bundles_post_ra>
